<compile_context>
chip_gen: v7x
topology: tpu7x:2x2x1
jax: 0.10.0
libtpu: 0.0.40
codegen_flags: <defaults>
</compile_context>

<pallas_src>
import functools
import jax
import jax.numpy as jnp
from jax.experimental import pallas as pl
from jax.experimental.pallas import tpu as pltpu

_SQRT2_INV = 0.7071067811865476
_C = 128  # unified (padded) channel width for the whole conv stack


def _fullspec(shape):
    n = len(shape)
    return pl.BlockSpec(shape, lambda i, _n=n: (0,) * _n)


def _erf(x):
    # Abramowitz & Stegun 7.1.26, |err| <= 1.5e-7; uses only exp/abs/select.
    p = 0.3275911
    a1, a2, a3, a4, a5 = (0.254829592, -0.284496736, 1.421413741,
                          -1.453152027, 1.061405429)
    ax = jnp.abs(x)
    t = 1.0 / (1.0 + p * ax)
    poly = ((((a5 * t + a4) * t + a3) * t + a2) * t + a1) * t
    y = 1.0 - poly * jnp.exp(-ax * ax)
    return jnp.where(x >= 0.0, y, -y)


def _gelu(x):
    # PyTorch nn.GELU() default (erf-based), f32
    return 0.5 * x * (1.0 + _erf(x * _SQRT2_INV))


def _sigmoid(x):
    return 1.0 / (1.0 + jnp.exp(-x))


# --------------------------------------------------------------------------------------
# The single fused kernel.
# --------------------------------------------------------------------------------------
def fused_forward_kernel(*refs, L, H, num_layers):
    it = iter(refs)
    gm_ref = next(it)                                   # (B, L, 8) f32
    x_ref = next(it)                                    # (B, num_features) f32
    conv = [(next(it), next(it), next(it)) for _ in range(4)]       # (w(3,C,C), sc, bi)
    gru = [(next(it), next(it), next(it), next(it)) for _ in range(num_layers)]
    sw_ref = next(it)                                   # (2H, 12) bf16
    dw1_ref = next(it)
    dw2_ref = next(it)
    dw3_ref = next(it)
    scg_ref = next(it)
    big_ref = next(it)
    scx_ref = next(it)
    bix_ref = next(it)
    wg_ref = next(it)                                   # (1, 12)  f32
    wx_ref = next(it)                                   # (1, 128) f32
    bh_ref = next(it)                                   # (1, 1)   f32
    o_ref = next(it)                                    # (B, 1)   f32 output
    pad_ref = next(it)                                  # (B, L+2, C) f32 scratch
    assert next(it, None) is None

    B = gm_ref.shape[0]
    C = _C

    # ------------------------------ conv stack ------------------------------
    pad_ref[...] = jnp.zeros_like(pad_ref)
    pad_ref[:, 1:L + 1, :8] = gm_ref[...]               # 8 real input channels

    def conv_stage(Lc, w_ref, sc_ref, bi_ref, pool):
        # Three shifted K=128 taps accumulated in f32 (no materialized im2col slab).
        acc = None
        for k in range(3):
            xk = pad_ref[:, k:k + Lc, :].reshape(B * Lc, C).astype(jnp.bfloat16)
            contrib = jnp.dot(xk, w_ref[k], preferred_element_type=jnp.float32)
            acc = contrib if acc is None else acc + contrib
        y = _gelu(acc * sc_ref[...] + bi_ref[...]).reshape(B, Lc, C)
        if pool:                                         # AvgPool1d(2, 2)
            y4 = y.reshape(B, Lc // 2, 2, C)
            y = (y4[:, :, 0, :] + y4[:, :, 1, :]) * 0.5
        return y

    y = conv_stage(L, *conv[0], pool=False)              # c1
    Lc = L
    for stage in range(1, 4):                            # three c2 blocks
        pad_ref[:, 1:Lc + 1, :] = y
        pad_ref[:, Lc + 1:Lc + 2, :] = jnp.zeros((B, 1, C), jnp.float32)  # re-zero pad
        y = conv_stage(Lc, *conv[stage], pool=True)
        Lc = Lc // 2
    T = Lc                                               # = L // 8

    # ------------------------------ bidirectional GRU ------------------------------
    # Gate column layout everywhere: [rf rb zf zb nf nb], each H lanes wide.
    H2, H4, H6 = 2 * H, 4 * H, 6 * H
    seq = y                                              # (B, T, Cin) value
    hs = None
    for li, (wih_ref, whh_ref, bx_ref, bhn_ref) in enumerate(gru):
        Cin = seq.shape[2]
        X = seq.reshape(B * T, Cin).astype(jnp.bfloat16)
        gx = (jnp.dot(X, wih_ref[...], preferred_element_type=jnp.float32)
              + bx_ref[...]).reshape(B, T, H6)

        # Hoist backward-direction time realignment + lane slicing out of the loop.
        gA = [jnp.concatenate([gx[:, s, 0:H], gx[:, T - 1 - s, H:H2],
                               gx[:, s, H2:3 * H], gx[:, T - 1 - s, 3 * H:H4]],
                              axis=-1) for s in range(T)]           # (B, 4H) r|z
        gN = [jnp.concatenate([gx[:, s, H4:5 * H], gx[:, T - 1 - s, 5 * H:H6]],
                              axis=-1) for s in range(T)]           # (B, 2H) n

        whh = whh_ref[...]                               # (2H, 6H) bf16, block-diag
        bhn = bhn_ref[...]                               # (1, 2H) f32
        h = jnp.zeros((B, H2), jnp.float32)              # [hf | hb]
        hs = []
        for s in range(T):                               # static unroll: T = L/8 is tiny
            if s == 0:                                   # h == 0 -> skip the matmul
                gh_rz = jnp.zeros((B, H4), jnp.float32)
                gh_n = jnp.zeros((B, H2), jnp.float32)
            else:
                gh = jnp.dot(h.astype(jnp.bfloat16), whh,
                             preferred_element_type=jnp.float32)    # one fused matmul
                gh_rz = gh[:, 0:H4]
                gh_n = gh[:, H4:H6]
            rz = _sigmoid(gA[s] + gh_rz)                 # one sigmoid over 4H lanes
            r = rz[:, 0:H2]
            z = rz[:, H2:H4]
            n = jnp.tanh(gN[s] + r * (gh_n + bhn))       # one tanh over 2H lanes
            h = (1.0 - z) * n + z * h
            hs.append(h)

        if li + 1 < num_layers:                          # feed next layer as a value
            seq = jnp.stack(
                [jnp.concatenate([hs[t][:, 0:H], hs[T - 1 - t][:, H:H2]], axis=-1)
                 for t in range(T)], axis=1)             # (B, T, 2H), time-aligned

    # out[:, -1, :] = [fwd state after last step | bwd state after first step]
    g_last = jnp.concatenate([hs[T - 1][:, 0:H], hs[0][:, H:H2]], axis=-1)  # (B, 2H)

    # ------------------------------ tail ------------------------------
    gs = jnp.dot(g_last.astype(jnp.bfloat16), sw_ref[...],
                 preferred_element_type=jnp.float32)                 # (B, 12)
    gb = gs * scg_ref[...] + big_ref[...]                            # BN (first 12 ch)

    xh = jnp.dot(x_ref[...].astype(jnp.bfloat16), dw1_ref[...],
                 preferred_element_type=jnp.float32)
    xh = jnp.maximum(xh, 0.0)
    xh = jnp.dot(xh.astype(jnp.bfloat16), dw2_ref[...],
                 preferred_element_type=jnp.float32)
    xh = jnp.maximum(xh, 0.0)
    xf = jnp.dot(xh.astype(jnp.bfloat16), dw3_ref[...],
                 preferred_element_type=jnp.float32)
    xb = xf * scx_ref[...] + bix_ref[...]                            # BN (last 128 ch)

    # Linear(140, 1) as two lane reductions (cheaper than two N=1 matmuls)
    out = (jnp.sum(gb * wg_ref[...], axis=-1, keepdims=True)
           + jnp.sum(xb * wx_ref[...], axis=-1, keepdims=True)
           + bh_ref[...])
    # numerically stable softplus
    o_ref[...] = jnp.maximum(out, 0.0) + jnp.log(1.0 + jnp.exp(-jnp.abs(out)))


# --------------------------------------------------------------------------------------
# Deterministic parameter init (shapes follow the PyTorch __init__).
# BN (eval) + conv bias folded into per-channel scale/bias; conv channels padded to 128;
# conv taps stored per-tap (3, 128, 128); GRU weights pre-fused into the
# [rf rb zf zb nf nb] column layout; matmul weights stored as bf16.
# --------------------------------------------------------------------------------------
def init_params(key, hidden_size, num_layers, num_features=24):
    H = hidden_size
    eps = 1e-5
    keys = iter(jax.random.split(key, 256))

    def rnd(shape, scale=0.05):
        return jax.random.normal(next(keys), shape, dtype=jnp.float32) * scale

    def bn_fold(c, conv_bias):
        gamma = 1.0 + rnd((c,))
        beta = rnd((c,))
        mean = rnd((c,))
        var = 1.0 + jnp.abs(rnd((c,)))
        scale = gamma / jnp.sqrt(var + eps)
        bias = beta + (conv_bias - mean) * scale
        return scale, bias

    C = _C
    params = {"conv": []}

    # c1: Conv2d(4->128, (2,3), pad (0,1)) + BN2d(128) + GELU
    w2d = rnd((128, 4, 2, 3), 0.1)
    b1 = rnd((128,))
    wtap = jnp.zeros((3, C, C), jnp.float32)
    for k in range(3):
        wtap = wtap.at[k, :8, :].set(w2d[:, :, :, k].reshape(128, 8).T)
    sc, bi = bn_fold(128, b1)
    params["conv"].append({"w": wtap.astype(jnp.bfloat16),
                           "scale": sc.reshape(1, C), "bias": bi.reshape(1, C)})

    # c2: Conv1d+BN1d+GELU+AvgPool blocks, channels zero-padded 108 -> 128
    for cin, cout in [(128, 108), (108, 108), (108, 128)]:
        w1d = rnd((cout, cin, 3), 0.1)
        b = rnd((cout,))
        wtap = jnp.zeros((3, C, C), jnp.float32)
        for k in range(3):
            wtap = wtap.at[k, :cin, :cout].set(w1d[:, :, k].T)
        sc, bi = bn_fold(cout, b)
        scp = jnp.zeros((C,), jnp.float32).at[:cout].set(sc)
        bip = jnp.zeros((C,), jnp.float32).at[:cout].set(bi)
        params["conv"].append({"w": wtap.astype(jnp.bfloat16),
                               "scale": scp.reshape(1, C), "bias": bip.reshape(1, C)})

    # GRU(128, H, num_layers, bidirectional), PyTorch gate order r|z|n per direction,
    # fused into column layout [rf rb zf zb nf nb] with block-diag hidden weights.
    params["gru"] = []
    for layer in range(num_layers):
        in_size = C if layer == 0 else 2 * H
        dirs = []
        for _direction in range(2):
            wih = rnd((3 * H, in_size), 0.1)             # rows [r; z; n]
            whh = rnd((3 * H, H), 0.1)
            bih = rnd((3 * H,))
            bhh = rnd((3 * H,))
            dirs.append((wih, whh, bih, bhh))
        (wih_f, whh_f, bih_f, bhh_f), (wih_b, whh_b, bih_b, bhh_b) = dirs

        def gate(m, i):
            return m[i * H:(i + 1) * H]

        wih_cat = jnp.concatenate(
            [gate(wih_f, 0).T, gate(wih_b, 0).T, gate(wih_f, 1).T, gate(wih_b, 1).T,
             gate(wih_f, 2).T, gate(wih_b, 2).T], axis=1)            # (Cin, 6H)
        Z = jnp.zeros((H, H), jnp.float32)
        top = jnp.concatenate([gate(whh_f, 0).T, Z, gate(whh_f, 1).T, Z,
                               gate(whh_f, 2).T, Z], axis=1)
        bot = jnp.concatenate([Z, gate(whh_b, 0).T, Z, gate(whh_b, 1).T,
                               Z, gate(whh_b, 2).T], axis=1)
        whh_cat = jnp.concatenate([top, bot], axis=0)                # (2H, 6H)

        # r/z hidden biases are safe to fold into the input projection; the n hidden
        # bias stays inside r*(...) per PyTorch semantics.
        bx = jnp.concatenate(
            [gate(bih_f, 0) + gate(bhh_f, 0), gate(bih_b, 0) + gate(bhh_b, 0),
             gate(bih_f, 1) + gate(bhh_f, 1), gate(bih_b, 1) + gate(bhh_b, 1),
             gate(bih_f, 2), gate(bih_b, 2)]).reshape(1, 6 * H)
        bhn = jnp.concatenate([gate(bhh_f, 2), gate(bhh_b, 2)]).reshape(1, 2 * H)

        params["gru"].append({"wih": wih_cat.astype(jnp.bfloat16),
                              "whh": whh_cat.astype(jnp.bfloat16),
                              "bx": bx, "bhn": bhn})

    # s: Linear(2H, 12, bias=False)
    params["s_w"] = rnd((12, 2 * H), 0.1).T.astype(jnp.bfloat16)

    # d: Linear(nf,96) -> Linear(96,64) -> Linear(64,128), all bias=False
    params["d"] = {"w1": rnd((96, num_features), 0.1).T.astype(jnp.bfloat16),
                   "w2": rnd((64, 96), 0.1).T.astype(jnp.bfloat16),
                   "w3": rnd((128, 64), 0.1).T.astype(jnp.bfloat16)}

    # head: BatchNorm1d(140) eval + Linear(140, 1, bias=True)
    gamma = 1.0 + rnd((140,))
    beta = rnd((140,))
    mean = rnd((140,))
    var = 1.0 + jnp.abs(rnd((140,)))
    scale = gamma / jnp.sqrt(var + eps)
    bias = beta - mean * scale
    wh = rnd((1, 140), 0.1)
    bh = rnd((1,))
    params["head"] = {
        "scale_g": scale[:12].reshape(1, 12), "bias_g": bias[:12].reshape(1, 12),
        "scale_x": scale[12:].reshape(1, 128), "bias_x": bias[12:].reshape(1, 128),
        "w_g": wh[:, :12],                               # (1, 12)  f32 (lane reduction)
        "w_x": wh[:, 12:],                               # (1, 128) f32 (lane reduction)
        "b": bh.reshape(1, 1),
    }
    return params


# --------------------------------------------------------------------------------------
# Full forward pass: ONE pallas_call; the only wrapper op is the channels-last relayout.
# --------------------------------------------------------------------------------------
def gene_interaction_forward(params, g, x):
    B = g.shape[0]
    L = g.shape[3]
    num_layers = len(params["gru"])
    H = params["gru"][0]["bhn"].shape[1] // 2

    # merge (in_ch=4, H=2) -> 8 channels, channels-last (single small XLA layout op)
    gm = jnp.transpose(g, (0, 3, 1, 2)).reshape(B, L, 8).astype(jnp.float32)

    args = [gm, x.astype(jnp.float32)]
    for blk in params["conv"]:
        args += [blk["w"], blk["scale"], blk["bias"]]
    for lp in params["gru"]:
        args += [lp["wih"], lp["whh"], lp["bx"], lp["bhn"]]
    d, hp = params["d"], params["head"]
    args += [params["s_w"], d["w1"], d["w2"], d["w3"],
             hp["scale_g"], hp["bias_g"], hp["scale_x"], hp["bias_x"],
             hp["w_g"], hp["w_x"], hp["b"]]

    kernel = functools.partial(fused_forward_kernel, L=L, H=H, num_layers=num_layers)
    return pl.pallas_call(
        kernel,
        out_shape=jax.ShapeDtypeStruct((B, 1), jnp.float32),
        grid=(1,),
        in_specs=[_fullspec(a.shape) for a in args],
        out_specs=_fullspec((B, 1)),
        scratch_shapes=[pltpu.VMEM((B, L + 2, _C), jnp.float32)],
    )(*args)


if __name__ == "__main__":
    B, L = 2, 24                      # L divisible by 8 so the three AvgPools stay exact
    hidden_size, num_layers, num_features = 16, 2, 24

    key = jax.random.PRNGKey(0)
    kp, kg, kx = jax.random.split(key, 3)
    params = init_params(kp, hidden_size, num_layers, num_features)

    g = jax.random.normal(kg, (B, 4, 2, L), dtype=jnp.float32)  # NCHW like the PyTorch module
    x = jax.random.normal(kx, (B, num_features), dtype=jnp.float32)

    fwd = jax.jit(gene_interaction_forward)
    out = jax.block_until_ready(fwd(params, g, x))
    assert out.shape == (B, 1)
    assert bool(jnp.all(out >= 0.0))  # softplus output is non-negative
    print("KERNEL_OK")
</pallas_src>

<mosaic_0001>
module attributes {stable_mosaic.version = 11 : i64} {
  func.func @fused_forward_kernel(%arg0: i32, %arg1: memref<2x24x8xf32, #tpu.memory_space<vmem>>, %arg2: memref<2x24xf32, #tpu.memory_space<vmem>>, %arg3: memref<3x128x128xbf16, #tpu.memory_space<vmem>>, %arg4: memref<1x128xf32, #tpu.memory_space<vmem>>, %arg5: memref<1x128xf32, #tpu.memory_space<vmem>>, %arg6: memref<3x128x128xbf16, #tpu.memory_space<vmem>>, %arg7: memref<1x128xf32, #tpu.memory_space<vmem>>, %arg8: memref<1x128xf32, #tpu.memory_space<vmem>>, %arg9: memref<3x128x128xbf16, #tpu.memory_space<vmem>>, %arg10: memref<1x128xf32, #tpu.memory_space<vmem>>, %arg11: memref<1x128xf32, #tpu.memory_space<vmem>>, %arg12: memref<3x128x128xbf16, #tpu.memory_space<vmem>>, %arg13: memref<1x128xf32, #tpu.memory_space<vmem>>, %arg14: memref<1x128xf32, #tpu.memory_space<vmem>>, %arg15: memref<128x96xbf16, #tpu.memory_space<vmem>>, %arg16: memref<32x96xbf16, #tpu.memory_space<vmem>>, %arg17: memref<1x96xf32, #tpu.memory_space<vmem>>, %arg18: memref<1x32xf32, #tpu.memory_space<vmem>>, %arg19: memref<32x96xbf16, #tpu.memory_space<vmem>>, %arg20: memref<32x96xbf16, #tpu.memory_space<vmem>>, %arg21: memref<1x96xf32, #tpu.memory_space<vmem>>, %arg22: memref<1x32xf32, #tpu.memory_space<vmem>>, %arg23: memref<32x12xbf16, #tpu.memory_space<vmem>>, %arg24: memref<24x96xbf16, #tpu.memory_space<vmem>>, %arg25: memref<96x64xbf16, #tpu.memory_space<vmem>>, %arg26: memref<64x128xbf16, #tpu.memory_space<vmem>>, %arg27: memref<1x12xf32, #tpu.memory_space<vmem>>, %arg28: memref<1x12xf32, #tpu.memory_space<vmem>>, %arg29: memref<1x128xf32, #tpu.memory_space<vmem>>, %arg30: memref<1x128xf32, #tpu.memory_space<vmem>>, %arg31: memref<1x12xf32, #tpu.memory_space<vmem>>, %arg32: memref<1x128xf32, #tpu.memory_space<vmem>>, %arg33: memref<1x1xf32, #tpu.memory_space<vmem>>, %arg34: memref<2x1xf32, #tpu.memory_space<vmem>>, %arg35: memref<2x26x128xf32, #tpu.memory_space<vmem>>) attributes {dimension_semantics = [#tpu.dimension_semantics<arbitrary>], iteration_bounds = array<i64: 1>, scalar_prefetch = 0 : i64, scratch_operands = 1 : i64, tpu.core_type = #tpu.core_type<tc>, window_params = [{pipeline_mode = #tpu.pipeline_mode<synchronous>, transform_indices = @transform_0, window_bounds = array<i64: 2, 24, 8>}, {pipeline_mode = #tpu.pipeline_mode<synchronous>, transform_indices = @transform_1, window_bounds = array<i64: 2, 24>}, {pipeline_mode = #tpu.pipeline_mode<synchronous>, transform_indices = @transform_2, window_bounds = array<i64: 3, 128, 128>}, {pipeline_mode = #tpu.pipeline_mode<synchronous>, transform_indices = @transform_3, window_bounds = array<i64: 1, 128>}, {pipeline_mode = #tpu.pipeline_mode<synchronous>, transform_indices = @transform_4, window_bounds = array<i64: 1, 128>}, {pipeline_mode = #tpu.pipeline_mode<synchronous>, transform_indices = @transform_5, window_bounds = array<i64: 3, 128, 128>}, {pipeline_mode = #tpu.pipeline_mode<synchronous>, transform_indices = @transform_6, window_bounds = array<i64: 1, 128>}, {pipeline_mode = #tpu.pipeline_mode<synchronous>, transform_indices = @transform_7, window_bounds = array<i64: 1, 128>}, {pipeline_mode = #tpu.pipeline_mode<synchronous>, transform_indices = @transform_8, window_bounds = array<i64: 3, 128, 128>}, {pipeline_mode = #tpu.pipeline_mode<synchronous>, transform_indices = @transform_9, window_bounds = array<i64: 1, 128>}, {pipeline_mode = #tpu.pipeline_mode<synchronous>, transform_indices = @transform_10, window_bounds = array<i64: 1, 128>}, {pipeline_mode = #tpu.pipeline_mode<synchronous>, transform_indices = @transform_11, window_bounds = array<i64: 3, 128, 128>}, {pipeline_mode = #tpu.pipeline_mode<synchronous>, transform_indices = @transform_12, window_bounds = array<i64: 1, 128>}, {pipeline_mode = #tpu.pipeline_mode<synchronous>, transform_indices = @transform_13, window_bounds = array<i64: 1, 128>}, {pipeline_mode = #tpu.pipeline_mode<synchronous>, transform_indices = @transform_14, window_bounds = array<i64: 128, 96>}, {pipeline_mode = #tpu.pipeline_mode<synchronous>, transform_indices = @transform_15, window_bounds = array<i64: 32, 96>}, {pipeline_mode = #tpu.pipeline_mode<synchronous>, transform_indices = @transform_16, window_bounds = array<i64: 1, 96>}, {pipeline_mode = #tpu.pipeline_mode<synchronous>, transform_indices = @transform_17, window_bounds = array<i64: 1, 32>}, {pipeline_mode = #tpu.pipeline_mode<synchronous>, transform_indices = @transform_18, window_bounds = array<i64: 32, 96>}, {pipeline_mode = #tpu.pipeline_mode<synchronous>, transform_indices = @transform_19, window_bounds = array<i64: 32, 96>}, {pipeline_mode = #tpu.pipeline_mode<synchronous>, transform_indices = @transform_20, window_bounds = array<i64: 1, 96>}, {pipeline_mode = #tpu.pipeline_mode<synchronous>, transform_indices = @transform_21, window_bounds = array<i64: 1, 32>}, {pipeline_mode = #tpu.pipeline_mode<synchronous>, transform_indices = @transform_22, window_bounds = array<i64: 32, 12>}, {pipeline_mode = #tpu.pipeline_mode<synchronous>, transform_indices = @transform_23, window_bounds = array<i64: 24, 96>}, {pipeline_mode = #tpu.pipeline_mode<synchronous>, transform_indices = @transform_24, window_bounds = array<i64: 96, 64>}, {pipeline_mode = #tpu.pipeline_mode<synchronous>, transform_indices = @transform_25, window_bounds = array<i64: 64, 128>}, {pipeline_mode = #tpu.pipeline_mode<synchronous>, transform_indices = @transform_26, window_bounds = array<i64: 1, 12>}, {pipeline_mode = #tpu.pipeline_mode<synchronous>, transform_indices = @transform_27, window_bounds = array<i64: 1, 12>}, {pipeline_mode = #tpu.pipeline_mode<synchronous>, transform_indices = @transform_28, window_bounds = array<i64: 1, 128>}, {pipeline_mode = #tpu.pipeline_mode<synchronous>, transform_indices = @transform_29, window_bounds = array<i64: 1, 128>}, {pipeline_mode = #tpu.pipeline_mode<synchronous>, transform_indices = @transform_30, window_bounds = array<i64: 1, 12>}, {pipeline_mode = #tpu.pipeline_mode<synchronous>, transform_indices = @transform_31, window_bounds = array<i64: 1, 128>}, {pipeline_mode = #tpu.pipeline_mode<synchronous>, transform_indices = @transform_32, window_bounds = array<i64: 1, 1>}, {pipeline_mode = #tpu.pipeline_mode<synchronous>, transform_indices = @transform_33, window_bounds = array<i64: 2, 1>}]} {
    %cst = arith.constant 0.000000e+00 : f32
    %0 = vector.broadcast %cst : f32 to vector<2x26x128xf32>
    %c0 = arith.constant 0 : index
    %c0_0 = arith.constant 0 : index
    %c0_1 = arith.constant 0 : index
    %1 = vector.load %arg35[%c0, %c0_0, %c0_1] : memref<2x26x128xf32, #tpu.memory_space<vmem>>, vector<2x26x128xf32>
    tpu.vector_store %arg35[%c0, %c0_0, %c0_1], %0 {strides = array<i32>} : memref<2x26x128xf32, #tpu.memory_space<vmem>>, vector<2x26x128xf32>,
    %c0_2 = arith.constant 0 : index
    %c0_3 = arith.constant 0 : index
    %c0_4 = arith.constant 0 : index
    %2 = vector.load %arg1[%c0_2, %c0_3, %c0_4] : memref<2x24x8xf32, #tpu.memory_space<vmem>>, vector<2x24x8xf32>
    %c0_5 = arith.constant 0 : index
    %c1 = arith.constant 1 : index
    %c0_6 = arith.constant 0 : index
    %3 = vector.load %arg35[%c0_5, %c1, %c0_6] : memref<2x26x128xf32, #tpu.memory_space<vmem>>, vector<2x24x8xf32>
    tpu.vector_store %arg35[%c0_5, %c1, %c0_6], %2 {strides = array<i32>} : memref<2x26x128xf32, #tpu.memory_space<vmem>>, vector<2x24x8xf32>,
    %c0_7 = arith.constant 0 : index
    %c0_8 = arith.constant 0 : index
    %c0_9 = arith.constant 0 : index
    %4 = vector.load %arg35[%c0_7, %c0_8, %c0_9] : memref<2x26x128xf32, #tpu.memory_space<vmem>>, vector<2x24x128xf32>
    %5 = vector.shape_cast %4 : vector<2x24x128xf32> to vector<48x128xf32>
    %6 = arith.truncf %5 : vector<48x128xf32> to vector<48x128xbf16>
    %c0_10 = arith.constant 0 : index
    %c0_11 = arith.constant 0 : index
    %c0_12 = arith.constant 0 : index
    %7 = vector.load %arg3[%c0_10, %c0_11, %c0_12] : memref<3x128x128xbf16, #tpu.memory_space<vmem>>, vector<1x128x128xbf16>
    %8 = vector.shape_cast %7 : vector<1x128x128xbf16> to vector<128x128xbf16>
    %cst_13 = arith.constant dense<0.000000e+00> : vector<48x128xf32>
    %9 = tpu.matmul %6, %8, %cst_13 {dimension_numbers = #tpu.dot_dimension_numbers<[1], [0], [0], [1], [0, 0, 1, 1], [], []>} : vector<48x128xbf16>, vector<128x128xbf16>, vector<48x128xf32> -> vector<48x128xf32>
    %c0_14 = arith.constant 0 : index
    %c1_15 = arith.constant 1 : index
    %c0_16 = arith.constant 0 : index
    %10 = vector.load %arg35[%c0_14, %c1_15, %c0_16] : memref<2x26x128xf32, #tpu.memory_space<vmem>>, vector<2x24x128xf32>
    %11 = vector.shape_cast %10 : vector<2x24x128xf32> to vector<48x128xf32>
    %12 = arith.truncf %11 : vector<48x128xf32> to vector<48x128xbf16>
    %c1_17 = arith.constant 1 : index
    %c0_18 = arith.constant 0 : index
    %c0_19 = arith.constant 0 : index
    %13 = vector.load %arg3[%c1_17, %c0_18, %c0_19] : memref<3x128x128xbf16, #tpu.memory_space<vmem>>, vector<1x128x128xbf16>
    %14 = vector.shape_cast %13 : vector<1x128x128xbf16> to vector<128x128xbf16>
    %cst_20 = arith.constant dense<0.000000e+00> : vector<48x128xf32>
    %15 = tpu.matmul %12, %14, %cst_20 {dimension_numbers = #tpu.dot_dimension_numbers<[1], [0], [0], [1], [0, 0, 1, 1], [], []>} : vector<48x128xbf16>, vector<128x128xbf16>, vector<48x128xf32> -> vector<48x128xf32>
    %16 = arith.addf %9, %15 : vector<48x128xf32>
    %c0_21 = arith.constant 0 : index
    %c2 = arith.constant 2 : index
    %c0_22 = arith.constant 0 : index
    %17 = vector.load %arg35[%c0_21, %c2, %c0_22] : memref<2x26x128xf32, #tpu.memory_space<vmem>>, vector<2x24x128xf32>
    %18 = vector.shape_cast %17 : vector<2x24x128xf32> to vector<48x128xf32>
    %19 = arith.truncf %18 : vector<48x128xf32> to vector<48x128xbf16>
    %c2_23 = arith.constant 2 : index
    %c0_24 = arith.constant 0 : index
    %c0_25 = arith.constant 0 : index
    %20 = vector.load %arg3[%c2_23, %c0_24, %c0_25] : memref<3x128x128xbf16, #tpu.memory_space<vmem>>, vector<1x128x128xbf16>
    %21 = vector.shape_cast %20 : vector<1x128x128xbf16> to vector<128x128xbf16>
    %cst_26 = arith.constant dense<0.000000e+00> : vector<48x128xf32>
    %22 = tpu.matmul %19, %21, %cst_26 {dimension_numbers = #tpu.dot_dimension_numbers<[1], [0], [0], [1], [0, 0, 1, 1], [], []>} : vector<48x128xbf16>, vector<128x128xbf16>, vector<48x128xf32> -> vector<48x128xf32>
    %23 = arith.addf %16, %22 : vector<48x128xf32>
    %c0_27 = arith.constant 0 : index
    %c0_28 = arith.constant 0 : index
    %24 = vector.load %arg4[%c0_27, %c0_28] : memref<1x128xf32, #tpu.memory_space<vmem>>, vector<1x128xf32>
    %25 = vector.broadcast %24 : vector<1x128xf32> to vector<48x128xf32>
    %26 = arith.mulf %23, %25 : vector<48x128xf32>
    %c0_29 = arith.constant 0 : index
    %c0_30 = arith.constant 0 : index
    %27 = vector.load %arg5[%c0_29, %c0_30] : memref<1x128xf32, #tpu.memory_space<vmem>>, vector<1x128xf32>
    %28 = vector.broadcast %27 : vector<1x128xf32> to vector<48x128xf32>
    %29 = arith.addf %26, %28 : vector<48x128xf32>
    %cst_31 = arith.constant 5.000000e-01 : f32
    %30 = vector.broadcast %cst_31 : f32 to vector<48x128xf32>
    %31 = arith.mulf %30, %29 : vector<48x128xf32>
    %cst_32 = arith.constant 0.707106769 : f32
    %32 = vector.broadcast %cst_32 : f32 to vector<48x128xf32>
    %33 = arith.mulf %29, %32 : vector<48x128xf32>
    %34 = math.absf %33 : vector<48x128xf32>
    %cst_33 = arith.constant 0.327591091 : f32
    %35 = vector.broadcast %cst_33 : f32 to vector<48x128xf32>
    %36 = arith.mulf %35, %34 : vector<48x128xf32>
    %cst_34 = arith.constant 1.000000e+00 : f32
    %37 = vector.broadcast %cst_34 : f32 to vector<48x128xf32>
    %38 = arith.addf %37, %36 : vector<48x128xf32>
    %cst_35 = arith.constant 1.000000e+00 : f32
    %39 = vector.broadcast %cst_35 : f32 to vector<48x128xf32>
    %40 = arith.divf %39, %38 : vector<48x128xf32>
    %cst_36 = arith.constant 1.06140542 : f32
    %41 = vector.broadcast %cst_36 : f32 to vector<48x128xf32>
    %42 = arith.mulf %41, %40 : vector<48x128xf32>
    %cst_37 = arith.constant -1.45315206 : f32
    %43 = vector.broadcast %cst_37 : f32 to vector<48x128xf32>
    %44 = arith.addf %42, %43 : vector<48x128xf32>
    %45 = arith.mulf %44, %40 : vector<48x128xf32>
    %cst_38 = arith.constant 1.42141378 : f32
    %46 = vector.broadcast %cst_38 : f32 to vector<48x128xf32>
    %47 = arith.addf %45, %46 : vector<48x128xf32>
    %48 = arith.mulf %47, %40 : vector<48x128xf32>
    %cst_39 = arith.constant -0.284496725 : f32
    %49 = vector.broadcast %cst_39 : f32 to vector<48x128xf32>
    %50 = arith.addf %48, %49 : vector<48x128xf32>
    %51 = arith.mulf %50, %40 : vector<48x128xf32>
    %cst_40 = arith.constant 0.254829586 : f32
    %52 = vector.broadcast %cst_40 : f32 to vector<48x128xf32>
    %53 = arith.addf %51, %52 : vector<48x128xf32>
    %54 = arith.mulf %53, %40 : vector<48x128xf32>
    %cst_41 = arith.constant 0.000000e+00 : f32
    %55 = vector.broadcast %cst_41 : f32 to vector<48x128xf32>
    %56 = arith.subf %55, %34 : vector<48x128xf32>
    %57 = arith.mulf %56, %34 : vector<48x128xf32>
    %58 = math.exp %57 : vector<48x128xf32>
    %59 = arith.mulf %54, %58 : vector<48x128xf32>
    %cst_42 = arith.constant 1.000000e+00 : f32
    %60 = vector.broadcast %cst_42 : f32 to vector<48x128xf32>
    %61 = arith.subf %60, %59 : vector<48x128xf32>
    %cst_43 = arith.constant 0.000000e+00 : f32
    %62 = vector.broadcast %cst_43 : f32 to vector<48x128xf32>
    %63 = arith.cmpf oge, %33, %62 : vector<48x128xf32>
    %cst_44 = arith.constant 0.000000e+00 : f32
    %64 = vector.broadcast %cst_44 : f32 to vector<48x128xf32>
    %65 = arith.subf %64, %61 : vector<48x128xf32>
    %66 = arith.select %63, %61, %65 : vector<48x128xi1>, vector<48x128xf32>
    %cst_45 = arith.constant 1.000000e+00 : f32
    %67 = vector.broadcast %cst_45 : f32 to vector<48x128xf32>
    %68 = arith.addf %67, %66 : vector<48x128xf32>
    %69 = arith.mulf %31, %68 : vector<48x128xf32>
    %70 = vector.shape_cast %69 : vector<48x128xf32> to vector<2x24x128xf32>
    %c0_46 = arith.constant 0 : index
    %c1_47 = arith.constant 1 : index
    %c0_48 = arith.constant 0 : index
    %71 = vector.load %arg35[%c0_46, %c1_47, %c0_48] : memref<2x26x128xf32, #tpu.memory_space<vmem>>, vector<2x24x128xf32>
    tpu.vector_store %arg35[%c0_46, %c1_47, %c0_48], %70 {strides = array<i32>} : memref<2x26x128xf32, #tpu.memory_space<vmem>>, vector<2x24x128xf32>,
    %cst_49 = arith.constant 0.000000e+00 : f32
    %72 = vector.broadcast %cst_49 : f32 to vector<2x1x128xf32>
    %c0_50 = arith.constant 0 : index
    %c25 = arith.constant 25 : index
    %c0_51 = arith.constant 0 : index
    %73 = vector.load %arg35[%c0_50, %c25, %c0_51] : memref<2x26x128xf32, #tpu.memory_space<vmem>>, vector<2x1x128xf32>
    tpu.vector_store %arg35[%c0_50, %c25, %c0_51], %72 {strides = array<i32>} : memref<2x26x128xf32, #tpu.memory_space<vmem>>, vector<2x1x128xf32>,
    %c0_52 = arith.constant 0 : index
    %c0_53 = arith.constant 0 : index
    %c0_54 = arith.constant 0 : index
    %74 = vector.load %arg35[%c0_52, %c0_53, %c0_54] : memref<2x26x128xf32, #tpu.memory_space<vmem>>, vector<2x24x128xf32>
    %75 = vector.shape_cast %74 : vector<2x24x128xf32> to vector<48x128xf32>
    %76 = arith.truncf %75 : vector<48x128xf32> to vector<48x128xbf16>
    %c0_55 = arith.constant 0 : index
    %c0_56 = arith.constant 0 : index
    %c0_57 = arith.constant 0 : index
    %77 = vector.load %arg6[%c0_55, %c0_56, %c0_57] : memref<3x128x128xbf16, #tpu.memory_space<vmem>>, vector<1x128x128xbf16>
    %78 = vector.shape_cast %77 : vector<1x128x128xbf16> to vector<128x128xbf16>
    %cst_58 = arith.constant dense<0.000000e+00> : vector<48x128xf32>
    %79 = tpu.matmul %76, %78, %cst_58 {dimension_numbers = #tpu.dot_dimension_numbers<[1], [0], [0], [1], [0, 0, 1, 1], [], []>} : vector<48x128xbf16>, vector<128x128xbf16>, vector<48x128xf32> -> vector<48x128xf32>
    %c0_59 = arith.constant 0 : index
    %c1_60 = arith.constant 1 : index
    %c0_61 = arith.constant 0 : index
    %80 = vector.load %arg35[%c0_59, %c1_60, %c0_61] : memref<2x26x128xf32, #tpu.memory_space<vmem>>, vector<2x24x128xf32>
    %81 = vector.shape_cast %80 : vector<2x24x128xf32> to vector<48x128xf32>
    %82 = arith.truncf %81 : vector<48x128xf32> to vector<48x128xbf16>
    %c1_62 = arith.constant 1 : index
    %c0_63 = arith.constant 0 : index
    %c0_64 = arith.constant 0 : index
    %83 = vector.load %arg6[%c1_62, %c0_63, %c0_64] : memref<3x128x128xbf16, #tpu.memory_space<vmem>>, vector<1x128x128xbf16>
    %84 = vector.shape_cast %83 : vector<1x128x128xbf16> to vector<128x128xbf16>
    %cst_65 = arith.constant dense<0.000000e+00> : vector<48x128xf32>
    %85 = tpu.matmul %82, %84, %cst_65 {dimension_numbers = #tpu.dot_dimension_numbers<[1], [0], [0], [1], [0, 0, 1, 1], [], []>} : vector<48x128xbf16>, vector<128x128xbf16>, vector<48x128xf32> -> vector<48x128xf32>
    %86 = arith.addf %79, %85 : vector<48x128xf32>
    %c0_66 = arith.constant 0 : index
    %c2_67 = arith.constant 2 : index
    %c0_68 = arith.constant 0 : index
    %87 = vector.load %arg35[%c0_66, %c2_67, %c0_68] : memref<2x26x128xf32, #tpu.memory_space<vmem>>, vector<2x24x128xf32>
    %88 = vector.shape_cast %87 : vector<2x24x128xf32> to vector<48x128xf32>
    %89 = arith.truncf %88 : vector<48x128xf32> to vector<48x128xbf16>
    %c2_69 = arith.constant 2 : index
    %c0_70 = arith.constant 0 : index
    %c0_71 = arith.constant 0 : index
    %90 = vector.load %arg6[%c2_69, %c0_70, %c0_71] : memref<3x128x128xbf16, #tpu.memory_space<vmem>>, vector<1x128x128xbf16>
    %91 = vector.shape_cast %90 : vector<1x128x128xbf16> to vector<128x128xbf16>
    %cst_72 = arith.constant dense<0.000000e+00> : vector<48x128xf32>
    %92 = tpu.matmul %89, %91, %cst_72 {dimension_numbers = #tpu.dot_dimension_numbers<[1], [0], [0], [1], [0, 0, 1, 1], [], []>} : vector<48x128xbf16>, vector<128x128xbf16>, vector<48x128xf32> -> vector<48x128xf32>
    %93 = arith.addf %86, %92 : vector<48x128xf32>
    %c0_73 = arith.constant 0 : index
    %c0_74 = arith.constant 0 : index
    %94 = vector.load %arg7[%c0_73, %c0_74] : memref<1x128xf32, #tpu.memory_space<vmem>>, vector<1x128xf32>
    %95 = vector.broadcast %94 : vector<1x128xf32> to vector<48x128xf32>
    %96 = arith.mulf %93, %95 : vector<48x128xf32>
    %c0_75 = arith.constant 0 : index
    %c0_76 = arith.constant 0 : index
    %97 = vector.load %arg8[%c0_75, %c0_76] : memref<1x128xf32, #tpu.memory_space<vmem>>, vector<1x128xf32>
    %98 = vector.broadcast %97 : vector<1x128xf32> to vector<48x128xf32>
    %99 = arith.addf %96, %98 : vector<48x128xf32>
    %cst_77 = arith.constant 5.000000e-01 : f32
    %100 = vector.broadcast %cst_77 : f32 to vector<48x128xf32>
    %101 = arith.mulf %100, %99 : vector<48x128xf32>
    %cst_78 = arith.constant 0.707106769 : f32
    %102 = vector.broadcast %cst_78 : f32 to vector<48x128xf32>
    %103 = arith.mulf %99, %102 : vector<48x128xf32>
    %104 = math.absf %103 : vector<48x128xf32>
    %cst_79 = arith.constant 0.327591091 : f32
    %105 = vector.broadcast %cst_79 : f32 to vector<48x128xf32>
    %106 = arith.mulf %105, %104 : vector<48x128xf32>
    %cst_80 = arith.constant 1.000000e+00 : f32
    %107 = vector.broadcast %cst_80 : f32 to vector<48x128xf32>
    %108 = arith.addf %107, %106 : vector<48x128xf32>
    %cst_81 = arith.constant 1.000000e+00 : f32
    %109 = vector.broadcast %cst_81 : f32 to vector<48x128xf32>
    %110 = arith.divf %109, %108 : vector<48x128xf32>
    %cst_82 = arith.constant 1.06140542 : f32
    %111 = vector.broadcast %cst_82 : f32 to vector<48x128xf32>
    %112 = arith.mulf %111, %110 : vector<48x128xf32>
    %cst_83 = arith.constant -1.45315206 : f32
    %113 = vector.broadcast %cst_83 : f32 to vector<48x128xf32>
    %114 = arith.addf %112, %113 : vector<48x128xf32>
    %115 = arith.mulf %114, %110 : vector<48x128xf32>
    %cst_84 = arith.constant 1.42141378 : f32
    %116 = vector.broadcast %cst_84 : f32 to vector<48x128xf32>
    %117 = arith.addf %115, %116 : vector<48x128xf32>
    %118 = arith.mulf %117, %110 : vector<48x128xf32>
    %cst_85 = arith.constant -0.284496725 : f32
    %119 = vector.broadcast %cst_85 : f32 to vector<48x128xf32>
    %120 = arith.addf %118, %119 : vector<48x128xf32>
    %121 = arith.mulf %120, %110 : vector<48x128xf32>
    %cst_86 = arith.constant 0.254829586 : f32
    %122 = vector.broadcast %cst_86 : f32 to vector<48x128xf32>
    %123 = arith.addf %121, %122 : vector<48x128xf32>
    %124 = arith.mulf %123, %110 : vector<48x128xf32>
    %cst_87 = arith.constant 0.000000e+00 : f32
    %125 = vector.broadcast %cst_87 : f32 to vector<48x128xf32>
    %126 = arith.subf %125, %104 : vector<48x128xf32>
    %127 = arith.mulf %126, %104 : vector<48x128xf32>
    %128 = math.exp %127 : vector<48x128xf32>
    %129 = arith.mulf %124, %128 : vector<48x128xf32>
    %cst_88 = arith.constant 1.000000e+00 : f32
    %130 = vector.broadcast %cst_88 : f32 to vector<48x128xf32>
    %131 = arith.subf %130, %129 : vector<48x128xf32>
    %cst_89 = arith.constant 0.000000e+00 : f32
    %132 = vector.broadcast %cst_89 : f32 to vector<48x128xf32>
    %133 = arith.cmpf oge, %103, %132 : vector<48x128xf32>
    %cst_90 = arith.constant 0.000000e+00 : f32
    %134 = vector.broadcast %cst_90 : f32 to vector<48x128xf32>
    %135 = arith.subf %134, %131 : vector<48x128xf32>
    %136 = arith.select %133, %131, %135 : vector<48x128xi1>, vector<48x128xf32>
    %cst_91 = arith.constant 1.000000e+00 : f32
    %137 = vector.broadcast %cst_91 : f32 to vector<48x128xf32>
    %138 = arith.addf %137, %136 : vector<48x128xf32>
    %139 = arith.mulf %101, %138 : vector<48x128xf32>
    %140 = vector.shape_cast %139 : vector<48x128xf32> to vector<2x24x128xf32>
    %141 = vector.shape_cast %140 : vector<2x24x128xf32> to vector<2x12x2x128xf32>
    %142 = vector.extract_strided_slice %141 {offsets = [0, 0, 0, 0], sizes = [2, 12, 1, 128], strides = [1, 1, 1, 1]} : vector<2x12x2x128xf32> to vector<2x12x1x128xf32>
    %143 = vector.shape_cast %142 : vector<2x12x1x128xf32> to vector<2x12x128xf32>
    %144 = vector.extract_strided_slice %141 {offsets = [0, 0, 1, 0], sizes = [2, 12, 1, 128], strides = [1, 1, 1, 1]} : vector<2x12x2x128xf32> to vector<2x12x1x128xf32>
    %145 = vector.shape_cast %144 : vector<2x12x1x128xf32> to vector<2x12x128xf32>
    %146 = arith.addf %143, %145 : vector<2x12x128xf32>
    %cst_92 = arith.constant 5.000000e-01 : f32
    %147 = vector.broadcast %cst_92 : f32 to vector<2x12x128xf32>
    %148 = arith.mulf %146, %147 : vector<2x12x128xf32>
    %c0_93 = arith.constant 0 : index
    %c1_94 = arith.constant 1 : index
    %c0_95 = arith.constant 0 : index
    %149 = vector.load %arg35[%c0_93, %c1_94, %c0_95] : memref<2x26x128xf32, #tpu.memory_space<vmem>>, vector<2x12x128xf32>
    tpu.vector_store %arg35[%c0_93, %c1_94, %c0_95], %148 {strides = array<i32>} : memref<2x26x128xf32, #tpu.memory_space<vmem>>, vector<2x12x128xf32>,
    %cst_96 = arith.constant 0.000000e+00 : f32
    %150 = vector.broadcast %cst_96 : f32 to vector<2x1x128xf32>
    %c0_97 = arith.constant 0 : index
    %c13 = arith.constant 13 : index
    %c0_98 = arith.constant 0 : index
    %151 = vector.load %arg35[%c0_97, %c13, %c0_98] : memref<2x26x128xf32, #tpu.memory_space<vmem>>, vector<2x1x128xf32>
    tpu.vector_store %arg35[%c0_97, %c13, %c0_98], %150 {strides = array<i32>} : memref<2x26x128xf32, #tpu.memory_space<vmem>>, vector<2x1x128xf32>,
    %c0_99 = arith.constant 0 : index
    %c0_100 = arith.constant 0 : index
    %c0_101 = arith.constant 0 : index
    %152 = vector.load %arg35[%c0_99, %c0_100, %c0_101] : memref<2x26x128xf32, #tpu.memory_space<vmem>>, vector<2x12x128xf32>
    %153 = vector.shape_cast %152 : vector<2x12x128xf32> to vector<24x128xf32>
    %154 = arith.truncf %153 : vector<24x128xf32> to vector<24x128xbf16>
    %c0_102 = arith.constant 0 : index
    %c0_103 = arith.constant 0 : index
    %c0_104 = arith.constant 0 : index
    %155 = vector.load %arg9[%c0_102, %c0_103, %c0_104] : memref<3x128x128xbf16, #tpu.memory_space<vmem>>, vector<1x128x128xbf16>
    %156 = vector.shape_cast %155 : vector<1x128x128xbf16> to vector<128x128xbf16>
    %cst_105 = arith.constant dense<0.000000e+00> : vector<24x128xf32>
    %157 = tpu.matmul %154, %156, %cst_105 {dimension_numbers = #tpu.dot_dimension_numbers<[1], [0], [0], [1], [0, 0, 1, 1], [], []>} : vector<24x128xbf16>, vector<128x128xbf16>, vector<24x128xf32> -> vector<24x128xf32>
    %c0_106 = arith.constant 0 : index
    %c1_107 = arith.constant 1 : index
    %c0_108 = arith.constant 0 : index
    %158 = vector.load %arg35[%c0_106, %c1_107, %c0_108] : memref<2x26x128xf32, #tpu.memory_space<vmem>>, vector<2x12x128xf32>
    %159 = vector.shape_cast %158 : vector<2x12x128xf32> to vector<24x128xf32>
    %160 = arith.truncf %159 : vector<24x128xf32> to vector<24x128xbf16>
    %c1_109 = arith.constant 1 : index
    %c0_110 = arith.constant 0 : index
    %c0_111 = arith.constant 0 : index
    %161 = vector.load %arg9[%c1_109, %c0_110, %c0_111] : memref<3x128x128xbf16, #tpu.memory_space<vmem>>, vector<1x128x128xbf16>
    %162 = vector.shape_cast %161 : vector<1x128x128xbf16> to vector<128x128xbf16>
    %cst_112 = arith.constant dense<0.000000e+00> : vector<24x128xf32>
    %163 = tpu.matmul %160, %162, %cst_112 {dimension_numbers = #tpu.dot_dimension_numbers<[1], [0], [0], [1], [0, 0, 1, 1], [], []>} : vector<24x128xbf16>, vector<128x128xbf16>, vector<24x128xf32> -> vector<24x128xf32>
    %164 = arith.addf %157, %163 : vector<24x128xf32>
    %c0_113 = arith.constant 0 : index
    %c2_114 = arith.constant 2 : index
    %c0_115 = arith.constant 0 : index
    %165 = vector.load %arg35[%c0_113, %c2_114, %c0_115] : memref<2x26x128xf32, #tpu.memory_space<vmem>>, vector<2x12x128xf32>
    %166 = vector.shape_cast %165 : vector<2x12x128xf32> to vector<24x128xf32>
    %167 = arith.truncf %166 : vector<24x128xf32> to vector<24x128xbf16>
    %c2_116 = arith.constant 2 : index
    %c0_117 = arith.constant 0 : index
    %c0_118 = arith.constant 0 : index
    %168 = vector.load %arg9[%c2_116, %c0_117, %c0_118] : memref<3x128x128xbf16, #tpu.memory_space<vmem>>, vector<1x128x128xbf16>
    %169 = vector.shape_cast %168 : vector<1x128x128xbf16> to vector<128x128xbf16>
    %cst_119 = arith.constant dense<0.000000e+00> : vector<24x128xf32>
    %170 = tpu.matmul %167, %169, %cst_119 {dimension_numbers = #tpu.dot_dimension_numbers<[1], [0], [0], [1], [0, 0, 1, 1], [], []>} : vector<24x128xbf16>, vector<128x128xbf16>, vector<24x128xf32> -> vector<24x128xf32>
    %171 = arith.addf %164, %170 : vector<24x128xf32>
    %c0_120 = arith.constant 0 : index
    %c0_121 = arith.constant 0 : index
    %172 = vector.load %arg10[%c0_120, %c0_121] : memref<1x128xf32, #tpu.memory_space<vmem>>, vector<1x128xf32>
    %173 = vector.broadcast %172 : vector<1x128xf32> to vector<24x128xf32>
    %174 = arith.mulf %171, %173 : vector<24x128xf32>
    %c0_122 = arith.constant 0 : index
    %c0_123 = arith.constant 0 : index
    %175 = vector.load %arg11[%c0_122, %c0_123] : memref<1x128xf32, #tpu.memory_space<vmem>>, vector<1x128xf32>
    %176 = vector.broadcast %175 : vector<1x128xf32> to vector<24x128xf32>
    %177 = arith.addf %174, %176 : vector<24x128xf32>
    %cst_124 = arith.constant 5.000000e-01 : f32
    %178 = vector.broadcast %cst_124 : f32 to vector<24x128xf32>
    %179 = arith.mulf %178, %177 : vector<24x128xf32>
    %cst_125 = arith.constant 0.707106769 : f32
    %180 = vector.broadcast %cst_125 : f32 to vector<24x128xf32>
    %181 = arith.mulf %177, %180 : vector<24x128xf32>
    %182 = math.absf %181 : vector<24x128xf32>
    %cst_126 = arith.constant 0.327591091 : f32
    %183 = vector.broadcast %cst_126 : f32 to vector<24x128xf32>
    %184 = arith.mulf %183, %182 : vector<24x128xf32>
    %cst_127 = arith.constant 1.000000e+00 : f32
    %185 = vector.broadcast %cst_127 : f32 to vector<24x128xf32>
    %186 = arith.addf %185, %184 : vector<24x128xf32>
    %cst_128 = arith.constant 1.000000e+00 : f32
    %187 = vector.broadcast %cst_128 : f32 to vector<24x128xf32>
    %188 = arith.divf %187, %186 : vector<24x128xf32>
    %cst_129 = arith.constant 1.06140542 : f32
    %189 = vector.broadcast %cst_129 : f32 to vector<24x128xf32>
    %190 = arith.mulf %189, %188 : vector<24x128xf32>
    %cst_130 = arith.constant -1.45315206 : f32
    %191 = vector.broadcast %cst_130 : f32 to vector<24x128xf32>
    %192 = arith.addf %190, %191 : vector<24x128xf32>
    %193 = arith.mulf %192, %188 : vector<24x128xf32>
    %cst_131 = arith.constant 1.42141378 : f32
    %194 = vector.broadcast %cst_131 : f32 to vector<24x128xf32>
    %195 = arith.addf %193, %194 : vector<24x128xf32>
    %196 = arith.mulf %195, %188 : vector<24x128xf32>
    %cst_132 = arith.constant -0.284496725 : f32
    %197 = vector.broadcast %cst_132 : f32 to vector<24x128xf32>
    %198 = arith.addf %196, %197 : vector<24x128xf32>
    %199 = arith.mulf %198, %188 : vector<24x128xf32>
    %cst_133 = arith.constant 0.254829586 : f32
    %200 = vector.broadcast %cst_133 : f32 to vector<24x128xf32>
    %201 = arith.addf %199, %200 : vector<24x128xf32>
    %202 = arith.mulf %201, %188 : vector<24x128xf32>
    %cst_134 = arith.constant 0.000000e+00 : f32
    %203 = vector.broadcast %cst_134 : f32 to vector<24x128xf32>
    %204 = arith.subf %203, %182 : vector<24x128xf32>
    %205 = arith.mulf %204, %182 : vector<24x128xf32>
    %206 = math.exp %205 : vector<24x128xf32>
    %207 = arith.mulf %202, %206 : vector<24x128xf32>
    %cst_135 = arith.constant 1.000000e+00 : f32
    %208 = vector.broadcast %cst_135 : f32 to vector<24x128xf32>
    %209 = arith.subf %208, %207 : vector<24x128xf32>
    %cst_136 = arith.constant 0.000000e+00 : f32
    %210 = vector.broadcast %cst_136 : f32 to vector<24x128xf32>
    %211 = arith.cmpf oge, %181, %210 : vector<24x128xf32>
    %cst_137 = arith.constant 0.000000e+00 : f32
    %212 = vector.broadcast %cst_137 : f32 to vector<24x128xf32>
    %213 = arith.subf %212, %209 : vector<24x128xf32>
    %214 = arith.select %211, %209, %213 : vector<24x128xi1>, vector<24x128xf32>
    %cst_138 = arith.constant 1.000000e+00 : f32
    %215 = vector.broadcast %cst_138 : f32 to vector<24x128xf32>
    %216 = arith.addf %215, %214 : vector<24x128xf32>
    %217 = arith.mulf %179, %216 : vector<24x128xf32>
    %218 = vector.shape_cast %217 : vector<24x128xf32> to vector<2x12x128xf32>
    %219 = vector.shape_cast %218 : vector<2x12x128xf32> to vector<2x6x2x128xf32>
    %220 = vector.extract_strided_slice %219 {offsets = [0, 0, 0, 0], sizes = [2, 6, 1, 128], strides = [1, 1, 1, 1]} : vector<2x6x2x128xf32> to vector<2x6x1x128xf32>
    %221 = vector.shape_cast %220 : vector<2x6x1x128xf32> to vector<2x6x128xf32>
    %222 = vector.extract_strided_slice %219 {offsets = [0, 0, 1, 0], sizes = [2, 6, 1, 128], strides = [1, 1, 1, 1]} : vector<2x6x2x128xf32> to vector<2x6x1x128xf32>
    %223 = vector.shape_cast %222 : vector<2x6x1x128xf32> to vector<2x6x128xf32>
    %224 = arith.addf %221, %223 : vector<2x6x128xf32>
    %cst_139 = arith.constant 5.000000e-01 : f32
    %225 = vector.broadcast %cst_139 : f32 to vector<2x6x128xf32>
    %226 = arith.mulf %224, %225 : vector<2x6x128xf32>
    %c0_140 = arith.constant 0 : index
    %c1_141 = arith.constant 1 : index
    %c0_142 = arith.constant 0 : index
    %227 = vector.load %arg35[%c0_140, %c1_141, %c0_142] : memref<2x26x128xf32, #tpu.memory_space<vmem>>, vector<2x6x128xf32>
    tpu.vector_store %arg35[%c0_140, %c1_141, %c0_142], %226 {strides = array<i32>} : memref<2x26x128xf32, #tpu.memory_space<vmem>>, vector<2x6x128xf32>,
    %cst_143 = arith.constant 0.000000e+00 : f32
    %228 = vector.broadcast %cst_143 : f32 to vector<2x1x128xf32>
    %c0_144 = arith.constant 0 : index
    %c7 = arith.constant 7 : index
    %c0_145 = arith.constant 0 : index
    %229 = vector.load %arg35[%c0_144, %c7, %c0_145] : memref<2x26x128xf32, #tpu.memory_space<vmem>>, vector<2x1x128xf32>
    tpu.vector_store %arg35[%c0_144, %c7, %c0_145], %228 {strides = array<i32>} : memref<2x26x128xf32, #tpu.memory_space<vmem>>, vector<2x1x128xf32>,
    %c0_146 = arith.constant 0 : index
    %c0_147 = arith.constant 0 : index
    %c0_148 = arith.constant 0 : index
    %230 = vector.load %arg35[%c0_146, %c0_147, %c0_148] : memref<2x26x128xf32, #tpu.memory_space<vmem>>, vector<2x6x128xf32>
    %231 = vector.shape_cast %230 : vector<2x6x128xf32> to vector<12x128xf32>
    %232 = arith.truncf %231 : vector<12x128xf32> to vector<12x128xbf16>
    %c0_149 = arith.constant 0 : index
    %c0_150 = arith.constant 0 : index
    %c0_151 = arith.constant 0 : index
    %233 = vector.load %arg12[%c0_149, %c0_150, %c0_151] : memref<3x128x128xbf16, #tpu.memory_space<vmem>>, vector<1x128x128xbf16>
    %234 = vector.shape_cast %233 : vector<1x128x128xbf16> to vector<128x128xbf16>
    %cst_152 = arith.constant dense<0.000000e+00> : vector<12x128xf32>
    %235 = tpu.matmul %232, %234, %cst_152 {dimension_numbers = #tpu.dot_dimension_numbers<[1], [0], [0], [1], [0, 0, 1, 1], [], []>} : vector<12x128xbf16>, vector<128x128xbf16>, vector<12x128xf32> -> vector<12x128xf32>
    %c0_153 = arith.constant 0 : index
    %c1_154 = arith.constant 1 : index
    %c0_155 = arith.constant 0 : index
    %236 = vector.load %arg35[%c0_153, %c1_154, %c0_155] : memref<2x26x128xf32, #tpu.memory_space<vmem>>, vector<2x6x128xf32>
    %237 = vector.shape_cast %236 : vector<2x6x128xf32> to vector<12x128xf32>
    %238 = arith.truncf %237 : vector<12x128xf32> to vector<12x128xbf16>
    %c1_156 = arith.constant 1 : index
    %c0_157 = arith.constant 0 : index
    %c0_158 = arith.constant 0 : index
    %239 = vector.load %arg12[%c1_156, %c0_157, %c0_158] : memref<3x128x128xbf16, #tpu.memory_space<vmem>>, vector<1x128x128xbf16>
    %240 = vector.shape_cast %239 : vector<1x128x128xbf16> to vector<128x128xbf16>
    %cst_159 = arith.constant dense<0.000000e+00> : vector<12x128xf32>
    %241 = tpu.matmul %238, %240, %cst_159 {dimension_numbers = #tpu.dot_dimension_numbers<[1], [0], [0], [1], [0, 0, 1, 1], [], []>} : vector<12x128xbf16>, vector<128x128xbf16>, vector<12x128xf32> -> vector<12x128xf32>
    %242 = arith.addf %235, %241 : vector<12x128xf32>
    %c0_160 = arith.constant 0 : index
    %c2_161 = arith.constant 2 : index
    %c0_162 = arith.constant 0 : index
    %243 = vector.load %arg35[%c0_160, %c2_161, %c0_162] : memref<2x26x128xf32, #tpu.memory_space<vmem>>, vector<2x6x128xf32>
    %244 = vector.shape_cast %243 : vector<2x6x128xf32> to vector<12x128xf32>
    %245 = arith.truncf %244 : vector<12x128xf32> to vector<12x128xbf16>
    %c2_163 = arith.constant 2 : index
    %c0_164 = arith.constant 0 : index
    %c0_165 = arith.constant 0 : index
    %246 = vector.load %arg12[%c2_163, %c0_164, %c0_165] : memref<3x128x128xbf16, #tpu.memory_space<vmem>>, vector<1x128x128xbf16>
    %247 = vector.shape_cast %246 : vector<1x128x128xbf16> to vector<128x128xbf16>
    %cst_166 = arith.constant dense<0.000000e+00> : vector<12x128xf32>
    %248 = tpu.matmul %245, %247, %cst_166 {dimension_numbers = #tpu.dot_dimension_numbers<[1], [0], [0], [1], [0, 0, 1, 1], [], []>} : vector<12x128xbf16>, vector<128x128xbf16>, vector<12x128xf32> -> vector<12x128xf32>
    %249 = arith.addf %242, %248 : vector<12x128xf32>
    %c0_167 = arith.constant 0 : index
    %c0_168 = arith.constant 0 : index
    %250 = vector.load %arg13[%c0_167, %c0_168] : memref<1x128xf32, #tpu.memory_space<vmem>>, vector<1x128xf32>
    %251 = vector.broadcast %250 : vector<1x128xf32> to vector<12x128xf32>
    %252 = arith.mulf %249, %251 : vector<12x128xf32>
    %c0_169 = arith.constant 0 : index
    %c0_170 = arith.constant 0 : index
    %253 = vector.load %arg14[%c0_169, %c0_170] : memref<1x128xf32, #tpu.memory_space<vmem>>, vector<1x128xf32>
    %254 = vector.broadcast %253 : vector<1x128xf32> to vector<12x128xf32>
    %255 = arith.addf %252, %254 : vector<12x128xf32>
    %cst_171 = arith.constant 5.000000e-01 : f32
    %256 = vector.broadcast %cst_171 : f32 to vector<12x128xf32>
    %257 = arith.mulf %256, %255 : vector<12x128xf32>
    %cst_172 = arith.constant 0.707106769 : f32
    %258 = vector.broadcast %cst_172 : f32 to vector<12x128xf32>
    %259 = arith.mulf %255, %258 : vector<12x128xf32>
    %260 = math.absf %259 : vector<12x128xf32>
    %cst_173 = arith.constant 0.327591091 : f32
    %261 = vector.broadcast %cst_173 : f32 to vector<12x128xf32>
    %262 = arith.mulf %261, %260 : vector<12x128xf32>
    %cst_174 = arith.constant 1.000000e+00 : f32
    %263 = vector.broadcast %cst_174 : f32 to vector<12x128xf32>
    %264 = arith.addf %263, %262 : vector<12x128xf32>
    %cst_175 = arith.constant 1.000000e+00 : f32
    %265 = vector.broadcast %cst_175 : f32 to vector<12x128xf32>
    %266 = arith.divf %265, %264 : vector<12x128xf32>
    %cst_176 = arith.constant 1.06140542 : f32
    %267 = vector.broadcast %cst_176 : f32 to vector<12x128xf32>
    %268 = arith.mulf %267, %266 : vector<12x128xf32>
    %cst_177 = arith.constant -1.45315206 : f32
    %269 = vector.broadcast %cst_177 : f32 to vector<12x128xf32>
    %270 = arith.addf %268, %269 : vector<12x128xf32>
    %271 = arith.mulf %270, %266 : vector<12x128xf32>
    %cst_178 = arith.constant 1.42141378 : f32
    %272 = vector.broadcast %cst_178 : f32 to vector<12x128xf32>
    %273 = arith.addf %271, %272 : vector<12x128xf32>
    %274 = arith.mulf %273, %266 : vector<12x128xf32>
    %cst_179 = arith.constant -0.284496725 : f32
    %275 = vector.broadcast %cst_179 : f32 to vector<12x128xf32>
    %276 = arith.addf %274, %275 : vector<12x128xf32>
    %277 = arith.mulf %276, %266 : vector<12x128xf32>
    %cst_180 = arith.constant 0.254829586 : f32
    %278 = vector.broadcast %cst_180 : f32 to vector<12x128xf32>
    %279 = arith.addf %277, %278 : vector<12x128xf32>
    %280 = arith.mulf %279, %266 : vector<12x128xf32>
    %cst_181 = arith.constant 0.000000e+00 : f32
    %281 = vector.broadcast %cst_181 : f32 to vector<12x128xf32>
    %282 = arith.subf %281, %260 : vector<12x128xf32>
    %283 = arith.mulf %282, %260 : vector<12x128xf32>
    %284 = math.exp %283 : vector<12x128xf32>
    %285 = arith.mulf %280, %284 : vector<12x128xf32>
    %cst_182 = arith.constant 1.000000e+00 : f32
    %286 = vector.broadcast %cst_182 : f32 to vector<12x128xf32>
    %287 = arith.subf %286, %285 : vector<12x128xf32>
    %cst_183 = arith.constant 0.000000e+00 : f32
    %288 = vector.broadcast %cst_183 : f32 to vector<12x128xf32>
    %289 = arith.cmpf oge, %259, %288 : vector<12x128xf32>
    %cst_184 = arith.constant 0.000000e+00 : f32
    %290 = vector.broadcast %cst_184 : f32 to vector<12x128xf32>
    %291 = arith.subf %290, %287 : vector<12x128xf32>
    %292 = arith.select %289, %287, %291 : vector<12x128xi1>, vector<12x128xf32>
    %cst_185 = arith.constant 1.000000e+00 : f32
    %293 = vector.broadcast %cst_185 : f32 to vector<12x128xf32>
    %294 = arith.addf %293, %292 : vector<12x128xf32>
    %295 = arith.mulf %257, %294 : vector<12x128xf32>
    %296 = vector.shape_cast %295 : vector<12x128xf32> to vector<2x6x128xf32>
    %297 = vector.shape_cast %296 : vector<2x6x128xf32> to vector<2x3x2x128xf32>
    %298 = vector.extract_strided_slice %297 {offsets = [0, 0, 0, 0], sizes = [2, 3, 1, 128], strides = [1, 1, 1, 1]} : vector<2x3x2x128xf32> to vector<2x3x1x128xf32>
    %299 = vector.shape_cast %298 : vector<2x3x1x128xf32> to vector<2x3x128xf32>
    %300 = vector.extract_strided_slice %297 {offsets = [0, 0, 1, 0], sizes = [2, 3, 1, 128], strides = [1, 1, 1, 1]} : vector<2x3x2x128xf32> to vector<2x3x1x128xf32>
    %301 = vector.shape_cast %300 : vector<2x3x1x128xf32> to vector<2x3x128xf32>
    %302 = arith.addf %299, %301 : vector<2x3x128xf32>
    %cst_186 = arith.constant 5.000000e-01 : f32
    %303 = vector.broadcast %cst_186 : f32 to vector<2x3x128xf32>
    %304 = arith.mulf %302, %303 : vector<2x3x128xf32>
    %305 = vector.shape_cast %304 : vector<2x3x128xf32> to vector<6x128xf32>
    %306 = arith.truncf %305 : vector<6x128xf32> to vector<6x128xbf16>
    %c0_187 = arith.constant 0 : index
    %c0_188 = arith.constant 0 : index
    %307 = vector.load %arg15[%c0_187, %c0_188] : memref<128x96xbf16, #tpu.memory_space<vmem>>, vector<128x96xbf16>
    %cst_189 = arith.constant dense<0.000000e+00> : vector<6x96xf32>
    %308 = tpu.matmul %306, %307, %cst_189 {dimension_numbers = #tpu.dot_dimension_numbers<[1], [0], [0], [1], [0, 0, 1, 1], [], []>} : vector<6x128xbf16>, vector<128x96xbf16>, vector<6x96xf32> -> vector<6x96xf32>
    %c0_190 = arith.constant 0 : index
    %c0_191 = arith.constant 0 : index
    %309 = vector.load %arg17[%c0_190, %c0_191] : memref<1x96xf32, #tpu.memory_space<vmem>>, vector<1x96xf32>
    %310 = vector.broadcast %309 : vector<1x96xf32> to vector<6x96xf32>
    %311 = arith.addf %308, %310 : vector<6x96xf32>
    %312 = vector.shape_cast %311 : vector<6x96xf32> to vector<2x3x96xf32>
    %313 = vector.extract_strided_slice %312 {offsets = [0, 0, 0], sizes = [2, 1, 16], strides = [1, 1, 1]} : vector<2x3x96xf32> to vector<2x1x16xf32>
    %314 = vector.shape_cast %313 : vector<2x1x16xf32> to vector<2x16xf32>
    %315 = vector.extract_strided_slice %312 {offsets = [0, 2, 16], sizes = [2, 1, 16], strides = [1, 1, 1]} : vector<2x3x96xf32> to vector<2x1x16xf32>
    %316 = vector.shape_cast %315 : vector<2x1x16xf32> to vector<2x16xf32>
    %317 = vector.extract_strided_slice %312 {offsets = [0, 0, 32], sizes = [2, 1, 16], strides = [1, 1, 1]} : vector<2x3x96xf32> to vector<2x1x16xf32>
    %318 = vector.shape_cast %317 : vector<2x1x16xf32> to vector<2x16xf32>
    %319 = vector.extract_strided_slice %312 {offsets = [0, 2, 48], sizes = [2, 1, 16], strides = [1, 1, 1]} : vector<2x3x96xf32> to vector<2x1x16xf32>
    %320 = vector.shape_cast %319 : vector<2x1x16xf32> to vector<2x16xf32>
    %321 = tpu.concatenate %314, %316, %318, %320 in 1 : vector<2x16xf32>, vector<2x16xf32>, vector<2x16xf32>, vector<2x16xf32> -> vector<2x64xf32>
    %322 = vector.extract_strided_slice %312 {offsets = [0, 1, 0], sizes = [2, 1, 16], strides = [1, 1, 1]} : vector<2x3x96xf32> to vector<2x1x16xf32>
    %323 = vector.shape_cast %322 : vector<2x1x16xf32> to vector<2x16xf32>
    %324 = vector.extract_strided_slice %312 {offsets = [0, 1, 16], sizes = [2, 1, 16], strides = [1, 1, 1]} : vector<2x3x96xf32> to vector<2x1x16xf32>
    %325 = vector.shape_cast %324 : vector<2x1x16xf32> to vector<2x16xf32>
    %326 = vector.extract_strided_slice %312 {offsets = [0, 1, 32], sizes = [2, 1, 16], strides = [1, 1, 1]} : vector<2x3x96xf32> to vector<2x1x16xf32>
    %327 = vector.shape_cast %326 : vector<2x1x16xf32> to vector<2x16xf32>
    %328 = vector.extract_strided_slice %312 {offsets = [0, 1, 48], sizes = [2, 1, 16], strides = [1, 1, 1]} : vector<2x3x96xf32> to vector<2x1x16xf32>
    %329 = vector.shape_cast %328 : vector<2x1x16xf32> to vector<2x16xf32>
    %330 = tpu.concatenate %323, %325, %327, %329 in 1 : vector<2x16xf32>, vector<2x16xf32>, vector<2x16xf32>, vector<2x16xf32> -> vector<2x64xf32>
    %331 = vector.extract_strided_slice %312 {offsets = [0, 2, 0], sizes = [2, 1, 16], strides = [1, 1, 1]} : vector<2x3x96xf32> to vector<2x1x16xf32>
    %332 = vector.shape_cast %331 : vector<2x1x16xf32> to vector<2x16xf32>
    %333 = vector.extract_strided_slice %312 {offsets = [0, 0, 16], sizes = [2, 1, 16], strides = [1, 1, 1]} : vector<2x3x96xf32> to vector<2x1x16xf32>
    %334 = vector.shape_cast %333 : vector<2x1x16xf32> to vector<2x16xf32>
    %335 = vector.extract_strided_slice %312 {offsets = [0, 2, 32], sizes = [2, 1, 16], strides = [1, 1, 1]} : vector<2x3x96xf32> to vector<2x1x16xf32>
    %336 = vector.shape_cast %335 : vector<2x1x16xf32> to vector<2x16xf32>
    %337 = vector.extract_strided_slice %312 {offsets = [0, 0, 48], sizes = [2, 1, 16], strides = [1, 1, 1]} : vector<2x3x96xf32> to vector<2x1x16xf32>
    %338 = vector.shape_cast %337 : vector<2x1x16xf32> to vector<2x16xf32>
    %339 = tpu.concatenate %332, %334, %336, %338 in 1 : vector<2x16xf32>, vector<2x16xf32>, vector<2x16xf32>, vector<2x16xf32> -> vector<2x64xf32>
    %340 = vector.extract_strided_slice %312 {offsets = [0, 0, 64], sizes = [2, 1, 16], strides = [1, 1, 1]} : vector<2x3x96xf32> to vector<2x1x16xf32>
    %341 = vector.shape_cast %340 : vector<2x1x16xf32> to vector<2x16xf32>
    %342 = vector.extract_strided_slice %312 {offsets = [0, 2, 80], sizes = [2, 1, 16], strides = [1, 1, 1]} : vector<2x3x96xf32> to vector<2x1x16xf32>
    %343 = vector.shape_cast %342 : vector<2x1x16xf32> to vector<2x16xf32>
    %344 = tpu.concatenate %341, %343 in 1 : vector<2x16xf32>, vector<2x16xf32> -> vector<2x32xf32>
    %345 = vector.extract_strided_slice %312 {offsets = [0, 1, 64], sizes = [2, 1, 16], strides = [1, 1, 1]} : vector<2x3x96xf32> to vector<2x1x16xf32>
    %346 = vector.shape_cast %345 : vector<2x1x16xf32> to vector<2x16xf32>
    %347 = vector.extract_strided_slice %312 {offsets = [0, 1, 80], sizes = [2, 1, 16], strides = [1, 1, 1]} : vector<2x3x96xf32> to vector<2x1x16xf32>
    %348 = vector.shape_cast %347 : vector<2x1x16xf32> to vector<2x16xf32>
    %349 = tpu.concatenate %346, %348 in 1 : vector<2x16xf32>, vector<2x16xf32> -> vector<2x32xf32>
    %350 = vector.extract_strided_slice %312 {offsets = [0, 2, 64], sizes = [2, 1, 16], strides = [1, 1, 1]} : vector<2x3x96xf32> to vector<2x1x16xf32>
    %351 = vector.shape_cast %350 : vector<2x1x16xf32> to vector<2x16xf32>
    %352 = vector.extract_strided_slice %312 {offsets = [0, 0, 80], sizes = [2, 1, 16], strides = [1, 1, 1]} : vector<2x3x96xf32> to vector<2x1x16xf32>
    %353 = vector.shape_cast %352 : vector<2x1x16xf32> to vector<2x16xf32>
    %354 = tpu.concatenate %351, %353 in 1 : vector<2x16xf32>, vector<2x16xf32> -> vector<2x32xf32>
    %c0_192 = arith.constant 0 : index
    %c0_193 = arith.constant 0 : index
    %355 = vector.load %arg16[%c0_192, %c0_193] : memref<32x96xbf16, #tpu.memory_space<vmem>>, vector<32x96xbf16>
    %c0_194 = arith.constant 0 : index
    %c0_195 = arith.constant 0 : index
    %356 = vector.load %arg18[%c0_194, %c0_195] : memref<1x32xf32, #tpu.memory_space<vmem>>, vector<1x32xf32>
    %cst_196 = arith.constant 0.000000e+00 : f32
    %357 = vector.broadcast %cst_196 : f32 to vector<2x32xf32>
    %cst_197 = arith.constant 0.000000e+00 : f32
    %358 = vector.broadcast %cst_197 : f32 to vector<2x64xf32>
    %cst_198 = arith.constant 0.000000e+00 : f32
    %359 = vector.broadcast %cst_198 : f32 to vector<2x32xf32>
    %360 = arith.addf %321, %358 : vector<2x64xf32>
    %cst_199 = arith.constant 0.000000e+00 : f32
    %361 = vector.broadcast %cst_199 : f32 to vector<2x64xf32>
    %362 = arith.subf %361, %360 : vector<2x64xf32>
    %363 = math.exp %362 : vector<2x64xf32>
    %cst_200 = arith.constant 1.000000e+00 : f32
    %364 = vector.broadcast %cst_200 : f32 to vector<2x64xf32>
    %365 = arith.addf %364, %363 : vector<2x64xf32>
    %cst_201 = arith.constant 1.000000e+00 : f32
    %366 = vector.broadcast %cst_201 : f32 to vector<2x64xf32>
    %367 = arith.divf %366, %365 : vector<2x64xf32>
    %368 = vector.extract_strided_slice %367 {offsets = [0, 0], sizes = [2, 32], strides = [1, 1]} : vector<2x64xf32> to vector<2x32xf32>
    %369 = vector.extract_strided_slice %367 {offsets = [0, 32], sizes = [2, 32], strides = [1, 1]} : vector<2x64xf32> to vector<2x32xf32>
    %370 = vector.broadcast %356 : vector<1x32xf32> to vector<2x32xf32>
    %371 = arith.addf %359, %370 : vector<2x32xf32>
    %372 = arith.mulf %368, %371 : vector<2x32xf32>
    %373 = arith.addf %344, %372 : vector<2x32xf32>
    %374 = math.tanh %373 : vector<2x32xf32>
    %cst_202 = arith.constant 1.000000e+00 : f32
    %375 = vector.broadcast %cst_202 : f32 to vector<2x32xf32>
    %376 = arith.subf %375, %369 : vector<2x32xf32>
    %377 = arith.mulf %376, %374 : vector<2x32xf32>
    %378 = arith.mulf %369, %357 : vector<2x32xf32>
    %379 = arith.addf %377, %378 : vector<2x32xf32>
    %380 = arith.truncf %379 : vector<2x32xf32> to vector<2x32xbf16>
    %cst_203 = arith.constant dense<0.000000e+00> : vector<2x96xf32>
    %381 = tpu.matmul %380, %355, %cst_203 {dimension_numbers = #tpu.dot_dimension_numbers<[1], [0], [0], [1], [0, 0, 1, 1], [], []>} : vector<2x32xbf16>, vector<32x96xbf16>, vector<2x96xf32> -> vector<2x96xf32>
    %382 = vector.extract_strided_slice %381 {offsets = [0, 0], sizes = [2, 64], strides = [1, 1]} : vector<2x96xf32> to vector<2x64xf32>
    %383 = vector.extract_strided_slice %381 {offsets = [0, 64], sizes = [2, 32], strides = [1, 1]} : vector<2x96xf32> to vector<2x32xf32>
    %384 = arith.addf %330, %382 : vector<2x64xf32>
    %cst_204 = arith.constant 0.000000e+00 : f32
    %385 = vector.broadcast %cst_204 : f32 to vector<2x64xf32>
    %386 = arith.subf %385, %384 : vector<2x64xf32>
    %387 = math.exp %386 : vector<2x64xf32>
    %cst_205 = arith.constant 1.000000e+00 : f32
    %388 = vector.broadcast %cst_205 : f32 to vector<2x64xf32>
    %389 = arith.addf %388, %387 : vector<2x64xf32>
    %cst_206 = arith.constant 1.000000e+00 : f32
    %390 = vector.broadcast %cst_206 : f32 to vector<2x64xf32>
    %391 = arith.divf %390, %389 : vector<2x64xf32>
    %392 = vector.extract_strided_slice %391 {offsets = [0, 0], sizes = [2, 32], strides = [1, 1]} : vector<2x64xf32> to vector<2x32xf32>
    %393 = vector.extract_strided_slice %391 {offsets = [0, 32], sizes = [2, 32], strides = [1, 1]} : vector<2x64xf32> to vector<2x32xf32>
    %394 = vector.broadcast %356 : vector<1x32xf32> to vector<2x32xf32>
    %395 = arith.addf %383, %394 : vector<2x32xf32>
    %396 = arith.mulf %392, %395 : vector<2x32xf32>
    %397 = arith.addf %349, %396 : vector<2x32xf32>
    %398 = math.tanh %397 : vector<2x32xf32>
    %cst_207 = arith.constant 1.000000e+00 : f32
    %399 = vector.broadcast %cst_207 : f32 to vector<2x32xf32>
    %400 = arith.subf %399, %393 : vector<2x32xf32>
    %401 = arith.mulf %400, %398 : vector<2x32xf32>
    %402 = arith.mulf %393, %379 : vector<2x32xf32>
    %403 = arith.addf %401, %402 : vector<2x32xf32>
    %404 = arith.truncf %403 : vector<2x32xf32> to vector<2x32xbf16>
    %cst_208 = arith.constant dense<0.000000e+00> : vector<2x96xf32>
    %405 = tpu.matmul %404, %355, %cst_208 {dimension_numbers = #tpu.dot_dimension_numbers<[1], [0], [0], [1], [0, 0, 1, 1], [], []>} : vector<2x32xbf16>, vector<32x96xbf16>, vector<2x96xf32> -> vector<2x96xf32>
    %406 = vector.extract_strided_slice %405 {offsets = [0, 0], sizes = [2, 64], strides = [1, 1]} : vector<2x96xf32> to vector<2x64xf32>
    %407 = vector.extract_strided_slice %405 {offsets = [0, 64], sizes = [2, 32], strides = [1, 1]} : vector<2x96xf32> to vector<2x32xf32>
    %408 = arith.addf %339, %406 : vector<2x64xf32>
    %cst_209 = arith.constant 0.000000e+00 : f32
    %409 = vector.broadcast %cst_209 : f32 to vector<2x64xf32>
    %410 = arith.subf %409, %408 : vector<2x64xf32>
    %411 = math.exp %410 : vector<2x64xf32>
    %cst_210 = arith.constant 1.000000e+00 : f32
    %412 = vector.broadcast %cst_210 : f32 to vector<2x64xf32>
    %413 = arith.addf %412, %411 : vector<2x64xf32>
    %cst_211 = arith.constant 1.000000e+00 : f32
    %414 = vector.broadcast %cst_211 : f32 to vector<2x64xf32>
    %415 = arith.divf %414, %413 : vector<2x64xf32>
    %416 = vector.extract_strided_slice %415 {offsets = [0, 0], sizes = [2, 32], strides = [1, 1]} : vector<2x64xf32> to vector<2x32xf32>
    %417 = vector.extract_strided_slice %415 {offsets = [0, 32], sizes = [2, 32], strides = [1, 1]} : vector<2x64xf32> to vector<2x32xf32>
    %418 = vector.broadcast %356 : vector<1x32xf32> to vector<2x32xf32>
    %419 = arith.addf %407, %418 : vector<2x32xf32>
    %420 = arith.mulf %416, %419 : vector<2x32xf32>
    %421 = arith.addf %354, %420 : vector<2x32xf32>
    %422 = math.tanh %421 : vector<2x32xf32>
    %cst_212 = arith.constant 1.000000e+00 : f32
    %423 = vector.broadcast %cst_212 : f32 to vector<2x32xf32>
    %424 = arith.subf %423, %417 : vector<2x32xf32>
    %425 = arith.mulf %424, %422 : vector<2x32xf32>
    %426 = arith.mulf %417, %403 : vector<2x32xf32>
    %427 = arith.addf %425, %426 : vector<2x32xf32>
    %428 = vector.extract_strided_slice %379 {offsets = [0, 0], sizes = [2, 16], strides = [1, 1]} : vector<2x32xf32> to vector<2x16xf32>
    %429 = vector.extract_strided_slice %427 {offsets = [0, 16], sizes = [2, 16], strides = [1, 1]} : vector<2x32xf32> to vector<2x16xf32>
    %430 = tpu.concatenate %428, %429 in 1 : vector<2x16xf32>, vector<2x16xf32> -> vector<2x32xf32>
    %431 = vector.extract_strided_slice %403 {offsets = [0, 0], sizes = [2, 16], strides = [1, 1]} : vector<2x32xf32> to vector<2x16xf32>
    %432 = vector.extract_strided_slice %403 {offsets = [0, 16], sizes = [2, 16], strides = [1, 1]} : vector<2x32xf32> to vector<2x16xf32>
    %433 = tpu.concatenate %431, %432 in 1 : vector<2x16xf32>, vector<2x16xf32> -> vector<2x32xf32>
    %434 = vector.extract_strided_slice %427 {offsets = [0, 0], sizes = [2, 16], strides = [1, 1]} : vector<2x32xf32> to vector<2x16xf32>
    %435 = vector.extract_strided_slice %379 {offsets = [0, 16], sizes = [2, 16], strides = [1, 1]} : vector<2x32xf32> to vector<2x16xf32>
    %436 = tpu.concatenate %434, %435 in 1 : vector<2x16xf32>, vector<2x16xf32> -> vector<2x32xf32>
    %437 = vector.shape_cast %430 : vector<2x32xf32> to vector<2x1x32xf32>
    %438 = vector.shape_cast %433 : vector<2x32xf32> to vector<2x1x32xf32>
    %439 = vector.shape_cast %436 : vector<2x32xf32> to vector<2x1x32xf32>
    %440 = tpu.concatenate %437, %438, %439 in 1 : vector<2x1x32xf32>, vector<2x1x32xf32>, vector<2x1x32xf32> -> vector<2x3x32xf32>
    %441 = vector.shape_cast %440 : vector<2x3x32xf32> to vector<6x32xf32>
    %442 = arith.truncf %441 : vector<6x32xf32> to vector<6x32xbf16>
    %c0_213 = arith.constant 0 : index
    %c0_214 = arith.constant 0 : index
    %443 = vector.load %arg19[%c0_213, %c0_214] : memref<32x96xbf16, #tpu.memory_space<vmem>>, vector<32x96xbf16>
    %cst_215 = arith.constant dense<0.000000e+00> : vector<6x96xf32>
    %444 = tpu.matmul %442, %443, %cst_215 {dimension_numbers = #tpu.dot_dimension_numbers<[1], [0], [0], [1], [0, 0, 1, 1], [], []>} : vector<6x32xbf16>, vector<32x96xbf16>, vector<6x96xf32> -> vector<6x96xf32>
    %c0_216 = arith.constant 0 : index
    %c0_217 = arith.constant 0 : index
    %445 = vector.load %arg21[%c0_216, %c0_217] : memref<1x96xf32, #tpu.memory_space<vmem>>, vector<1x96xf32>
    %446 = vector.broadcast %445 : vector<1x96xf32> to vector<6x96xf32>
    %447 = arith.addf %444, %446 : vector<6x96xf32>
    %448 = vector.shape_cast %447 : vector<6x96xf32> to vector<2x3x96xf32>
    %449 = vector.extract_strided_slice %448 {offsets = [0, 0, 0], sizes = [2, 1, 16], strides = [1, 1, 1]} : vector<2x3x96xf32> to vector<2x1x16xf32>
    %450 = vector.shape_cast %449 : vector<2x1x16xf32> to vector<2x16xf32>
    %451 = vector.extract_strided_slice %448 {offsets = [0, 2, 16], sizes = [2, 1, 16], strides = [1, 1, 1]} : vector<2x3x96xf32> to vector<2x1x16xf32>
    %452 = vector.shape_cast %451 : vector<2x1x16xf32> to vector<2x16xf32>
    %453 = vector.extract_strided_slice %448 {offsets = [0, 0, 32], sizes = [2, 1, 16], strides = [1, 1, 1]} : vector<2x3x96xf32> to vector<2x1x16xf32>
    %454 = vector.shape_cast %453 : vector<2x1x16xf32> to vector<2x16xf32>
    %455 = vector.extract_strided_slice %448 {offsets = [0, 2, 48], sizes = [2, 1, 16], strides = [1, 1, 1]} : vector<2x3x96xf32> to vector<2x1x16xf32>
    %456 = vector.shape_cast %455 : vector<2x1x16xf32> to vector<2x16xf32>
    %457 = tpu.concatenate %450, %452, %454, %456 in 1 : vector<2x16xf32>, vector<2x16xf32>, vector<2x16xf32>, vector<2x16xf32> -> vector<2x64xf32>
    %458 = vector.extract_strided_slice %448 {offsets = [0, 1, 0], sizes = [2, 1, 16], strides = [1, 1, 1]} : vector<2x3x96xf32> to vector<2x1x16xf32>
    %459 = vector.shape_cast %458 : vector<2x1x16xf32> to vector<2x16xf32>
    %460 = vector.extract_strided_slice %448 {offsets = [0, 1, 16], sizes = [2, 1, 16], strides = [1, 1, 1]} : vector<2x3x96xf32> to vector<2x1x16xf32>
    %461 = vector.shape_cast %460 : vector<2x1x16xf32> to vector<2x16xf32>
    %462 = vector.extract_strided_slice %448 {offsets = [0, 1, 32], sizes = [2, 1, 16], strides = [1, 1, 1]} : vector<2x3x96xf32> to vector<2x1x16xf32>
    %463 = vector.shape_cast %462 : vector<2x1x16xf32> to vector<2x16xf32>
    %464 = vector.extract_strided_slice %448 {offsets = [0, 1, 48], sizes = [2, 1, 16], strides = [1, 1, 1]} : vector<2x3x96xf32> to vector<2x1x16xf32>
    %465 = vector.shape_cast %464 : vector<2x1x16xf32> to vector<2x16xf32>
    %466 = tpu.concatenate %459, %461, %463, %465 in 1 : vector<2x16xf32>, vector<2x16xf32>, vector<2x16xf32>, vector<2x16xf32> -> vector<2x64xf32>
    %467 = vector.extract_strided_slice %448 {offsets = [0, 2, 0], sizes = [2, 1, 16], strides = [1, 1, 1]} : vector<2x3x96xf32> to vector<2x1x16xf32>
    %468 = vector.shape_cast %467 : vector<2x1x16xf32> to vector<2x16xf32>
    %469 = vector.extract_strided_slice %448 {offsets = [0, 0, 16], sizes = [2, 1, 16], strides = [1, 1, 1]} : vector<2x3x96xf32> to vector<2x1x16xf32>
    %470 = vector.shape_cast %469 : vector<2x1x16xf32> to vector<2x16xf32>
    %471 = vector.extract_strided_slice %448 {offsets = [0, 2, 32], sizes = [2, 1, 16], strides = [1, 1, 1]} : vector<2x3x96xf32> to vector<2x1x16xf32>
    %472 = vector.shape_cast %471 : vector<2x1x16xf32> to vector<2x16xf32>
    %473 = vector.extract_strided_slice %448 {offsets = [0, 0, 48], sizes = [2, 1, 16], strides = [1, 1, 1]} : vector<2x3x96xf32> to vector<2x1x16xf32>
    %474 = vector.shape_cast %473 : vector<2x1x16xf32> to vector<2x16xf32>
    %475 = tpu.concatenate %468, %470, %472, %474 in 1 : vector<2x16xf32>, vector<2x16xf32>, vector<2x16xf32>, vector<2x16xf32> -> vector<2x64xf32>
    %476 = vector.extract_strided_slice %448 {offsets = [0, 0, 64], sizes = [2, 1, 16], strides = [1, 1, 1]} : vector<2x3x96xf32> to vector<2x1x16xf32>
    %477 = vector.shape_cast %476 : vector<2x1x16xf32> to vector<2x16xf32>
    %478 = vector.extract_strided_slice %448 {offsets = [0, 2, 80], sizes = [2, 1, 16], strides = [1, 1, 1]} : vector<2x3x96xf32> to vector<2x1x16xf32>
    %479 = vector.shape_cast %478 : vector<2x1x16xf32> to vector<2x16xf32>
    %480 = tpu.concatenate %477, %479 in 1 : vector<2x16xf32>, vector<2x16xf32> -> vector<2x32xf32>
    %481 = vector.extract_strided_slice %448 {offsets = [0, 1, 64], sizes = [2, 1, 16], strides = [1, 1, 1]} : vector<2x3x96xf32> to vector<2x1x16xf32>
    %482 = vector.shape_cast %481 : vector<2x1x16xf32> to vector<2x16xf32>
    %483 = vector.extract_strided_slice %448 {offsets = [0, 1, 80], sizes = [2, 1, 16], strides = [1, 1, 1]} : vector<2x3x96xf32> to vector<2x1x16xf32>
    %484 = vector.shape_cast %483 : vector<2x1x16xf32> to vector<2x16xf32>
    %485 = tpu.concatenate %482, %484 in 1 : vector<2x16xf32>, vector<2x16xf32> -> vector<2x32xf32>
    %486 = vector.extract_strided_slice %448 {offsets = [0, 2, 64], sizes = [2, 1, 16], strides = [1, 1, 1]} : vector<2x3x96xf32> to vector<2x1x16xf32>
    %487 = vector.shape_cast %486 : vector<2x1x16xf32> to vector<2x16xf32>
    %488 = vector.extract_strided_slice %448 {offsets = [0, 0, 80], sizes = [2, 1, 16], strides = [1, 1, 1]} : vector<2x3x96xf32> to vector<2x1x16xf32>
    %489 = vector.shape_cast %488 : vector<2x1x16xf32> to vector<2x16xf32>
    %490 = tpu.concatenate %487, %489 in 1 : vector<2x16xf32>, vector<2x16xf32> -> vector<2x32xf32>
    %c0_218 = arith.constant 0 : index
    %c0_219 = arith.constant 0 : index
    %491 = vector.load %arg20[%c0_218, %c0_219] : memref<32x96xbf16, #tpu.memory_space<vmem>>, vector<32x96xbf16>
    %c0_220 = arith.constant 0 : index
    %c0_221 = arith.constant 0 : index
    %492 = vector.load %arg22[%c0_220, %c0_221] : memref<1x32xf32, #tpu.memory_space<vmem>>, vector<1x32xf32>
    %cst_222 = arith.constant 0.000000e+00 : f32
    %493 = vector.broadcast %cst_222 : f32 to vector<2x32xf32>
    %cst_223 = arith.constant 0.000000e+00 : f32
    %494 = vector.broadcast %cst_223 : f32 to vector<2x64xf32>
    %cst_224 = arith.constant 0.000000e+00 : f32
    %495 = vector.broadcast %cst_224 : f32 to vector<2x32xf32>
    %496 = arith.addf %457, %494 : vector<2x64xf32>
    %cst_225 = arith.constant 0.000000e+00 : f32
    %497 = vector.broadcast %cst_225 : f32 to vector<2x64xf32>
    %498 = arith.subf %497, %496 : vector<2x64xf32>
    %499 = math.exp %498 : vector<2x64xf32>
    %cst_226 = arith.constant 1.000000e+00 : f32
    %500 = vector.broadcast %cst_226 : f32 to vector<2x64xf32>
    %501 = arith.addf %500, %499 : vector<2x64xf32>
    %cst_227 = arith.constant 1.000000e+00 : f32
    %502 = vector.broadcast %cst_227 : f32 to vector<2x64xf32>
    %503 = arith.divf %502, %501 : vector<2x64xf32>
    %504 = vector.extract_strided_slice %503 {offsets = [0, 0], sizes = [2, 32], strides = [1, 1]} : vector<2x64xf32> to vector<2x32xf32>
    %505 = vector.extract_strided_slice %503 {offsets = [0, 32], sizes = [2, 32], strides = [1, 1]} : vector<2x64xf32> to vector<2x32xf32>
    %506 = vector.broadcast %492 : vector<1x32xf32> to vector<2x32xf32>
    %507 = arith.addf %495, %506 : vector<2x32xf32>
    %508 = arith.mulf %504, %507 : vector<2x32xf32>
    %509 = arith.addf %480, %508 : vector<2x32xf32>
    %510 = math.tanh %509 : vector<2x32xf32>
    %cst_228 = arith.constant 1.000000e+00 : f32
    %511 = vector.broadcast %cst_228 : f32 to vector<2x32xf32>
    %512 = arith.subf %511, %505 : vector<2x32xf32>
    %513 = arith.mulf %512, %510 : vector<2x32xf32>
    %514 = arith.mulf %505, %493 : vector<2x32xf32>
    %515 = arith.addf %513, %514 : vector<2x32xf32>
    %516 = arith.truncf %515 : vector<2x32xf32> to vector<2x32xbf16>
    %cst_229 = arith.constant dense<0.000000e+00> : vector<2x96xf32>
    %517 = tpu.matmul %516, %491, %cst_229 {dimension_numbers = #tpu.dot_dimension_numbers<[1], [0], [0], [1], [0, 0, 1, 1], [], []>} : vector<2x32xbf16>, vector<32x96xbf16>, vector<2x96xf32> -> vector<2x96xf32>
    %518 = vector.extract_strided_slice %517 {offsets = [0, 0], sizes = [2, 64], strides = [1, 1]} : vector<2x96xf32> to vector<2x64xf32>
    %519 = vector.extract_strided_slice %517 {offsets = [0, 64], sizes = [2, 32], strides = [1, 1]} : vector<2x96xf32> to vector<2x32xf32>
    %520 = arith.addf %466, %518 : vector<2x64xf32>
    %cst_230 = arith.constant 0.000000e+00 : f32
    %521 = vector.broadcast %cst_230 : f32 to vector<2x64xf32>
    %522 = arith.subf %521, %520 : vector<2x64xf32>
    %523 = math.exp %522 : vector<2x64xf32>
    %cst_231 = arith.constant 1.000000e+00 : f32
    %524 = vector.broadcast %cst_231 : f32 to vector<2x64xf32>
    %525 = arith.addf %524, %523 : vector<2x64xf32>
    %cst_232 = arith.constant 1.000000e+00 : f32
    %526 = vector.broadcast %cst_232 : f32 to vector<2x64xf32>
    %527 = arith.divf %526, %525 : vector<2x64xf32>
    %528 = vector.extract_strided_slice %527 {offsets = [0, 0], sizes = [2, 32], strides = [1, 1]} : vector<2x64xf32> to vector<2x32xf32>
    %529 = vector.extract_strided_slice %527 {offsets = [0, 32], sizes = [2, 32], strides = [1, 1]} : vector<2x64xf32> to vector<2x32xf32>
    %530 = vector.broadcast %492 : vector<1x32xf32> to vector<2x32xf32>
    %531 = arith.addf %519, %530 : vector<2x32xf32>
    %532 = arith.mulf %528, %531 : vector<2x32xf32>
    %533 = arith.addf %485, %532 : vector<2x32xf32>
    %534 = math.tanh %533 : vector<2x32xf32>
    %cst_233 = arith.constant 1.000000e+00 : f32
    %535 = vector.broadcast %cst_233 : f32 to vector<2x32xf32>
    %536 = arith.subf %535, %529 : vector<2x32xf32>
    %537 = arith.mulf %536, %534 : vector<2x32xf32>
    %538 = arith.mulf %529, %515 : vector<2x32xf32>
    %539 = arith.addf %537, %538 : vector<2x32xf32>
    %540 = arith.truncf %539 : vector<2x32xf32> to vector<2x32xbf16>
    %cst_234 = arith.constant dense<0.000000e+00> : vector<2x96xf32>
    %541 = tpu.matmul %540, %491, %cst_234 {dimension_numbers = #tpu.dot_dimension_numbers<[1], [0], [0], [1], [0, 0, 1, 1], [], []>} : vector<2x32xbf16>, vector<32x96xbf16>, vector<2x96xf32> -> vector<2x96xf32>
    %542 = vector.extract_strided_slice %541 {offsets = [0, 0], sizes = [2, 64], strides = [1, 1]} : vector<2x96xf32> to vector<2x64xf32>
    %543 = vector.extract_strided_slice %541 {offsets = [0, 64], sizes = [2, 32], strides = [1, 1]} : vector<2x96xf32> to vector<2x32xf32>
    %544 = arith.addf %475, %542 : vector<2x64xf32>
    %cst_235 = arith.constant 0.000000e+00 : f32
    %545 = vector.broadcast %cst_235 : f32 to vector<2x64xf32>
    %546 = arith.subf %545, %544 : vector<2x64xf32>
    %547 = math.exp %546 : vector<2x64xf32>
    %cst_236 = arith.constant 1.000000e+00 : f32
    %548 = vector.broadcast %cst_236 : f32 to vector<2x64xf32>
    %549 = arith.addf %548, %547 : vector<2x64xf32>
    %cst_237 = arith.constant 1.000000e+00 : f32
    %550 = vector.broadcast %cst_237 : f32 to vector<2x64xf32>
    %551 = arith.divf %550, %549 : vector<2x64xf32>
    %552 = vector.extract_strided_slice %551 {offsets = [0, 0], sizes = [2, 32], strides = [1, 1]} : vector<2x64xf32> to vector<2x32xf32>
    %553 = vector.extract_strided_slice %551 {offsets = [0, 32], sizes = [2, 32], strides = [1, 1]} : vector<2x64xf32> to vector<2x32xf32>
    %554 = vector.broadcast %492 : vector<1x32xf32> to vector<2x32xf32>
    %555 = arith.addf %543, %554 : vector<2x32xf32>
    %556 = arith.mulf %552, %555 : vector<2x32xf32>
    %557 = arith.addf %490, %556 : vector<2x32xf32>
    %558 = math.tanh %557 : vector<2x32xf32>
    %cst_238 = arith.constant 1.000000e+00 : f32
    %559 = vector.broadcast %cst_238 : f32 to vector<2x32xf32>
    %560 = arith.subf %559, %553 : vector<2x32xf32>
    %561 = arith.mulf %560, %558 : vector<2x32xf32>
    %562 = arith.mulf %553, %539 : vector<2x32xf32>
    %563 = arith.addf %561, %562 : vector<2x32xf32>
    %564 = vector.extract_strided_slice %563 {offsets = [0, 0], sizes = [2, 16], strides = [1, 1]} : vector<2x32xf32> to vector<2x16xf32>
    %565 = vector.extract_strided_slice %515 {offsets = [0, 16], sizes = [2, 16], strides = [1, 1]} : vector<2x32xf32> to vector<2x16xf32>
    %566 = tpu.concatenate %564, %565 in 1 : vector<2x16xf32>, vector<2x16xf32> -> vector<2x32xf32>
    %567 = arith.truncf %566 : vector<2x32xf32> to vector<2x32xbf16>
    %c0_239 = arith.constant 0 : index
    %c0_240 = arith.constant 0 : index
    %568 = vector.load %arg23[%c0_239, %c0_240] : memref<32x12xbf16, #tpu.memory_space<vmem>>, vector<32x12xbf16>
    %cst_241 = arith.constant dense<0.000000e+00> : vector<2x12xf32>
    %569 = tpu.matmul %567, %568, %cst_241 {dimension_numbers = #tpu.dot_dimension_numbers<[1], [0], [0], [1], [0, 0, 1, 1], [], []>} : vector<2x32xbf16>, vector<32x12xbf16>, vector<2x12xf32> -> vector<2x12xf32>
    %c0_242 = arith.constant 0 : index
    %c0_243 = arith.constant 0 : index
    %570 = vector.load %arg27[%c0_242, %c0_243] : memref<1x12xf32, #tpu.memory_space<vmem>>, vector<1x12xf32>
    %571 = vector.broadcast %570 : vector<1x12xf32> to vector<2x12xf32>
    %572 = arith.mulf %569, %571 : vector<2x12xf32>
    %c0_244 = arith.constant 0 : index
    %c0_245 = arith.constant 0 : index
    %573 = vector.load %arg28[%c0_244, %c0_245] : memref<1x12xf32, #tpu.memory_space<vmem>>, vector<1x12xf32>
    %574 = vector.broadcast %573 : vector<1x12xf32> to vector<2x12xf32>
    %575 = arith.addf %572, %574 : vector<2x12xf32>
    %c0_246 = arith.constant 0 : index
    %c0_247 = arith.constant 0 : index
    %576 = vector.load %arg2[%c0_246, %c0_247] : memref<2x24xf32, #tpu.memory_space<vmem>>, vector<2x24xf32>
    %577 = arith.truncf %576 : vector<2x24xf32> to vector<2x24xbf16>
    %c0_248 = arith.constant 0 : index
    %c0_249 = arith.constant 0 : index
    %578 = vector.load %arg24[%c0_248, %c0_249] : memref<24x96xbf16, #tpu.memory_space<vmem>>, vector<24x96xbf16>
    %cst_250 = arith.constant dense<0.000000e+00> : vector<2x96xf32>
    %579 = tpu.matmul %577, %578, %cst_250 {dimension_numbers = #tpu.dot_dimension_numbers<[1], [0], [0], [1], [0, 0, 1, 1], [], []>} : vector<2x24xbf16>, vector<24x96xbf16>, vector<2x96xf32> -> vector<2x96xf32>
    %cst_251 = arith.constant 0.000000e+00 : f32
    %580 = vector.broadcast %cst_251 : f32 to vector<2x96xf32>
    %581 = arith.maximumf %579, %580 : vector<2x96xf32>
    %582 = arith.truncf %581 : vector<2x96xf32> to vector<2x96xbf16>
    %c0_252 = arith.constant 0 : index
    %c0_253 = arith.constant 0 : index
    %583 = vector.load %arg25[%c0_252, %c0_253] : memref<96x64xbf16, #tpu.memory_space<vmem>>, vector<96x64xbf16>
    %cst_254 = arith.constant dense<0.000000e+00> : vector<2x64xf32>
    %584 = tpu.matmul %582, %583, %cst_254 {dimension_numbers = #tpu.dot_dimension_numbers<[1], [0], [0], [1], [0, 0, 1, 1], [], []>} : vector<2x96xbf16>, vector<96x64xbf16>, vector<2x64xf32> -> vector<2x64xf32>
    %cst_255 = arith.constant 0.000000e+00 : f32
    %585 = vector.broadcast %cst_255 : f32 to vector<2x64xf32>
    %586 = arith.maximumf %584, %585 : vector<2x64xf32>
    %587 = arith.truncf %586 : vector<2x64xf32> to vector<2x64xbf16>
    %c0_256 = arith.constant 0 : index
    %c0_257 = arith.constant 0 : index
    %588 = vector.load %arg26[%c0_256, %c0_257] : memref<64x128xbf16, #tpu.memory_space<vmem>>, vector<64x128xbf16>
    %cst_258 = arith.constant dense<0.000000e+00> : vector<2x128xf32>
    %589 = tpu.matmul %587, %588, %cst_258 {dimension_numbers = #tpu.dot_dimension_numbers<[1], [0], [0], [1], [0, 0, 1, 1], [], []>} : vector<2x64xbf16>, vector<64x128xbf16>, vector<2x128xf32> -> vector<2x128xf32>
    %c0_259 = arith.constant 0 : index
    %c0_260 = arith.constant 0 : index
    %590 = vector.load %arg29[%c0_259, %c0_260] : memref<1x128xf32, #tpu.memory_space<vmem>>, vector<1x128xf32>
    %591 = vector.broadcast %590 : vector<1x128xf32> to vector<2x128xf32>
    %592 = arith.mulf %589, %591 : vector<2x128xf32>
    %c0_261 = arith.constant 0 : index
    %c0_262 = arith.constant 0 : index
    %593 = vector.load %arg30[%c0_261, %c0_262] : memref<1x128xf32, #tpu.memory_space<vmem>>, vector<1x128xf32>
    %594 = vector.broadcast %593 : vector<1x128xf32> to vector<2x128xf32>
    %595 = arith.addf %592, %594 : vector<2x128xf32>
    %c0_263 = arith.constant 0 : index
    %c0_264 = arith.constant 0 : index
    %596 = vector.load %arg31[%c0_263, %c0_264] : memref<1x12xf32, #tpu.memory_space<vmem>>, vector<1x12xf32>
    %597 = vector.broadcast %596 : vector<1x12xf32> to vector<2x12xf32>
    %598 = arith.mulf %575, %597 : vector<2x12xf32>
    %cst_265 = arith.constant dense<0.000000e+00> : vector<2xf32>
    %599 = vector.multi_reduction <add>, %598, %cst_265 [1] : vector<2x12xf32> to vector<2xf32>
    %600 = vector.shape_cast %599 : vector<2xf32> to vector<2x1xf32>
    %c0_266 = arith.constant 0 : index
    %c0_267 = arith.constant 0 : index
    %601 = vector.load %arg32[%c0_266, %c0_267] : memref<1x128xf32, #tpu.memory_space<vmem>>, vector<1x128xf32>
    %602 = vector.broadcast %601 : vector<1x128xf32> to vector<2x128xf32>
    %603 = arith.mulf %595, %602 : vector<2x128xf32>
    %cst_268 = arith.constant dense<0.000000e+00> : vector<2xf32>
    %604 = vector.multi_reduction <add>, %603, %cst_268 [1] : vector<2x128xf32> to vector<2xf32>
    %605 = vector.shape_cast %604 : vector<2xf32> to vector<2x1xf32>
    %606 = arith.addf %600, %605 : vector<2x1xf32>
    %c0_269 = arith.constant 0 : index
    %c0_270 = arith.constant 0 : index
    %607 = vector.load %arg33[%c0_269, %c0_270] : memref<1x1xf32, #tpu.memory_space<vmem>>, vector<1x1xf32>
    %608 = vector.broadcast %607 : vector<1x1xf32> to vector<2x1xf32>
    %609 = arith.addf %606, %608 : vector<2x1xf32>
    %cst_271 = arith.constant 0.000000e+00 : f32
    %610 = vector.broadcast %cst_271 : f32 to vector<2x1xf32>
    %611 = arith.maximumf %609, %610 : vector<2x1xf32>
    %612 = math.absf %609 : vector<2x1xf32>
    %cst_272 = arith.constant 0.000000e+00 : f32
    %613 = vector.broadcast %cst_272 : f32 to vector<2x1xf32>
    %614 = arith.subf %613, %612 : vector<2x1xf32>
    %615 = math.exp %614 : vector<2x1xf32>
    %cst_273 = arith.constant 1.000000e+00 : f32
    %616 = vector.broadcast %cst_273 : f32 to vector<2x1xf32>
    %617 = arith.addf %616, %615 : vector<2x1xf32>
    %618 = math.log %617 : vector<2x1xf32>
    %619 = arith.addf %611, %618 : vector<2x1xf32>
    %c0_274 = arith.constant 0 : index
    %c0_275 = arith.constant 0 : index
    %620 = vector.load %arg34[%c0_274, %c0_275] : memref<2x1xf32, #tpu.memory_space<vmem>>, vector<2x1xf32>
    tpu.vector_store %arg34[%c0_274, %c0_275], %619 {strides = array<i32>} : memref<2x1xf32, #tpu.memory_space<vmem>>, vector<2x1xf32>,
    return
  }
  func.func @transform_0(%arg0: i32) -> (i32, i32, i32) {
    %c0_i32 = arith.constant 0 : i32
    %c0_i32_0 = arith.constant 0 : i32
    %c0_i32_1 = arith.constant 0 : i32
    %c0_i32_2 = arith.constant 0 : i32
    return %c0_i32, %c0_i32_0, %c0_i32_1 : i32, i32, i32
  }
  func.func @transform_1(%arg0: i32) -> (i32, i32) {
    %c0_i32 = arith.constant 0 : i32
    %c0_i32_0 = arith.constant 0 : i32
    %c0_i32_1 = arith.constant 0 : i32
    return %c0_i32, %c0_i32_0 : i32, i32
  }
  func.func @transform_2(%arg0: i32) -> (i32, i32, i32) {
    %c0_i32 = arith.constant 0 : i32
    %c0_i32_0 = arith.constant 0 : i32
    %c0_i32_1 = arith.constant 0 : i32
    %c0_i32_2 = arith.constant 0 : i32
    return %c0_i32, %c0_i32_0, %c0_i32_1 : i32, i32, i32
  }
  func.func @transform_3(%arg0: i32) -> (i32, i32) {
    %c0_i32 = arith.constant 0 : i32
    %c0_i32_0 = arith.constant 0 : i32
    %c0_i32_1 = arith.constant 0 : i32
    return %c0_i32, %c0_i32_0 : i32, i32
  }
  func.func @transform_4(%arg0: i32) -> (i32, i32) {
    %c0_i32 = arith.constant 0 : i32
    %c0_i32_0 = arith.constant 0 : i32
    %c0_i32_1 = arith.constant 0 : i32
    return %c0_i32, %c0_i32_0 : i32, i32
  }
  func.func @transform_5(%arg0: i32) -> (i32, i32, i32) {
    %c0_i32 = arith.constant 0 : i32
    %c0_i32_0 = arith.constant 0 : i32
    %c0_i32_1 = arith.constant 0 : i32
    %c0_i32_2 = arith.constant 0 : i32
    return %c0_i32, %c0_i32_0, %c0_i32_1 : i32, i32, i32
  }
  func.func @transform_6(%arg0: i32) -> (i32, i32) {
    %c0_i32 = arith.constant 0 : i32
    %c0_i32_0 = arith.constant 0 : i32
    %c0_i32_1 = arith.constant 0 : i32
    return %c0_i32, %c0_i32_0 : i32, i32
  }
  func.func @transform_7(%arg0: i32) -> (i32, i32) {
    %c0_i32 = arith.constant 0 : i32
    %c0_i32_0 = arith.constant 0 : i32
    %c0_i32_1 = arith.constant 0 : i32
    return %c0_i32, %c0_i32_0 : i32, i32
  }
  func.func @transform_8(%arg0: i32) -> (i32, i32, i32) {
    %c0_i32 = arith.constant 0 : i32
    %c0_i32_0 = arith.constant 0 : i32
    %c0_i32_1 = arith.constant 0 : i32
    %c0_i32_2 = arith.constant 0 : i32
    return %c0_i32, %c0_i32_0, %c0_i32_1 : i32, i32, i32
  }
  func.func @transform_9(%arg0: i32) -> (i32, i32) {
    %c0_i32 = arith.constant 0 : i32
    %c0_i32_0 = arith.constant 0 : i32
    %c0_i32_1 = arith.constant 0 : i32
    return %c0_i32, %c0_i32_0 : i32, i32
  }
  func.func @transform_10(%arg0: i32) -> (i32, i32) {
    %c0_i32 = arith.constant 0 : i32
    %c0_i32_0 = arith.constant 0 : i32
    %c0_i32_1 = arith.constant 0 : i32
    return %c0_i32, %c0_i32_0 : i32, i32
  }
  func.func @transform_11(%arg0: i32) -> (i32, i32, i32) {
    %c0_i32 = arith.constant 0 : i32
    %c0_i32_0 = arith.constant 0 : i32
    %c0_i32_1 = arith.constant 0 : i32
    %c0_i32_2 = arith.constant 0 : i32
    return %c0_i32, %c0_i32_0, %c0_i32_1 : i32, i32, i32
  }
  func.func @transform_12(%arg0: i32) -> (i32, i32) {
    %c0_i32 = arith.constant 0 : i32
    %c0_i32_0 = arith.constant 0 : i32
    %c0_i32_1 = arith.constant 0 : i32
    return %c0_i32, %c0_i32_0 : i32, i32
  }
  func.func @transform_13(%arg0: i32) -> (i32, i32) {
    %c0_i32 = arith.constant 0 : i32
    %c0_i32_0 = arith.constant 0 : i32
    %c0_i32_1 = arith.constant 0 : i32
    return %c0_i32, %c0_i32_0 : i32, i32
  }
  func.func @transform_14(%arg0: i32) -> (i32, i32) {
    %c0_i32 = arith.constant 0 : i32
    %c0_i32_0 = arith.constant 0 : i32
    %c0_i32_1 = arith.constant 0 : i32
    return %c0_i32, %c0_i32_0 : i32, i32
  }
  func.func @transform_15(%arg0: i32) -> (i32, i32) {
    %c0_i32 = arith.constant 0 : i32
    %c0_i32_0 = arith.constant 0 : i32
    %c0_i32_1 = arith.constant 0 : i32
    return %c0_i32, %c0_i32_0 : i32, i32
  }
  func.func @transform_16(%arg0: i32) -> (i32, i32) {
    %c0_i32 = arith.constant 0 : i32
    %c0_i32_0 = arith.constant 0 : i32
    %c0_i32_1 = arith.constant 0 : i32
    return %c0_i32, %c0_i32_0 : i32, i32
  }
  func.func @transform_17(%arg0: i32) -> (i32, i32) {
    %c0_i32 = arith.constant 0 : i32
    %c0_i32_0 = arith.constant 0 : i32
    %c0_i32_1 = arith.constant 0 : i32
    return %c0_i32, %c0_i32_0 : i32, i32
  }
  func.func @transform_18(%arg0: i32) -> (i32, i32) {
    %c0_i32 = arith.constant 0 : i32
    %c0_i32_0 = arith.constant 0 : i32
    %c0_i32_1 = arith.constant 0 : i32
    return %c0_i32, %c0_i32_0 : i32, i32
  }
  func.func @transform_19(%arg0: i32) -> (i32, i32) {
    %c0_i32 = arith.constant 0 : i32
    %c0_i32_0 = arith.constant 0 : i32
    %c0_i32_1 = arith.constant 0 : i32
    return %c0_i32, %c0_i32_0 : i32, i32
  }
  func.func @transform_20(%arg0: i32) -> (i32, i32) {
    %c0_i32 = arith.constant 0 : i32
    %c0_i32_0 = arith.constant 0 : i32
    %c0_i32_1 = arith.constant 0 : i32
    return %c0_i32, %c0_i32_0 : i32, i32
  }
  func.func @transform_21(%arg0: i32) -> (i32, i32) {
    %c0_i32 = arith.constant 0 : i32
    %c0_i32_0 = arith.constant 0 : i32
    %c0_i32_1 = arith.constant 0 : i32
    return %c0_i32, %c0_i32_0 : i32, i32
  }
  func.func @transform_22(%arg0: i32) -> (i32, i32) {
    %c0_i32 = arith.constant 0 : i32
    %c0_i32_0 = arith.constant 0 : i32
    %c0_i32_1 = arith.constant 0 : i32
    return %c0_i32, %c0_i32_0 : i32, i32
  }
  func.func @transform_23(%arg0: i32) -> (i32, i32) {
    %c0_i32 = arith.constant 0 : i32
    %c0_i32_0 = arith.constant 0 : i32
    %c0_i32_1 = arith.constant 0 : i32
    return %c0_i32, %c0_i32_0 : i32, i32
  }
  func.func @transform_24(%arg0: i32) -> (i32, i32) {
    %c0_i32 = arith.constant 0 : i32
    %c0_i32_0 = arith.constant 0 : i32
    %c0_i32_1 = arith.constant 0 : i32
    return %c0_i32, %c0_i32_0 : i32, i32
  }
  func.func @transform_25(%arg0: i32) -> (i32, i32) {
    %c0_i32 = arith.constant 0 : i32
    %c0_i32_0 = arith.constant 0 : i32
    %c0_i32_1 = arith.constant 0 : i32
    return %c0_i32, %c0_i32_0 : i32, i32
  }
  func.func @transform_26(%arg0: i32) -> (i32, i32) {
    %c0_i32 = arith.constant 0 : i32
    %c0_i32_0 = arith.constant 0 : i32
    %c0_i32_1 = arith.constant 0 : i32
    return %c0_i32, %c0_i32_0 : i32, i32
  }
  func.func @transform_27(%arg0: i32) -> (i32, i32) {
    %c0_i32 = arith.constant 0 : i32
    %c0_i32_0 = arith.constant 0 : i32
    %c0_i32_1 = arith.constant 0 : i32
    return %c0_i32, %c0_i32_0 : i32, i32
  }
  func.func @transform_28(%arg0: i32) -> (i32, i32) {
    %c0_i32 = arith.constant 0 : i32
    %c0_i32_0 = arith.constant 0 : i32
    %c0_i32_1 = arith.constant 0 : i32
    return %c0_i32, %c0_i32_0 : i32, i32
  }
  func.func @transform_29(%arg0: i32) -> (i32, i32) {
    %c0_i32 = arith.constant 0 : i32
    %c0_i32_0 = arith.constant 0 : i32
    %c0_i32_1 = arith.constant 0 : i32
    return %c0_i32, %c0_i32_0 : i32, i32
  }
  func.func @transform_30(%arg0: i32) -> (i32, i32) {
    %c0_i32 = arith.constant 0 : i32
    %c0_i32_0 = arith.constant 0 : i32
    %c0_i32_1 = arith.constant 0 : i32
    return %c0_i32, %c0_i32_0 : i32, i32
  }
  func.func @transform_31(%arg0: i32) -> (i32, i32) {
    %c0_i32 = arith.constant 0 : i32
    %c0_i32_0 = arith.constant 0 : i32
    %c0_i32_1 = arith.constant 0 : i32
    return %c0_i32, %c0_i32_0 : i32, i32
  }
  func.func @transform_32(%arg0: i32) -> (i32, i32) {
    %c0_i32 = arith.constant 0 : i32
    %c0_i32_0 = arith.constant 0 : i32
    %c0_i32_1 = arith.constant 0 : i32
    return %c0_i32, %c0_i32_0 : i32, i32
  }
  func.func @transform_33(%arg0: i32) -> (i32, i32) {
    %c0_i32 = arith.constant 0 : i32
    %c0_i32_0 = arith.constant 0 : i32
    %c0_i32_1 = arith.constant 0 : i32
    return %c0_i32, %c0_i32_0 : i32, i32
  }
}

</mosaic_0001>

<bundles_post_ra>
// kernel: gene_interaction_forward.1
= control target key start
LH: loop header
LB: loop body
LE: loop exit
PB: predicated region body
PF: predicated region fallthrough
CT: control target
= control target key end

     0   :  { %s6355_s6 = smov 1   ;;  %s6356_s10 = smov 2   ;;  %s7444_s0 = inlined_call_operand.smem [shape: u32[34], index: -1, kind: input, shape index: {}] }
   0x1   :  { %s6423_s5 = sld [smem:[%s7444_s0]]   ;;  %s6357_s14 = smov 3  }
   0x2   :  { %s6428_s9 = sld [smem:[%s7444_s0 + %s6355_s6]]   ;;  %s6358_s18 = smov 4  }
   0x3   :  { %s6433_s13 = sld [smem:[%s7444_s0 + %s6356_s10]]   ;;  %s6359_s22 = smov 5  }
   0x4   :  { %s6438_s17 = sld [smem:[%s7444_s0 + %s6357_s14]]   ;;  %s6360_s26 = smov 6  }
   0x5   :  { %s6443_s21 = sld [smem:[%s7444_s0 + %s6358_s18]]   ;;  %s6361_s30 = smov 7  }
   0x6   :  { %s6448_s25 = sld [smem:[%s7444_s0 + %s6359_s22]]   ;;  %s6362_s4 = smov 8  }
   0x7   :  { %7459 = sst [smem:[#allocation43_spill]] %s6423_s5  ;;  %s6363_s10 = smov 9  }
   0x8   :  { %7460 = sst [smem:[#allocation44_spill]] %s6428_s9  ;;  %s6364_s15 = smov 10  }
   0x9   :  { %7461 = sst [smem:[#allocation45_spill]] %s6433_s13  ;;  %s6365_s20 = smov 11  }
   0xa   :  { %s6453_s29 = sld [smem:[%s7444_s0 + %s6360_s26]]   ;;  %s6366_s26 = smov 12  }
   0xb   :  { %s6458_s3 = sld [smem:[%s7444_s0 + %s6361_s30]]   ;;  %s6367_s1 = smov 13  }
   0xc   :  { %s6463_s8 = sld [smem:[%s7444_s0 + %s6362_s4]]   ;;  %s6368_s7 = smov 14  }
   0xd   :  { %s6468_s14 = sld [smem:[%s7444_s0 + %s6363_s10]]   ;;  %s6370_s22 = smov 16  }
   0xe   :  { %s6473_s19 = sld [smem:[%s7444_s0 + %s6364_s15]]   ;;  %s6369_s15 = smov 15  }
   0xf   :  { %s6478_s24 = sld [smem:[%s7444_s0 + %s6365_s20]]   ;;  %s6371_s28 = smov 17  }
  0x10   :  { %s6483_s30 = sld [smem:[%s7444_s0 + %s6366_s26]]  }
  0x11   :  { %s6488_s6 = sld [smem:[%s7444_s0 + %s6367_s1]]   ;;  %s6387_s1 = smov 33  }
  0x12   :  { %s6493_s12 = sld [smem:[%s7444_s0 + %s6368_s7]]   ;;  %s6372_s7 = smov 18  }
  0x13   :  { %s6498_s20 = sld [smem:[%s7444_s0 + %s6369_s15]]   ;;  %s6373_s15 = smov 19  }
  0x14   :  { %s6503_s27 = sld [smem:[%s7444_s0 + %s6370_s22]]   ;;  %s6374_s22 = smov 20  }
  0x15   :  { %s6508_s4 = sld [smem:[%s7444_s0 + %s6371_s28]]   ;;  %s6375_s28 = smov 21  }
  0x16   :  { %s6513_s9 = sld [smem:[%s7444_s0 + %s6372_s7]]   ;;  %s6376_s7 = smov 22  }
  0x17   :  { %7462 = sst [smem:[#allocation46_spill]] %s6488_s6 }
  0x18   :  { %7463 = sst [smem:[#allocation47_spill]] %s6493_s12 }
  0x19   :  { %7464 = sst [smem:[#allocation48_spill]] %s6498_s20 }
  0x1a   :  { %s6518_s20 = sld [smem:[%s7444_s0 + %s6373_s15]]   ;;  %s6377_s15 = smov 23  }
  0x1b   :  { %7465 = sst [smem:[#allocation49_spill]] %s6508_s4 }
  0x1c   :  { %7466 = sst [smem:[#allocation50_spill]] %s6513_s9 }
  0x1d   :  { %s6523_s12 = sld [smem:[%s7444_s0 + %s6374_s22]]   ;;  %s6378_s22 = smov 24  }
  0x1e   :  { %s6528_s5 = sld [smem:[%s7444_s0 + %s6375_s28]]   ;;  %s6379_s28 = smov 25  }
  0x1f   :  { %s6533_s9 = sld [smem:[%s7444_s0 + %s6376_s7]]   ;;  %s6380_s7 = smov 26  }
  0x20   :  { %7467 = sst [smem:[#allocation51_spill]] %s6518_s20 }
  0x21   :  { %s6538_s20 = sld [smem:[%s7444_s0 + %s6377_s15]]   ;;  %s6381_s15 = smov 27  }
  0x22   :  { %s6543_s13 = sld [smem:[%s7444_s0 + %s6378_s22]]   ;;  %s6382_s22 = smov 28  }
  0x23   :  { %s6558_s4 = sld [smem:[%s7444_s0 + %s6381_s15]]   ;;  %s6385_s15 = smov 31  }
  0x24   :  { %7468 = sst [smem:[#allocation52_spill]] %s6528_s5 }
  0x25   :  { %7469 = sst [smem:[#allocation53_spill]] %s6533_s9 }
  0x26   :  { %s6548_s5 = sld [smem:[%s7444_s0 + %s6379_s28]]   ;;  %s6383_s28 = smov 29  }
  0x27   :  { %s6553_s9 = sld [smem:[%s7444_s0 + %s6380_s7]]   ;;  %s6384_s7 = smov 30  }
  0x28   :  { %7470 = sst [smem:[#allocation54_spill]] %s6543_s13 }
  0x29   :  { %s6563_s13 = sld [smem:[%s7444_s0 + %s6382_s22]]   ;;  %s6386_s22 = smov 32  }
  0x2a   :  { %s6578_s6 = sld [smem:[%s7444_s0 + %s6385_s15]]  }
  0x2c   :  { %7471 = sst [smem:[#allocation55_spill]] %s6548_s5 }
  0x2d   :  { %7472 = sst [smem:[#allocation56_spill]] %s6553_s9 }
  0x2e   :  { %s6568_s5 = sld [smem:[%s7444_s0 + %s6383_s28]]  }
  0x2f   :  { %7473 = sst [smem:[#allocation57_spill]] %s6563_s13 }
  0x30   :  { %s6573_s9 = sld [smem:[%s7444_s0 + %s6384_s7]]  }
  0x31   :  { %s4760_s13 = sld [smem:[%s7444_s0 + %s6386_s22]]  }
  0x34   :  { %7474 = sst [smem:[#allocation58_spill]] %s6568_s5 }
  0x35   :  { %s6586_s5 = sld [smem:[%s7444_s0 + %s6387_s1]]  }
  0x37   :  { %v72_v0 = vstv %s4760_s13 }
  0x38   :  { %73 = vst [vmem:[#allocation3] sm:$0x1] %v72_v0 }
  0x39   :  { %74 = vsyncpa [#allocation5], 0 }
  0x3a   :  { %75 = vsyncpa [#allocation7], 0 }
  0x3b   :  { %76 = vsyncpa [#allocation10], 0 }
  0x3c   :  { %77 = vsyncpa [#allocation13], 0 }
  0x3d   :  { %78 = vsyncpa [#allocation16], 0 }
  0x3e   :  { %79 = vsyncpa [#allocation19], 0 }
  0x3f   :  { %80 = vsyncpa [#allocation22], 0 }
  0x40   :  { %81 = vsyncpa [#allocation25], 0 }
  0x41   :  { %82 = vsyncpa [#allocation28], 0 }
  0x42   :  { %83 = vsyncpa [#allocation31], 0  ;;  %s6388_s7 = smov [#allocation6]   ;;  %s6389_s11 = smov [#allocation9]  }
  0x43   :  { %s106_s10 = sshll.u32 %s6388_s7, 4  ;;  %s128_s0 = sshll.u32 %s6389_s11, 4  ;;  %s107_s10 = int_to_ptr.vmem [resolvable:$true] %s106_s10  ;;  %s129_s0 = int_to_ptr.vmem [resolvable:$true] %s128_s0 }
  0x44   :  { %s5917_s13 = scalar_lea.hbm %s6443_s21, 16 }
  0x45   :  { %p5918_p0 = scmp.ne.s32.totalorder %s6443_s21, %s5917_s13  ;;  %p5921_p1 = scmp.lt.u32.totalorder %s5917_s13, %s6443_s21 }
  0x47   :  { %p5923_p2 = pnand %p5921_p1, %p5918_p0 }
  0x49   :  { %5926 = shalt.err (!%p5923_p2)
}
  0x4a   :  { %s5927_s15 = scalar_lea.vmem %s107_s10, 16  ;;  %s5931_s16 = scalar_lea.vmem %s107_s10, 32 }
  0x4b   :  { %p5928_p3 = scmp.ne.s32.totalorder %s107_s10, %s5927_s15  ;;  %p5932_p4 = scmp.lt.s32.totalorder %s107_s10, %s107_s10 }
  0x4c   :  { %p5933_p5 = scmp.lt.s32.totalorder %s5931_s16, %s5927_s15 }
  0x4e   :  { %p5934_p6 = por %p5933_p5, %p5932_p4 }
  0x50   :  { %p5935_p7 = pnand %p5934_p6, %p5928_p3 }
  0x52   :  { %5938 = shalt.err (!%p5935_p7)
}
  0x53   :  { %109 = dma.hbm_to_vmem [thread:$0]  %s6443_s21, 16, %s107_s10, [#allocation7]  }
  0x54   :  { %s5939_s18 = scalar_lea.hbm %s6453_s29, 16 }
  0x55   :  { %p5940_p8 = scmp.ne.s32.totalorder %s6453_s29, %s5939_s18  ;;  %p5943_p9 = scmp.lt.u32.totalorder %s5939_s18, %s6453_s29 }
  0x57   :  { %p5945_p10 = pnand %p5943_p9, %p5940_p8 }
  0x59   :  { %5948 = shalt.err (!%p5945_p10)
}
  0x5a   :  { %s5949_s22 = scalar_lea.vmem %s129_s0, 16  ;;  %s5953_s23 = scalar_lea.vmem %s129_s0, 32 }
  0x5b   :  { %p5950_p11 = scmp.ne.s32.totalorder %s129_s0, %s5949_s22  ;;  %p5954_p12 = scmp.lt.s32.totalorder %s129_s0, %s129_s0 }
  0x5c   :  { %p5955_p13 = scmp.lt.s32.totalorder %s5953_s23, %s5949_s22 }
  0x5e   :  { %p5956_p0 = por %p5955_p13, %p5954_p12 }
  0x60   :  { %p5957_p1 = pnand %p5956_p0, %p5950_p11 }
  0x62   :  { %5960 = shalt.err (!%p5957_p1)
}
  0x63   :  { %131 = dma.hbm_to_vmem [thread:$0]  %s6453_s29, 16, %s129_s0, [#allocation10]  }
  0x64   :  { %s6390_s26 = smov [#allocation12]   ;;  %s6391_s1 = smov [#allocation15]  }
  0x65   :  { %s147_s21 = sshll.u32 %s6390_s26, 4  ;;  %s170_s28 = sshll.u32 %s6391_s1, 4  ;;  %s148_s21 = int_to_ptr.vmem [resolvable:$true] %s147_s21  ;;  %s6596_s28 = int_to_ptr.vmem [resolvable:$true] %s170_s28 }
  0x66   :  { %s5961_s2 = scalar_lea.hbm %s6463_s8, 3072 }
  0x67   :  { %p5962_p2 = scmp.ne.s32.totalorder %s6463_s8, %s5961_s2  ;;  %p5965_p3 = scmp.lt.u32.totalorder %s5961_s2, %s6463_s8 }
  0x69   :  { %p5967_p4 = pnand %p5965_p3, %p5962_p2 }
  0x6b   :  { %5970 = shalt.err (!%p5967_p4)
}
  0x6c   :  { %s5971_s7 = scalar_lea.vmem %s148_s21, 3072  ;;  %p5976_p6 = scmp.lt.s32.totalorder %s148_s21, %s148_s21 }
  0x6d   :  { %p5972_p5 = scmp.ne.s32.totalorder %s148_s21, %s5971_s7  ;;  %p5977_p7 = scmp.lt.s32.totalorder %s5971_s7, %s5971_s7 }
  0x6f   :  { %p5978_p8 = por %p5977_p7, %p5976_p6 }
  0x71   :  { %p5979_p9 = pnand %p5978_p8, %p5972_p5 }
  0x73   :  { %5982 = shalt.err (!%p5979_p9)
}
  0x74   :  { %s6392_s29 = smov 64   ;;  %s6393_s10 = smov 4  }
  0x75   :  { %153 = dma.hbm_to_vmem [thread:$0]  %s6463_s8, 3072, %s148_s21, [#allocation13], %s6392_s29, %s6392_s29, %s6393_s10  }
  0x76   :  { %s5983_s11 = scalar_lea.hbm %s6473_s19, 16 }
  0x77   :  { %p5984_p10 = scmp.ne.s32.totalorder %s6473_s19, %s5983_s11  ;;  %p5987_p11 = scmp.lt.u32.totalorder %s5983_s11, %s6473_s19 }
  0x79   :  { %p5989_p12 = pnand %p5987_p11, %p5984_p10 }
  0x7b   :  { %5992 = shalt.err (!%p5989_p12)
}
  0x7c   :  { %s5993_s0 = scalar_lea.vmem %s6596_s28, 16  ;;  %s5997_s13 = scalar_lea.vmem %s6596_s28, 32 }
  0x7d   :  { %p5994_p13 = scmp.ne.s32.totalorder %s6596_s28, %s5993_s0  ;;  %p5998_p0 = scmp.lt.s32.totalorder %s6596_s28, %s6596_s28 }
  0x7e   :  { %p5999_p1 = scmp.lt.s32.totalorder %s5997_s13, %s5993_s0 }
  0x80   :  { %p6000_p2 = por %p5999_p1, %p5998_p0 }
  0x82   :  { %p6001_p3 = pnand %p6000_p2, %p5994_p13 }
  0x84   :  { %6004 = shalt.err (!%p6001_p3)
}
  0x85   :  { %173 = dma.hbm_to_vmem [thread:$0]  %s6473_s19, 16, %s6596_s28, [#allocation16]  }
  0x86   :  { %s6394_s8 = smov [#allocation18]   ;;  %s6395_s16 = smov [#allocation21]  }
  0x87   :  { %s192_s15 = sshll.u32 %s6394_s8, 4  ;;  %s216_s18 = sshll.u32 %s6395_s16, 4  ;;  %s193_s15 = int_to_ptr.vmem [resolvable:$true] %s192_s15  ;;  %s217_s18 = int_to_ptr.vmem [resolvable:$true] %s216_s18 }
  0x88   :  { %s6005_s22 = scalar_lea.hbm %s6483_s30, 16 }
  0x89   :  { %p6006_p4 = scmp.ne.s32.totalorder %s6483_s30, %s6005_s22  ;;  %p6009_p5 = scmp.lt.u32.totalorder %s6005_s22, %s6483_s30 }
  0x8b   :  { %p6011_p6 = pnand %p6009_p5, %p6006_p4 }
  0x8d   :  { %6014 = shalt.err (!%p6011_p6)
}
  0x8e   :  { %s6015_s23 = scalar_lea.vmem %s193_s15, 16  ;;  %s6019_s26 = scalar_lea.vmem %s193_s15, 32 }
  0x8f   :  { %p6016_p7 = scmp.ne.s32.totalorder %s193_s15, %s6015_s23  ;;  %p6020_p8 = scmp.lt.s32.totalorder %s193_s15, %s193_s15 }
  0x90   :  { %p6021_p9 = scmp.lt.s32.totalorder %s6019_s26, %s6015_s23 }
  0x92   :  { %p6022_p10 = por %p6021_p9, %p6020_p8 }
  0x94   :  { %p6023_p11 = pnand %p6022_p10, %p6016_p7 }
  0x96   :  { %6026 = shalt.err (!%p6023_p11)
}
  0x97   :  { %195 = dma.hbm_to_vmem [thread:$0]  %s6483_s30, 16, %s193_s15, [#allocation19]  }
  0x98   :  { %s6027_s19 = scalar_lea.hbm %s6503_s27, 16 }
  0x99   :  { %p6028_p12 = scmp.ne.s32.totalorder %s6503_s27, %s6027_s19  ;;  %p6031_p13 = scmp.lt.u32.totalorder %s6027_s19, %s6503_s27 }
  0x9b   :  { %p6033_p0 = pnand %p6031_p13, %p6028_p12 }
  0x9d   :  { %6036 = shalt.err (!%p6033_p0)
}
  0x9e   :  { %s6037_s21 = scalar_lea.vmem %s217_s18, 16  ;;  %s6041_s1 = scalar_lea.vmem %s217_s18, 32 }
  0x9f   :  { %p6038_p1 = scmp.ne.s32.totalorder %s217_s18, %s6037_s21  ;;  %p6042_p2 = scmp.lt.s32.totalorder %s217_s18, %s217_s18 }
  0xa0   :  { %p6043_p3 = scmp.lt.s32.totalorder %s6041_s1, %s6037_s21 }
  0xa2   :  { %p6044_p4 = por %p6043_p3, %p6042_p2 }
  0xa4   :  { %p6045_p5 = pnand %p6044_p4, %p6038_p1 }
  0xa6   :  { %6048 = shalt.err (!%p6045_p5)
}
  0xa7   :  { %219 = dma.hbm_to_vmem [thread:$0]  %s6503_s27, 16, %s217_s18, [#allocation22]  }
  0xa8   :  { %s6396_s28 = smov [#allocation24]   ;;  %s6397_s2 = smov [#allocation27]  }
  0xa9   :  { %s240_s30 = sshll.u32 %s6396_s28, 4  ;;  %s261_s7 = sshll.u32 %s6397_s2, 4  ;;  %s241_s30 = int_to_ptr.vmem [resolvable:$true] %s240_s30  ;;  %s6623_s7 = int_to_ptr.vmem [resolvable:$true] %s261_s7 }
  0xaa   :  { %s6049_s11 = scalar_lea.hbm %s6523_s12, 16 }
  0xab   :  { %p6050_p6 = scmp.ne.s32.totalorder %s6523_s12, %s6049_s11  ;;  %p6053_p7 = scmp.lt.u32.totalorder %s6049_s11, %s6523_s12 }
  0xad   :  { %p6055_p8 = pnand %p6053_p7, %p6050_p6 }
  0xaf   :  { %6058 = shalt.err (!%p6055_p8)
}
  0xb0   :  { %s6059_s0 = scalar_lea.vmem %s241_s30, 16  ;;  %s6063_s13 = scalar_lea.vmem %s241_s30, 32 }
  0xb1   :  { %p6060_p9 = scmp.ne.s32.totalorder %s241_s30, %s6059_s0  ;;  %p6064_p10 = scmp.lt.s32.totalorder %s241_s30, %s241_s30 }
  0xb2   :  { %p6065_p11 = scmp.lt.s32.totalorder %s6063_s13, %s6059_s0 }
  0xb4   :  { %p6066_p12 = por %p6065_p11, %p6064_p10 }
  0xb6   :  { %p6067_p13 = pnand %p6066_p12, %p6060_p9 }
  0xb8   :  { %6070 = shalt.err (!%p6067_p13)
}
  0xb9   :  { %243 = dma.hbm_to_vmem [thread:$0]  %s6523_s12, 16, %s241_s30, [#allocation25]  }
  0xba   :  { %s6071_s27 = scalar_lea.hbm %s6538_s20, 192 }
  0xbb   :  { %p6072_p0 = scmp.ne.s32.totalorder %s6538_s20, %s6071_s27  ;;  %p6075_p1 = scmp.lt.u32.totalorder %s6071_s27, %s6538_s20 }
  0xbd   :  { %p6077_p2 = pnand %p6075_p1, %p6072_p0 }
  0xbf   :  { %6080 = shalt.err (!%p6077_p2)
}
  0xc0   :  { %s6081_s8 = scalar_lea.vmem %s6623_s7, 192  ;;  %p6086_p4 = scmp.lt.s32.totalorder %s6623_s7, %s6623_s7 }
  0xc1   :  { %p6082_p3 = scmp.ne.s32.totalorder %s6623_s7, %s6081_s8  ;;  %p6087_p5 = scmp.lt.s32.totalorder %s6081_s8, %s6081_s8 }
  0xc3   :  { %p6088_p6 = por %p6087_p5, %p6086_p4 }
  0xc5   :  { %p6089_p7 = pnand %p6088_p6, %p6082_p3 }
  0xc7   :  { %6092 = shalt.err (!%p6089_p7)
}
  0xc8   :  { %267 = dma.hbm_to_vmem [thread:$0]  %s6538_s20, 192, %s6623_s7, [#allocation28], %s6392_s29, %s6392_s29, %s6393_s10  }
  0xc9   :  { %s6398_s12 = smov [#allocation30]   ;;  %s6399_s16 = smov [#allocation4]  }
  0xca   :  { %s288_s15 = sshll.u32 %s6398_s12, 4  ;;  %s96_s18 = sshll.u32 %s6399_s16, 4  ;;  %s289_s15 = int_to_ptr.vmem [resolvable:$true] %s288_s15  ;;  %s97_s18 = int_to_ptr.vmem [resolvable:$true] %s96_s18 }
  0xcb   :  { %s6093_s22 = scalar_lea.hbm %s6558_s4, 16 }
  0xcc   :  { %p6094_p8 = scmp.ne.s32.totalorder %s6558_s4, %s6093_s22  ;;  %p6097_p9 = scmp.lt.u32.totalorder %s6093_s22, %s6558_s4 }
  0xce   :  { %p6099_p10 = pnand %p6097_p9, %p6094_p8 }
  0xd0   :  { %6102 = shalt.err (!%p6099_p10)
}
  0xd1   :  { %s6103_s23 = scalar_lea.vmem %s289_s15, 16  ;;  %s6107_s26 = scalar_lea.vmem %s289_s15, 32 }
  0xd2   :  { %p6104_p11 = scmp.ne.s32.totalorder %s289_s15, %s6103_s23  ;;  %p6108_p12 = scmp.lt.s32.totalorder %s289_s15, %s289_s15 }
  0xd3   :  { %p6109_p13 = scmp.lt.s32.totalorder %s6107_s26, %s6103_s23 }
  0xd5   :  { %p6110_p0 = por %p6109_p13, %p6108_p12 }
  0xd7   :  { %p6111_p1 = pnand %p6110_p0, %p6104_p11 }
  0xd9   :  { %6114 = shalt.err (!%p6111_p1)
}
  0xda   :  { %291 = dma.hbm_to_vmem [thread:$0]  %s6558_s4, 16, %s289_s15, [#allocation31]  }
  0xdb   :  { %s6115_s20 = scalar_lea.hbm %s6438_s17, 16 }
  0xdc   :  { %p6116_p2 = scmp.ne.s32.totalorder %s6438_s17, %s6115_s20  ;;  %p6119_p3 = scmp.lt.u32.totalorder %s6115_s20, %s6438_s17 }
  0xde   :  { %p6121_p4 = pnand %p6119_p3, %p6116_p2 }
  0xe0   :  { %6124 = shalt.err (!%p6121_p4)
}
  0xe1   :  { %s6125_s19 = scalar_lea.vmem %s97_s18, 16  ;;  %s6129_s21 = scalar_lea.vmem %s97_s18, 32 }
  0xe2   :  { %p6126_p5 = scmp.ne.s32.totalorder %s97_s18, %s6125_s19  ;;  %p6130_p6 = scmp.lt.s32.totalorder %s97_s18, %s97_s18 }
  0xe3   :  { %p6131_p7 = scmp.lt.s32.totalorder %s6129_s21, %s6125_s19 }
  0xe5   :  { %p6132_p8 = por %p6131_p7, %p6130_p6 }
  0xe7   :  { %p6133_p9 = pnand %p6132_p8, %p6126_p5 }
  0xe9   :  { %6136 = shalt.err (!%p6133_p9)
}
  0xea   :  { %99 = dma.hbm_to_vmem [thread:$0]  %s6438_s17, 16, %s97_s18, [#allocation5]  }
  0xeb   :  { %s6400_s1 = smov [#allocation8]   ;;  %s6401_s28 = smov [#allocation11]  }
  0xec   :  { %s115_s4 = sshll.u32 %s6400_s1, 4  ;;  %s138_s30 = sshll.u32 %s6401_s28, 4  ;;  %s116_s4 = int_to_ptr.vmem [resolvable:$true] %s115_s4  ;;  %s139_s30 = int_to_ptr.vmem [resolvable:$true] %s138_s30 }
  0xed   :  { %s6137_s2 = scalar_lea.hbm %s6448_s25, 3072 }
  0xee   :  { %p6138_p10 = scmp.ne.s32.totalorder %s6448_s25, %s6137_s2  ;;  %p6141_p11 = scmp.lt.u32.totalorder %s6137_s2, %s6448_s25 }
  0xf0   :  { %p6143_p12 = pnand %p6141_p11, %p6138_p10 }
  0xf2   :  { %6146 = shalt.err (!%p6143_p12)
}
  0xf3   :  { %s6147_s7 = scalar_lea.vmem %s116_s4, 3072  ;;  %p6152_p0 = scmp.lt.s32.totalorder %s116_s4, %s116_s4 }
  0xf4   :  { %p6148_p13 = scmp.ne.s32.totalorder %s116_s4, %s6147_s7  ;;  %p6153_p1 = scmp.lt.s32.totalorder %s6147_s7, %s6147_s7 }
  0xf6   :  { %p6154_p2 = por %p6153_p1, %p6152_p0 }
  0xf8   :  { %p6155_p3 = pnand %p6154_p2, %p6148_p13 }
  0xfa   :  { %6158 = shalt.err (!%p6155_p3)
}
  0xfb   :  { %121 = dma.hbm_to_vmem [thread:$0]  %s6448_s25, 3072, %s116_s4, [#allocation7], %s6392_s29, %s6392_s29, %s6393_s10  }
  0xfc   :  { %s6159_s17 = scalar_lea.hbm %s6458_s3, 16 }
  0xfd   :  { %p6160_p4 = scmp.ne.s32.totalorder %s6458_s3, %s6159_s17  ;;  %p6163_p5 = scmp.lt.u32.totalorder %s6159_s17, %s6458_s3 }
  0xff   :  { %p6165_p6 = pnand %p6163_p5, %p6160_p4 }
 0x101   :  { %6168 = shalt.err (!%p6165_p6)
}
 0x102   :  { %s6169_s11 = scalar_lea.vmem %s139_s30, 16  ;;  %s6173_s0 = scalar_lea.vmem %s139_s30, 32 }
 0x103   :  { %p6170_p7 = scmp.ne.s32.totalorder %s139_s30, %s6169_s11  ;;  %p6174_p8 = scmp.lt.s32.totalorder %s139_s30, %s139_s30 }
 0x104   :  { %p6175_p9 = scmp.lt.s32.totalorder %s6173_s0, %s6169_s11 }
 0x106   :  { %p6176_p10 = por %p6175_p9, %p6174_p8 }
 0x108   :  { %p6177_p11 = pnand %p6176_p10, %p6170_p7 }
 0x10a   :  { %6180 = shalt.err (!%p6177_p11)
}
 0x10b   :  { %141 = dma.hbm_to_vmem [thread:$0]  %s6458_s3, 16, %s139_s30, [#allocation10]  }
 0x10c   :  { %s6402_s13 = smov [#allocation14]   ;;  %s6403_s27 = smov [#allocation17]  }
 0x10d   :  { %s160_s25 = sshll.u32 %s6402_s13, 4  ;;  %s179_s8 = sshll.u32 %s6403_s27, 4  ;;  %s161_s25 = int_to_ptr.vmem [resolvable:$true] %s160_s25  ;;  %s6660_s8 = int_to_ptr.vmem [resolvable:$true] %s179_s8 }
 0x10e   :  { %s6181_s12 = scalar_lea.hbm %s6468_s14, 16 }
 0x10f   :  { %p6182_p12 = scmp.ne.s32.totalorder %s6468_s14, %s6181_s12  ;;  %p6185_p13 = scmp.lt.u32.totalorder %s6181_s12, %s6468_s14 }
 0x111   :  { %p6187_p0 = pnand %p6185_p13, %p6182_p12 }
 0x113   :  { %6190 = shalt.err (!%p6187_p0)
}
 0x114   :  { %s6191_s15 = scalar_lea.vmem %s161_s25, 16  ;;  %s6195_s16 = scalar_lea.vmem %s161_s25, 32 }
 0x115   :  { %p6192_p1 = scmp.ne.s32.totalorder %s161_s25, %s6191_s15  ;;  %p6196_p2 = scmp.lt.s32.totalorder %s161_s25, %s161_s25 }
 0x116   :  { %p6197_p3 = scmp.lt.s32.totalorder %s6195_s16, %s6191_s15 }
 0x118   :  { %p6198_p4 = por %p6197_p3, %p6196_p2 }
 0x11a   :  { %p6199_p5 = pnand %p6198_p4, %p6192_p1 }
 0x11c   :  { %6202 = shalt.err (!%p6199_p5)
}
 0x11d   :  { %163 = dma.hbm_to_vmem [thread:$0]  %s6468_s14, 16, %s161_s25, [#allocation13]  }
 0x11e   :  { %s6203_s3 = scalar_lea.hbm %s6478_s24, 3072 }
 0x11f   :  { %p6204_p6 = scmp.ne.s32.totalorder %s6478_s24, %s6203_s3  ;;  %p6207_p7 = scmp.lt.u32.totalorder %s6203_s3, %s6478_s24 }
 0x121   :  { %p6209_p8 = pnand %p6207_p7, %p6204_p6 }
 0x123   :  { %6212 = shalt.err (!%p6209_p8)
}
 0x124   :  { %s6213_s18 = scalar_lea.vmem %s6660_s8, 3072  ;;  %p6218_p10 = scmp.lt.s32.totalorder %s6660_s8, %s6660_s8 }
 0x125   :  { %p6214_p9 = scmp.ne.s32.totalorder %s6660_s8, %s6213_s18  ;;  %p6219_p11 = scmp.lt.s32.totalorder %s6213_s18, %s6213_s18 }
 0x127   :  { %p6220_p12 = por %p6219_p11, %p6218_p10 }
 0x129   :  { %p6221_p13 = pnand %p6220_p12, %p6214_p9 }
 0x12b   :  { %6224 = shalt.err (!%p6221_p13)
}
 0x12c   :  { %s7475_s14 = sld [smem:[#allocation46_spill]]  ;;  %s6404_s22 = smov [#allocation20]  }
 0x12d   :  { %185 = dma.hbm_to_vmem [thread:$0]  %s6478_s24, 3072, %s6660_s8, [#allocation16], %s6392_s29, %s6392_s29, %s6393_s10  }
 0x12e   :  { %s202_s23 = sshll.u32 %s6404_s22, 4  ;;  %s6405_s26 = smov [#allocation23]   ;;  %s203_s23 = int_to_ptr.vmem [resolvable:$true] %s202_s23 }
 0x12f   :  { %s226_s20 = sshll.u32 %s6405_s26, 4  ;;  %s227_s20 = int_to_ptr.vmem [resolvable:$true] %s226_s20 }
 0x132   :  { %s6225_s19 = scalar_lea.hbm %s7475_s14, 16 }
 0x133   :  { %p6226_p0 = scmp.ne.s32.totalorder %s7475_s14, %s6225_s19  ;;  %p6229_p1 = scmp.lt.u32.totalorder %s6225_s19, %s7475_s14 }
 0x135   :  { %p6231_p2 = pnand %p6229_p1, %p6226_p0 }
 0x137   :  { %6234 = shalt.err (!%p6231_p2)
}
 0x138   :  { %s6235_s21 = scalar_lea.vmem %s203_s23, 16  ;;  %s6239_s1 = scalar_lea.vmem %s203_s23, 32 }
 0x139   :  { %p6236_p3 = scmp.ne.s32.totalorder %s203_s23, %s6235_s21  ;;  %p6240_p4 = scmp.lt.s32.totalorder %s203_s23, %s203_s23 }
 0x13a   :  { %p6241_p5 = scmp.lt.s32.totalorder %s6239_s1, %s6235_s21 }
 0x13c   :  { %p6242_p6 = por %p6241_p5, %p6240_p4 }
 0x13e   :  { %p6243_p7 = pnand %p6242_p6, %p6236_p3 }
 0x140   :  { %6246 = shalt.err (!%p6243_p7)
}
 0x141   :  { %s7476_s24 = sld [smem:[#allocation49_spill]] }
 0x142   :  { %205 = dma.hbm_to_vmem [thread:$0]  %s7475_s14, 16, %s203_s23, [#allocation19]  }
 0x147   :  { %s6247_s10 = scalar_lea.hbm %s7476_s24, 16 }
 0x148   :  { %p6248_p8 = scmp.ne.s32.totalorder %s7476_s24, %s6247_s10  ;;  %p6251_p9 = scmp.lt.u32.totalorder %s6247_s10, %s7476_s24 }
 0x14a   :  { %p6253_p10 = pnand %p6251_p9, %p6248_p8 }
 0x14c   :  { %6256 = shalt.err (!%p6253_p10)
}
 0x14d   :  { %s6257_s4 = scalar_lea.vmem %s227_s20, 16  ;;  %s6261_s28 = scalar_lea.vmem %s227_s20, 32 }
 0x14e   :  { %p6258_p11 = scmp.ne.s32.totalorder %s227_s20, %s6257_s4  ;;  %p6262_p12 = scmp.lt.s32.totalorder %s227_s20, %s227_s20 }
 0x14f   :  { %p6263_p13 = scmp.lt.s32.totalorder %s6261_s28, %s6257_s4 }
 0x151   :  { %p6264_p0 = por %p6263_p13, %p6262_p12 }
 0x153   :  { %p6265_p1 = pnand %p6264_p0, %p6258_p11 }
 0x155   :  { %6268 = shalt.err (!%p6265_p1)
}
 0x156   :  { %s7477_s30 = sld [smem:[#allocation52_spill]]  ;;  %s6406_s2 = smov [#allocation26]  }
 0x157   :  { %229 = dma.hbm_to_vmem [thread:$0]  %s7476_s24, 16, %s227_s20, [#allocation22]  }
 0x158   :  { %s250_s7 = sshll.u32 %s6406_s2, 4  ;;  %s6407_s17 = smov [#allocation29]   ;;  %s251_s7 = int_to_ptr.vmem [resolvable:$true] %s250_s7 }
 0x159   :  { %s278_s11 = sshll.u32 %s6407_s17, 4  ;;  %s279_s11 = int_to_ptr.vmem [resolvable:$true] %s278_s11 }
 0x15c   :  { %s6269_s0 = scalar_lea.hbm %s7477_s30, 16 }
 0x15d   :  { %p6270_p2 = scmp.ne.s32.totalorder %s7477_s30, %s6269_s0  ;;  %p6273_p3 = scmp.lt.u32.totalorder %s6269_s0, %s7477_s30 }
 0x15f   :  { %p6275_p4 = pnand %p6273_p3, %p6270_p2 }
 0x161   :  { %6278 = shalt.err (!%p6275_p4)
}
 0x162   :  { %s6279_s13 = scalar_lea.vmem %s251_s7, 16  ;;  %s6283_s25 = scalar_lea.vmem %s251_s7, 32 }
 0x163   :  { %p6280_p5 = scmp.ne.s32.totalorder %s251_s7, %s6279_s13  ;;  %p6284_p6 = scmp.lt.s32.totalorder %s251_s7, %s251_s7 }
 0x164   :  { %p6285_p7 = scmp.lt.s32.totalorder %s6283_s25, %s6279_s13 }
 0x166   :  { %p6286_p8 = por %p6285_p7, %p6284_p6 }
 0x168   :  { %p6287_p9 = pnand %p6286_p8, %p6280_p5 }
 0x16a   :  { %6290 = shalt.err (!%p6287_p9)
}
 0x16b   :  { %s7478_s27 = sld [smem:[#allocation56_spill]] }
 0x16c   :  { %253 = dma.hbm_to_vmem [thread:$0]  %s7477_s30, 16, %s251_s7, [#allocation25]  }
 0x171   :  { %s6291_s8 = scalar_lea.hbm %s7478_s27, 16 }
 0x172   :  { %p6292_p10 = scmp.ne.s32.totalorder %s7478_s27, %s6291_s8  ;;  %p6295_p11 = scmp.lt.u32.totalorder %s6291_s8, %s7478_s27 }
 0x174   :  { %p6297_p12 = pnand %p6295_p11, %p6292_p10 }
 0x176   :  { %6300 = shalt.err (!%p6297_p12)
}
 0x177   :  { %s6301_s12 = scalar_lea.vmem %s279_s11, 16  ;;  %s6305_s15 = scalar_lea.vmem %s279_s11, 32 }
 0x178   :  { %p6302_p13 = scmp.ne.s32.totalorder %s279_s11, %s6301_s12  ;;  %p6306_p0 = scmp.lt.s32.totalorder %s279_s11, %s279_s11 }
 0x179   :  { %p6307_p1 = scmp.lt.s32.totalorder %s6305_s15, %s6301_s12 }
 0x17b   :  { %p6308_p2 = por %p6307_p1, %p6306_p0 }
 0x17d   :  { %p6309_p3 = pnand %p6308_p2, %p6302_p13 }
 0x17f   :  { %6312 = shalt.err (!%p6309_p3)
}
 0x180   :  { %s7479_s16 = sld [smem:[#allocation58_spill]]  ;;  %s6408_s3 = smov [#allocation32]  }
 0x181   :  { %281 = dma.hbm_to_vmem [thread:$0]  %s7478_s27, 16, %s279_s11, [#allocation28]  }
 0x182   :  { %s300_s18 = sshll.u32 %s6408_s3, 4  ;;  %s301_s18 = int_to_ptr.vmem [resolvable:$true] %s300_s18 }
 0x186   :  { %s6313_s14 = scalar_lea.hbm %s7479_s16, 16 }
 0x187   :  { %p6314_p4 = scmp.ne.s32.totalorder %s7479_s16, %s6313_s14  ;;  %p6317_p5 = scmp.lt.u32.totalorder %s6313_s14, %s7479_s16 }
 0x189   :  { %p6319_p6 = pnand %p6317_p5, %p6314_p4 }
 0x18b   :  { %6322 = shalt.err (!%p6319_p6)
}
 0x18c   :  { %s6323_s22 = scalar_lea.vmem %s301_s18, 16  ;;  %s6327_s23 = scalar_lea.vmem %s301_s18, 32 }
 0x18d   :  { %p6324_p7 = scmp.ne.s32.totalorder %s301_s18, %s6323_s22  ;;  %p6328_p8 = scmp.lt.s32.totalorder %s301_s18, %s301_s18 }
 0x18e   :  { %p6329_p9 = scmp.lt.s32.totalorder %s6327_s23, %s6323_s22 }
 0x190   :  { %p6330_p10 = por %p6329_p9, %p6328_p8 }
 0x192   :  { %p6331_p11 = pnand %p6330_p10, %p6324_p7 }
 0x194   :  { %6334 = shalt.err (!%p6331_p11)
}
 0x195   :  { %303 = dma.hbm_to_vmem [thread:$0]  %s7479_s16, 16, %s301_s18, [#allocation31]  }
 0x196   :  { %6335 = dma.done.wait [#allocation5], 16  }
 0x197   :  { %6336 = vsyncadd [#allocation5], 4294967280 }
 0x198   :  { %6337 = dma.done.wait [#allocation7], 3088  }
 0x199   :  { %6338 = vsyncadd [#allocation7], 4294964208 }
 0x19a   :  { %6339 = dma.done.wait [#allocation10], 32  }
 0x19b   :  { %6340 = vsyncadd [#allocation10], 4294967264 }
 0x19c   :  { %6341 = dma.done.wait [#allocation13], 3088  }
 0x19d   :  { %6342 = vsyncadd [#allocation13], 4294964208 }
 0x19e   :  { %6343 = dma.done.wait [#allocation16], 3088  }
 0x19f   :  { %6344 = vsyncadd [#allocation16], 4294964208 }
 0x1a0   :  { %6345 = dma.done.wait [#allocation19], 32  }
 0x1a1   :  { %6346 = vsyncadd [#allocation19], 4294967264 }
 0x1a2   :  { %6347 = dma.done.wait [#allocation22], 32  }
 0x1a3   :  { %6348 = vsyncadd [#allocation22], 4294967264 }
 0x1a4   :  { %6349 = dma.done.wait [#allocation25], 32  }
 0x1a5   :  { %6350 = vsyncadd [#allocation25], 4294967264 }
 0x1a6   :  { %6351 = dma.done.wait [#allocation28], 208  }
 0x1a7   :  { %6352 = vsyncadd [#allocation28], 4294967088 }
 0x1a8   :  { %6353 = dma.done.wait [#allocation31], 32  }
 0x1a9   :  { %6354 = vsyncadd [#allocation31], 4294967264  ;;  %s7480_s26 = sld [smem:[#allocation45_spill]]  ;;  %v6409_v1 = vmov 0.0   ;;  %s7481_s20 = sld [smem:[#allocation43_spill]]  ;;  %vm6410_vm0 = vmmov 0  }
 0x1aa   :  { %5153 = vmatprep.subr.bf16.mxu0 %v6409_v1  ;;  %368 = vst [vmem:[#allocation2] sm:$0xff] %v6409_v1  ;;  %369 = vst [vmem:[#allocation2 + $0x8] sm:$0xff] %v6409_v1  ;;  %5169 = vmatprep.mubr.msk.bf16.mxu0 %vm6410_vm0, %v6409_v1  ;;  %vm382_vm1 = vcmask 64512   ;;  %v5698_v59 = vld [vmem:[#allocation8 + $0x40] sm:$0xff]   ;;  %v5699_v60 = vld [vmem:[#allocation8 + $0x48] sm:$0xff]   ;;  %vm1941_vm11 = vcmask 1041409  }
 0x1ab   :  { %370 = vst [vmem:[#allocation2 + $0x10] sm:$0xff] %v6409_v1  ;;  %371 = vst [vmem:[#allocation2 + $0x18] sm:$0x3] %v6409_v1  ;;  %5237 = vmatprep.subr.bf16.mxu1 %v6409_v1  ;;  %5253 = vmatprep.mubr.msk.bf16.mxu1 %vm6410_vm0, %v6409_v1  ;;  %v5700_v61 = vld [vmem:[#allocation8 + $0x50] sm:$0xff]   ;;  %v5701_v62 = vld [vmem:[#allocation8 + $0x58] sm:$0xff]   ;;  %vm1943_vm12 = vcmask 1042434  }
 0x1ac   :  { %372 = vst [vmem:[#allocation2 + $0x20] sm:$0xff] %v6409_v1  ;;  %373 = vst [vmem:[#allocation2 + $0x28] sm:$0xff] %v6409_v1  ;;  %5238 = vmatpush3.bf16.msra.mxu1 %v5698_v59  ;;  %v5702_v63 = vld [vmem:[#allocation8 + $0x60] sm:$0xff]   ;;  %v5703_v0 = vld [vmem:[#allocation8 + $0x68] sm:$0xff]   ;;  %vm1945_vm13 = vcmask 1043459   ;;  %vm1947_vm14 = vcmask 1044484  }
 0x1ad   :  { %374 = vst [vmem:[#allocation2 + $0x30] sm:$0xff] %v6409_v1  ;;  %375 = vst [vmem:[#allocation2 + $0x38] sm:$0x3] %v6409_v1  ;;  %5239 = vmatprep.subr.bf16.mxu1 %v6409_v1  ;;  %vm1949_vm15 = vcmask 1045509   ;;  %s7482_s19 = sld [smem:[#allocation47_spill]]  ;;  %s7483_s21 = sld [smem:[#allocation48_spill]] }
 0x1ae   :  { %s6413_s1 = smov 32   ;;  %s6414_s24 = smov 96  }
 0x1af   :  { %v5674_v2 = vld [vmem:[%s7480_s26 + $0x40] sm:$0xff]   ;;  %v5675_v3 = vld [vmem:[%s7480_s26 + $0x48] sm:$0xff]   ;;  %v5676_v4 = vld [vmem:[%s7480_s26 + $0x50] sm:$0xff]   ;;  %s7484_s10 = sld [smem:[#allocation50_spill]]  ;;  %s7485_s4 = sld [smem:[#allocation51_spill]] }
 0x1b0   :  { %5154 = vmatpush3.bf16.msra.mxu0 %v5674_v2  ;;  %v376_v5 = vld [vmem:[%s7481_s20] sm:$0xff]  ;;  %v377_v6 = vld [vmem:[%s7481_s20 + $0x8] sm:$0xff]  ;;  %v5677_v7 = vld [vmem:[%s7480_s26 + $0x58] sm:$0xff]   ;;  %5240 = vmatpush3.bf16.msra.mxu1 %v5699_v60  ;;  %s7486_s28 = sld [smem:[#allocation44_spill]]  ;;  %s7487_s30 = sld [smem:[#allocation53_spill]] }
 0x1b1   :  { %5155 = vmatprep.subr.bf16.mxu0 %v6409_v1  ;;  %383 = vst.msk [vmem:[#allocation2 + $0x1] sm:$0xff] %vm382_vm1, %v376_v5  ;;  %384 = vst.msk [vmem:[#allocation2 + $0x9] sm:$0xff] %vm382_vm1, %v377_v6  ;;  %v378_v8 = vld [vmem:[%s7481_s20 + $0x10] sm:$0xff]  ;;  %v379_v9 = vld [vmem:[%s7481_s20 + $0x18] sm:$0xff]  ;;  %5241 = vmatprep.subr.bf16.mxu1 %v6409_v1  ;;  %s7489_s2 = sld [smem:[#allocation55_spill]]  ;;  %s7490_s7 = sld [smem:[#allocation57_spill]] }
 0x1b2   :  { %385 = vst.msk [vmem:[#allocation2 + $0x11] sm:$0xff] %vm382_vm1, %v378_v8  ;;  %v5678_v10 = vld [vmem:[%s7480_s26 + $0x60] sm:$0xff]   ;;  %386 = vst.msk [vmem:[#allocation2 + $0x21] sm:$0xff] %vm382_vm1, %v379_v9  ;;  %v381_v12 = vld [vmem:[%s7481_s20 + $0x28] sm:$0xff] }
 0x1b3   :  { %v380_v11 = vld [vmem:[%s7481_s20 + $0x20] sm:$0xff]  ;;  %388 = vst.msk [vmem:[#allocation2 + $0x31] sm:$0xff] %vm382_vm1, %v381_v12  ;;  %v5679_v13 = vld [vmem:[%s7480_s26 + $0x68] sm:$0xff]   ;;  %v5680_v14 = vld [vmem:[%s7480_s26 + $0x70] sm:$0xff]  }
 0x1b4   :  { %5156 = vmatpush3.bf16.msra.mxu0 %v5675_v3  ;;  %387 = vst.msk [vmem:[#allocation2 + $0x29] sm:$0xff] %vm382_vm1, %v380_v11  ;;  %v5681_v15 = vld [vmem:[%s7480_s26 + $0x78] sm:$0xff]   ;;  %v5682_v19 = vld [vmem:[%s7480_s26] sm:$0xff]   ;;  %v5683_v22 = vld [vmem:[%s7480_s26 + $0x8] sm:$0xff]   ;;  %5242 = vmatpush3.bf16.msra.mxu1 %v5700_v61 }
 0x1b5   :  { %5157 = vmatprep.subr.bf16.mxu0 %v6409_v1  ;;  %v5684_v25 = vld [vmem:[%s7480_s26 + $0x10] sm:$0xff]   ;;  %v5685_v27 = vld [vmem:[%s7480_s26 + $0x18] sm:$0xff]   ;;  %v5686_v30 = vld [vmem:[%s7480_s26 + $0x20] sm:$0xff]   ;;  %5243 = vmatprep.subr.bf16.mxu1 %v6409_v1 }
 0x1b6   :  { %v5687_v32 = vld [vmem:[%s7480_s26 + $0x28] sm:$0xff]   ;;  %v5688_v33 = vld [vmem:[%s7480_s26 + $0x30] sm:$0xff]   ;;  %v5689_v34 = vld [vmem:[%s7480_s26 + $0x38] sm:$0xff]  }
 0x1b7   :  { %v5690_v37 = vld [vmem:[%s7480_s26 + $0x80] sm:$0xff]   ;;  %v5691_v39 = vld [vmem:[%s7480_s26 + $0x88] sm:$0xff]   ;;  %v5692_v42 = vld [vmem:[%s7480_s26 + $0x90] sm:$0xff]  }
 0x1b8   :  { %5158 = vmatpush3.bf16.msra.mxu0 %v5676_v4  ;;  %v414_v16 = vld [vmem:[#allocation2 + $0x1] sm:$0xff]  ;;  %v415_v17 = vld [vmem:[#allocation2 + $0x9] sm:$0xff]  ;;  %v5693_v44 = vld [vmem:[%s7480_s26 + $0x98] sm:$0xff]   ;;  %5244 = vmatpush3.bf16.msra.mxu1 %v5701_v62 }
 0x1b9   :  { %5159 = vmatprep.subr.bf16.mxu0 %v6409_v1  ;;  %v420_v18 = vpack.c.bf16 %v415_v17, %v414_v16  ;;  %v6740_v20 = vld [vmem:[#allocation2 + $0x12] sm:$0xff]  ;;  %v417_v24 = vld [vmem:[#allocation2 + $0x21] sm:$0xff]  ;;  %v651_v53 = vld [vmem:[#allocation2 + $0xa] sm:$0xff]  ;;  %5245 = vmatprep.subr.bf16.mxu1 %v6409_v1 }
 0x1ba   :  { %981 = vst [vmem:[#allocation2 + $0x19] sm:$0x1] %v6409_v1  ;;  %v6744_v21 = vld [vmem:[#allocation2 + $0x32] sm:$0xff]  ;;  %v389_v35 = vld [vmem:[#allocation2] sm:$0xff]  ;;  %v390_v36 = vld [vmem:[#allocation2 + $0x8] sm:$0xff] }
 0x1bb   :  { %v416_v23 = vld [vmem:[#allocation2 + $0x11] sm:$0xff]  ;;  %982 = vst [vmem:[#allocation2 + $0x39] sm:$0x1] %v6409_v1  ;;  %v418_v28 = vld [vmem:[#allocation2 + $0x29] sm:$0xff]  ;;  %v395_v38 = vpack.c.bf16 %v390_v36, %v389_v35  ;;  %v392_v41 = vld [vmem:[#allocation2 + $0x20] sm:$0xff] }
 0x1bc   :  { %5160 = vmatpush3.bf16.msra.mxu0 %v5677_v7  ;;  %v421_v26 = vpack.c.bf16 %v417_v24, %v416_v23  ;;  %v419_v29 = vld [vmem:[#allocation2 + $0x31] sm:$0xff]  ;;  %v393_v45 = vld [vmem:[#allocation2 + $0x28] sm:$0xff]  ;;  %v5694_v47 = vld [vmem:[%s7480_s26 + $0xa0] sm:$0xff]   ;;  %5246 = vmatpush3.bf16.msra.mxu1 %v5702_v63 }
 0x1bd   :  { %5161 = vmatprep.subr.bf16.mxu0 %v6409_v1  ;;  %v422_v31 = vpack.c.bf16 %v419_v29, %v418_v28  ;;  %v391_v40 = vld [vmem:[#allocation2 + $0x10] sm:$0xff]  ;;  %v5695_v49 = vld [vmem:[%s7480_s26 + $0xa8] sm:$0xff]   ;;  %v5697_v51 = vld [vmem:[%s7480_s26 + $0xb8] sm:$0xff]   ;;  %5247 = vmatprep.subr.bf16.mxu1 %v6409_v1 }
 0x1be   :  { %v396_v43 = vpack.c.bf16 %v392_v41, %v391_v40  ;;  %v394_v46 = vld [vmem:[#allocation2 + $0x30] sm:$0xff]  ;;  %v650_v52 = vld [vmem:[#allocation2 + $0x2] sm:$0xff]  ;;  %v4818_v4 = vld [vmem:[#allocation4] ss:$0 sm:$0xff] }
 0x1bf   :  { %v397_v48 = vpack.c.bf16 %v394_v46, %v393_v45  ;;  %v5696_v50 = vld [vmem:[%s7480_s26 + $0xb0] sm:$0xff]   ;;  %v656_v54 = vpack.c.bf16 %v651_v53, %v650_v52  ;;  %v653_v55 = vld [vmem:[#allocation2 + $0x22] sm:$0xff] }
 0x1c0   :  { %5162 = vmatpush3.bf16.msra.mxu0 %v5678_v10  ;;  %v657_v56 = vpack.c.bf16 %v653_v55, %v6740_v20  ;;  %v654_v57 = vld [vmem:[#allocation2 + $0x2a] sm:$0xff]  ;;  %5248 = vmatpush3.bf16.msra.mxu1 %v5703_v0  ;;  %v5704_v2 = vld [vmem:[#allocation8 + $0x70] sm:$0xff]   ;;  %v5705_v3 = vld [vmem:[#allocation8 + $0x78] sm:$0xff]  }
 0x1c1   :  { %5163 = vmatprep.subr.bf16.mxu0 %v6409_v1  ;;  %v658_v58 = vpack.c.bf16 %v6744_v21, %v654_v57  ;;  %5249 = vmatprep.subr.bf16.mxu1 %v6409_v1  ;;  %v4819_v6 = vld [vmem:[#allocation6] ss:$0 sm:$0xff] }
 0x1c4   :  { %5164 = vmatpush3.bf16.msra.mxu0 %v5679_v13  ;;  %5250 = vmatpush3.bf16.msra.mxu1 %v5704_v2 }
 0x1c5   :  { %5165 = vmatprep.subr.bf16.mxu0 %v6409_v1  ;;  %5251 = vmatprep.subr.bf16.mxu1 %v6409_v1 }
 0x1c8   :  { %5166 = vmatpush3.bf16.msra.mxu0 %v5680_v14  ;;  %5252 = vmatpush3.bf16.msra.mxu1 %v5705_v3 }
 0x1c9   :  { %5167 = vmatprep.subr.bf16.mxu0 %v6409_v1  ;;  %5265 = vmatprep.subr.bf16.mxu1 %v6409_v1 }
 0x1cc   :  { %5168 = vmatpush3.bf16.msra.mxu0 %v5681_v15 }
 0x1cd   :  { %5181 = vmatprep.subr.bf16.mxu0 %v6409_v1 }
 0x1cf   :  { %5170 = vmatmul.mubr.bf16.vlgmr.msra.gmra.mrb[0].mxu0 %v420_v18 }
 0x1d0   :  { %5182 = vmatpush3.bf16.msra.mxu0 %v5682_v19  ;;  %5173 = vmatprep.mubr.msk.bf16.mxu0 %vm6410_vm0, %v6409_v1 }
 0x1d1   :  { %5183 = vmatprep.subr.bf16.mxu0 %v6409_v1 }
 0x1d4   :  { %5184 = vmatpush3.bf16.msra.mxu0 %v5683_v22 }
 0x1d5   :  { %5185 = vmatprep.subr.bf16.mxu0 %v6409_v1 }
 0x1d7   :  { %5174 = vmatmul.mubr.bf16.gmra.mrb[4].mxu0 %v421_v26 }
 0x1d8   :  { %5186 = vmatpush3.bf16.msra.mxu0 %v5684_v25  ;;  %5177 = vmatprep.mubr.msk.bf16.mxu0 %vm6410_vm0, %v6409_v1 }
 0x1d9   :  { %5187 = vmatprep.subr.bf16.mxu0 %v6409_v1 }
 0x1dc   :  { %5188 = vmatpush3.bf16.msra.mxu0 %v5685_v27 }
 0x1dd   :  { %5189 = vmatprep.subr.bf16.mxu0 %v6409_v1 }
 0x1df   :  { %5178 = vmatmul.mubr.bf16.gmra.mrb[8].mxu0 %v422_v31 }
 0x1e0   :  { %5190 = vmatpush3.bf16.msra.mxu0 %v5686_v30  ;;  %5197 = vmatprep.mubr.msk.bf16.mxu0 %vm6410_vm0, %v6409_v1 }
 0x1e1   :  { %5191 = vmatprep.subr.bf16.mxu0 %v6409_v1 }
 0x1e4   :  { %5192 = vmatpush3.bf16.msra.mxu0 %v5687_v32 }
 0x1e5   :  { %5193 = vmatprep.subr.bf16.mxu0 %v6409_v1 }
 0x1e8   :  { %5194 = vmatpush3.bf16.msra.mxu0 %v5688_v33 }
 0x1e9   :  { %5195 = vmatprep.subr.bf16.mxu0 %v6409_v1 }
 0x1ec   :  { %5196 = vmatpush3.bf16.msra.mxu0 %v5689_v34 }
 0x1ed   :  { %5209 = vmatprep.subr.bf16.mxu0 %v6409_v1 }
 0x1ef   :  { %5198 = vmatmul.mubr.bf16.vlgmr.msra.gmra.mrb[0].mxu0 %v395_v38 }
 0x1f0   :  { %5210 = vmatpush3.bf16.msra.mxu0 %v5690_v37  ;;  %5201 = vmatprep.mubr.msk.bf16.mxu0 %vm6410_vm0, %v6409_v1 }
 0x1f1   :  { %5211 = vmatprep.subr.bf16.mxu0 %v6409_v1 }
 0x1f4   :  { %5212 = vmatpush3.bf16.msra.mxu0 %v5691_v39 }
 0x1f5   :  { %5213 = vmatprep.subr.bf16.mxu0 %v6409_v1 }
 0x1f7   :  { %5202 = vmatmul.mubr.bf16.gmra.mrb[4].mxu0 %v396_v43 }
 0x1f8   :  { %5214 = vmatpush3.bf16.msra.mxu0 %v5692_v42  ;;  %5205 = vmatprep.mubr.msk.bf16.mxu0 %vm6410_vm0, %v6409_v1 }
 0x1f9   :  { %5215 = vmatprep.subr.bf16.mxu0 %v6409_v1 }
 0x1fc   :  { %5216 = vmatpush3.bf16.msra.mxu0 %v5693_v44 }
 0x1fd   :  { %5217 = vmatprep.subr.bf16.mxu0 %v6409_v1 }
 0x1ff   :  { %5206 = vmatmul.mubr.bf16.gmra.mrb[8].mxu0 %v397_v48 }
 0x200   :  { %5218 = vmatpush3.bf16.msra.mxu0 %v5694_v47  ;;  %5225 = vmatprep.mubr.msk.bf16.mxu0 %vm6410_vm0, %v6409_v1 }
 0x201   :  { %5219 = vmatprep.subr.bf16.mxu0 %v6409_v1 }
 0x204   :  { %5220 = vmatpush3.bf16.msra.mxu0 %v5695_v49 }
 0x205   :  { %5221 = vmatprep.subr.bf16.mxu0 %v6409_v1 }
 0x208   :  { %5222 = vmatpush3.bf16.msra.mxu0 %v5696_v50 }
 0x209   :  { %5223 = vmatprep.subr.bf16.mxu0 %v6409_v1 }
 0x20c   :  { %5224 = vmatpush3.bf16.msra.mxu0 %v5697_v51 }
 0x20f   :  { %5226 = vmatmul.mubr.bf16.vlgmr.msra.gmra.mrb[0].mxu0 %v656_v54 }
 0x210   :  { %5229 = vmatprep.mubr.msk.bf16.mxu0 %vm6410_vm0, %v6409_v1 }
 0x217   :  { %5230 = vmatmul.mubr.bf16.gmra.mrb[4].mxu0 %v657_v56 }
 0x218   :  { %5233 = vmatprep.mubr.msk.bf16.mxu0 %vm6410_vm0, %v6409_v1 }
 0x21f   :  { %5234 = vmatmul.mubr.bf16.gmra.mrb[8].mxu0 %v658_v58 }
 0x2e2   :  { %v758_v5 = vpop.f32.mrb[0].mxu0 }
 0x2e3   :  { %v794_v7 = vmul.f32 %v4818_v4, %v758_v5  ;;  %v5227_v8 = vpop.f32.mrb[1].mxu0 }
 0x2e4   :  { %v761_v9 = vpop.f32.mrb[2].mxu0 }
 0x2e5   :  { %v6803_v10 = vadd.f32 %v4819_v6, %v794_v7  ;;  %v795_v11 = vmul.f32 %v4818_v4, %v761_v9  ;;  %v5228_v12 = vpop.f32.mrb[3].mxu0 }
 0x2e7   :  { %v6806_v13 = vmul.f32 0.70710677, %v6803_v10  ;;  %v6808_v14 = vadd.f32 %v4819_v6, %v795_v11 }
 0x2e9   :  { %v825_v15 = vand.u32 2147483647, %v6806_v13  ;;  %v6812_v16 = vmul.f32 0.70710677, %v6808_v14  ;;  %vm945_vm2 = vcmp.ge.f32.partialorder %v6806_v13, 0.0 }
 0x2ea   :  { %v766_v17 = vpop.f32.mrb[4].mxu0 }
 0x2eb   :  { %v831_v18 = vmul.f32 0.3275911, %v825_v15  ;;  %v826_v19 = vand.u32 2147483647, %v6812_v16  ;;  %v796_v20 = vmul.f32 %v4818_v4, %v766_v17  ;;  %v5231_v21 = vpop.f32.mrb[5].mxu0  ;;  %v909_v38 = vsub.f32 0.0, %v825_v15 }
 0x2ec   :  { %v769_v24 = vpop.f32.mrb[6].mxu0  ;;  %vm946_vm3 = vcmp.ge.f32.partialorder %v6812_v16, 0.0 }
 0x2ed   :  { %v837_v22 = vadd.f32 1.0, %v831_v18  ;;  %v832_v23 = vmul.f32 0.3275911, %v826_v19  ;;  %v6815_v25 = vadd.f32 %v4819_v6, %v796_v20  ;;  %v797_v26 = vmul.f32 %v4818_v4, %v769_v24  ;;  %v5232_v27 = vpop.f32.mrb[7].mxu0 }
 0x2ee   :  { %v910_v46 = vsub.f32 0.0, %v826_v19  ;;  %v915_v49 = vmul.f32 %v909_v38, %v825_v15 }
 0x2ef   :  { %5809 = vrcp.f32 %v837_v22  ;;  %v838_v28 = vadd.f32 1.0, %v832_v23  ;;  %v6818_v29 = vmul.f32 0.70710677, %v6815_v25  ;;  %v6820_v30 = vadd.f32 %v4819_v6, %v797_v26 }
 0x2f0   :  { %v916_v57 = vmul.f32 %v910_v46, %v826_v19  ;;  %v921_v59 = vmul.f32 1.442695, %v915_v49 }
 0x2f1   :  { %5811 = vrcp.f32 %v838_v28  ;;  %v827_v31 = vand.u32 2147483647, %v6818_v29  ;;  %v6824_v33 = vmul.f32 0.70710677, %v6820_v30  ;;  %vm947_vm4 = vcmp.ge.f32.partialorder %v6818_v29, 0.0 }
 0x2f2   :  { %v774_v32 = vpop.f32.mrb[8].mxu0 }
 0x2f3   :  { %v798_v34 = vmul.f32 %v4818_v4, %v774_v32  ;;  %v5235_v35 = vpop.f32.mrb[9].mxu0  ;;  %v833_v36 = vmul.f32 0.3275911, %v827_v31  ;;  %v828_v39 = vand.u32 2147483647, %v6824_v33  ;;  %v911_v63 = vsub.f32 0.0, %v827_v31 }
 0x2f4   :  { %v777_v37 = vpop.f32.mrb[10].mxu0  ;;  %vm948_vm5 = vcmp.ge.f32.partialorder %v6824_v33, 0.0 }
 0x2f5   :  { %v6827_v40 = vadd.f32 %v4819_v6, %v798_v34  ;;  %v799_v41 = vmul.f32 %v4818_v4, %v777_v37  ;;  %v5236_v42 = vpop.f32.mrb[11].mxu0  ;;  %v839_v43 = vadd.f32 1.0, %v833_v36  ;;  %v834_v44 = vmul.f32 0.3275911, %v828_v39 }
 0x2f6   :  { %v923_v4 = vmul.f32 1.442695, %v916_v57  ;;  %v912_v5 = vsub.f32 0.0, %v828_v39  ;;  %v917_v11 = vmul.f32 %v911_v63, %v827_v31 }
 0x2f7   :  { %v6830_v45 = vmul.f32 0.70710677, %v6827_v40  ;;  %5813 = vrcp.f32 %v839_v43  ;;  %v6832_v47 = vadd.f32 %v4819_v6, %v799_v41  ;;  %v840_v50 = vadd.f32 1.0, %v834_v44 }
 0x2f8   :  { %v918_v18 = vmul.f32 %v912_v5, %v828_v39  ;;  %v925_v24 = vmul.f32 1.442695, %v917_v11 }
 0x2f9   :  { %v5810_v48 = vpop.eup %5809  ;;  %v829_v51 = vand.u32 2147483647, %v6830_v45  ;;  %v6836_v53 = vmul.f32 0.70710677, %v6832_v47  ;;  %5815 = vrcp.f32 %v840_v50  ;;  %vm949_vm6 = vcmp.ge.f32.partialorder %v6830_v45, 0.0 }
 0x2fa   :  { %v855_v52 = vmul.f32 1.0614054, %v5810_v48  ;;  %v927_v35 = vmul.f32 1.442695, %v918_v18 }
 0x2fb   :  { %v835_v54 = vmul.f32 0.3275911, %v829_v51  ;;  %v5812_v55 = vpop.eup %5811  ;;  %v830_v58 = vand.u32 2147483647, %v6836_v53  ;;  %v913_v22 = vsub.f32 0.0, %v829_v51  ;;  %vm950_vm7 = vcmp.ge.f32.partialorder %v6836_v53, 0.0 }
 0x2fc   :  { %v861_v56 = vadd.f32 -1.4531521, %v855_v52  ;;  %v856_v60 = vmul.f32 1.0614054, %v5812_v55 }
 0x2fd   :  { %v841_v61 = vadd.f32 1.0, %v835_v54  ;;  %v836_v0 = vmul.f32 0.3275911, %v830_v58  ;;  %v914_v31 = vsub.f32 0.0, %v830_v58  ;;  %v919_v39 = vmul.f32 %v913_v22, %v829_v51 }
 0x2fe   :  { %v867_v62 = vmul.f32 %v5810_v48, %v861_v56  ;;  %v862_v2 = vadd.f32 -1.4531521, %v856_v60 }
 0x2ff   :  { %5817 = vrcp.f32 %v841_v61  ;;  %v842_v6 = vadd.f32 1.0, %v836_v0  ;;  %v920_v50 = vmul.f32 %v914_v31, %v830_v58  ;;  %v929_v51 = vmul.f32 1.442695, %v919_v39 }
 0x300   :  { %v873_v3 = vadd.f32 1.4214138, %v867_v62  ;;  %5819 = vpow2.f32 %v921_v59  ;;  %v868_v7 = vmul.f32 %v5812_v55, %v862_v2 }
 0x301   :  { %v6839_v8 = vpop.eup %5813  ;;  %5821 = vrcp.f32 %v842_v6 }
 0x302   :  { %v879_v9 = vmul.f32 %v5810_v48, %v873_v3  ;;  %v874_v12 = vadd.f32 1.4214138, %v868_v7  ;;  %v857_v15 = vmul.f32 1.0614054, %v6839_v8  ;;  %5823 = vpow2.f32 %v923_v4 }
 0x303   :  { %v6842_v19 = vpop.eup %5815  ;;  %5825 = vpow2.f32 %v925_v24  ;;  %v931_v4 = vmul.f32 1.442695, %v920_v50 }
 0x304   :  { %v885_v17 = vadd.f32 -0.28449672, %v879_v9  ;;  %v880_v20 = vmul.f32 %v5812_v55, %v874_v12  ;;  %v863_v21 = vadd.f32 -1.4531521, %v857_v15  ;;  %v858_v26 = vmul.f32 1.0614054, %v6842_v19 }
 0x305   :  { %5827 = vpow2.f32 %v927_v35  ;;  %v813_v12 = vmul.f32 0.5, %v6803_v10 }
 0x306   :  { %v891_v23 = vmul.f32 %v5810_v48, %v885_v17  ;;  %v886_v27 = vadd.f32 -0.28449672, %v880_v20  ;;  %v869_v28 = vmul.f32 %v6839_v8, %v863_v21  ;;  %v864_v34 = vadd.f32 -1.4531521, %v858_v26 }
 0x307   :  { %5829 = vpow2.f32 %v929_v51 }
 0x308   :  { %v897_v32 = vadd.f32 0.2548296, %v891_v23  ;;  %v892_v37 = vmul.f32 %v5812_v55, %v886_v27  ;;  %v875_v38 = vadd.f32 1.4214138, %v869_v28  ;;  %v870_v42 = vmul.f32 %v6842_v19, %v864_v34 }
 0x309   :  { %v6846_v36 = vpop.eup %5817  ;;  %5831 = vpow2.f32 %v931_v4  ;;  %v814_v34 = vmul.f32 0.5, %v6808_v14  ;;  %v5708_v4 = vld [vmem:[#allocation8 + $0x10] sm:$0xff]  }
 0x30a   :  { %v903_v41 = vmul.f32 %v5810_v48, %v897_v32  ;;  %v859_v43 = vmul.f32 1.0614054, %v6846_v36  ;;  %v5820_v44 = vpop.eup %5819  ;;  %v898_v46 = vadd.f32 0.2548296, %v892_v37  ;;  %v881_v49 = vmul.f32 %v6839_v8, %v875_v38 }
 0x30b   :  { %v6851_v52 = vpop.eup %5821  ;;  %v876_v56 = vadd.f32 1.4214138, %v870_v42 }
 0x30c   :  { %v933_v54 = vmul.f32 %v5820_v44, %v903_v41  ;;  %v865_v57 = vadd.f32 -1.4531521, %v859_v43  ;;  %v904_v59 = vmul.f32 %v5812_v55, %v898_v46  ;;  %v887_v60 = vadd.f32 -0.28449672, %v881_v49  ;;  %v5824_v61 = vpop.eup %5823  ;;  %v5706_v46 = vld [vmem:[#allocation8] sm:$0xff]  }
 0x30d   :  { %v860_v48 = vmul.f32 1.0614054, %v6851_v52  ;;  %v882_v63 = vmul.f32 %v6842_v19, %v876_v56  ;;  %v5826_v23 = vpop.eup %5825 }
 0x30e   :  { %v939_v62 = vsub.f32 1.0, %v933_v54  ;;  %v871_v0 = vmul.f32 %v6846_v36, %v865_v57  ;;  %v934_v2 = vmul.f32 %v5824_v61, %v904_v59  ;;  %v893_v58 = vmul.f32 %v6839_v8, %v887_v60  ;;  %v5707_v61 = vld [vmem:[#allocation8 + $0x8] sm:$0xff]  }
 0x30f   :  { %v866_v3 = vadd.f32 -1.4531521, %v860_v48  ;;  %v888_v6 = vadd.f32 -0.28449672, %v882_v63  ;;  %v5828_v32 = vpop.eup %5827  ;;  %v815_v57 = vmul.f32 0.5, %v6815_v25  ;;  %v816_v25 = vmul.f32 0.5, %v6820_v30 }
 0x310   :  { %v951_v5 = vsub.f32 0.0, %v939_v62  ;;  %v877_v55 = vadd.f32 1.4214138, %v871_v0  ;;  %v940_v7 = vsub.f32 1.0, %v934_v2  ;;  %v899_v9 = vadd.f32 0.2548296, %v893_v58 }
 0x311   :  { %v872_v11 = vmul.f32 %v6851_v52, %v866_v3  ;;  %v894_v17 = vmul.f32 %v6842_v19, %v888_v6 }
 0x312   :  { %v957_v15 = vsel %vm945_vm2, %v939_v62, %v951_v5  ;;  %v883_v18 = vmul.f32 %v6846_v36, %v877_v55  ;;  %v952_v21 = vsub.f32 0.0, %v940_v7  ;;  %v905_v22 = vmul.f32 %v6839_v8, %v899_v9 }
 0x313   :  { %v963_v20 = vadd.f32 1.0, %v957_v15  ;;  %v878_v13 = vadd.f32 1.4214138, %v872_v11  ;;  %v900_v24 = vadd.f32 0.2548296, %v894_v17  ;;  %v817_v5 = vmul.f32 0.5, %v6827_v40 }
 0x314   :  { %v889_v26 = vadd.f32 -0.28449672, %v883_v18  ;;  %v958_v28 = vsel %vm946_vm3, %v940_v7, %v952_v21  ;;  %v935_v31 = vmul.f32 %v5826_v23, %v905_v22  ;;  %v818_v11 = vmul.f32 0.5, %v6832_v47  ;;  %v5710_v18 = vld [vmem:[#allocation8 + $0x20] sm:$0xff]   ;;  %v5711_v47 = vld [vmem:[#allocation8 + $0x28] sm:$0xff]   ;;  %v5712_v22 = vld [vmem:[#allocation8 + $0x30] sm:$0xff]  }
 0x315   :  { %v969_v27 = vmul.f32 %v963_v20, %v813_v12  ;;  %v884_v10 = vmul.f32 %v6851_v52, %v878_v13  ;;  %v964_v35 = vadd.f32 1.0, %v958_v28  ;;  %v906_v37 = vmul.f32 %v6842_v19, %v900_v24  ;;  %v5830_v19 = vpop.eup %5829  ;;  %v5709_v12 = vld [vmem:[#allocation8 + $0x18] sm:$0xff]   ;;  %v5714_v24 = vld [vmem:[#allocation8 + $0x80] sm:$0xff]  }
 0x316   :  { %v895_v8 = vmul.f32 %v6846_v36, %v889_v26  ;;  %v941_v38 = vsub.f32 1.0, %v935_v31  ;;  %v5832_v29 = vpop.eup %5831  ;;  %v5713_v13 = vld [vmem:[#allocation8 + $0x38] sm:$0xff]   ;;  %vm1951_vm2 = vcmask 1046534   ;;  %vm1953_vm3 = vcmask 1047559  }
 0x317   :  { %975 = vst [vmem:[#allocation2 + $0x1] sm:$0xff] %v969_v27  ;;  %v890_v39 = vadd.f32 -0.28449672, %v884_v10  ;;  %v970_v16 = vmul.f32 %v964_v35, %v814_v34  ;;  %v936_v41 = vmul.f32 %v5828_v32, %v906_v37  ;;  %v5716_v10 = vld [vmem:[#allocation8 + $0x90] sm:$0xff]   ;;  %v5717_v34 = vld [vmem:[#allocation8 + $0x98] sm:$0xff]   ;;  %v5718_v37 = vld [vmem:[#allocation8 + $0xa0] sm:$0xff]  }
 0x318   :  { %v901_v42 = vadd.f32 0.2548296, %v895_v8  ;;  %v953_v43 = vsub.f32 0.0, %v941_v38 }
 0x319   :  { %v896_v44 = vmul.f32 %v6851_v52, %v890_v39  ;;  %976 = vst [vmem:[#allocation2 + $0x9] sm:$0xff] %v970_v16  ;;  %v942_v49 = vsub.f32 1.0, %v936_v41  ;;  %v1014_v50 = vpack.c.bf16 %v970_v16, %v969_v27  ;;  %v5715_v27 = vld [vmem:[#allocation8 + $0x88] sm:$0xff]   ;;  %v5720_v39 = vld [vmem:[#allocation8 + $0xb0] sm:$0xff]   ;;  %v5721_v16 = vld [vmem:[#allocation8 + $0xb8] sm:$0xff]  }
 0x31a   :  { %v907_v14 = vmul.f32 %v6846_v36, %v901_v42  ;;  %v959_v54 = vsel %vm947_vm4, %v941_v38, %v953_v43  ;;  %v5719_v38 = vld [vmem:[#allocation8 + $0xa8] sm:$0xff]  }
 0x31b   :  { %v902_v56 = vadd.f32 0.2548296, %v896_v44  ;;  %v965_v59 = vadd.f32 1.0, %v959_v54  ;;  %v954_v60 = vsub.f32 0.0, %v942_v49  ;;  %5254 = vmatmul.mubr.bf16.vlgmr.msra.gmra.mrb[0].mxu1 %v1014_v50  ;;  %v5722_v50 = vld [vmem:[#allocation12 + $0x40] sm:$0xff]   ;;  %v5724_v54 = vld [vmem:[#allocation12 + $0x50] sm:$0xff]  }
 0x31c   :  { %v937_v51 = vmul.f32 %v5830_v19, %v907_v14  ;;  %5266 = vmatpush3.bf16.msra.mxu1 %v5706_v46  ;;  %5257 = vmatprep.mubr.msk.bf16.mxu1 %vm6410_vm0, %v6409_v1  ;;  %v5723_v19 = vld [vmem:[#allocation12 + $0x48] sm:$0xff]  }
 0x31d   :  { %v908_v48 = vmul.f32 %v6851_v52, %v902_v56  ;;  %v971_v36 = vmul.f32 %v965_v59, %v815_v57  ;;  %v960_v62 = vsel %vm948_vm5, %v942_v49, %v954_v60  ;;  %5267 = vmatprep.subr.bf16.mxu1 %v6409_v1  ;;  %5321 = vmatprep.subr.bf16.mxu0 %v5722_v50  ;;  %v5725_v56 = vld [vmem:[#allocation12 + $0x58] sm:$0xff]   ;;  %v5726_v57 = vld [vmem:[#allocation12 + $0x60] sm:$0xff]   ;;  %v5727_v59 = vld [vmem:[#allocation12 + $0x68] sm:$0xff]  }
 0x31e   :  { %v943_v63 = vsub.f32 1.0, %v937_v51  ;;  %v966_v0 = vadd.f32 1.0, %v960_v62  ;;  %v983_v23 = vld [vmem:[#allocation2] sm:$0xff]  ;;  %5322 = vmatpush3.bf16.msra.mxu0 %v5722_v50 }
 0x31f   :  { %v938_v2 = vmul.f32 %v5832_v29, %v908_v48  ;;  %977 = vst [vmem:[#allocation2 + $0x11] sm:$0xff] %v971_v36  ;;  %5323 = vmatprep.subr.bf16.mxu0 %v5723_v19  ;;  %v5728_v60 = vld [vmem:[#allocation12 + $0x70] sm:$0xff]   ;;  %v5729_v51 = vld [vmem:[#allocation12 + $0x78] sm:$0xff]   ;;  %v6918_v48 = vld [vmem:[#allocation12] sm:$0xff]  }
 0x320   :  { %v955_v58 = vsub.f32 0.0, %v943_v63  ;;  %v972_v33 = vmul.f32 %v966_v0, %v816_v25  ;;  %5268 = vmatpush3.bf16.msra.mxu1 %v5707_v61  ;;  %v984_v40 = vld [vmem:[#allocation2 + $0x8] sm:$0xff]  ;;  %v4844_v61 = vld [vmem:[#allocation9] ss:$0 sm:$0xff] }
 0x321   :  { %v944_v52 = vsub.f32 1.0, %v938_v2  ;;  %5269 = vmatprep.subr.bf16.mxu1 %v6409_v1  ;;  %v989_v26 = vpack.c.bf16 %v984_v40, %v983_v23  ;;  %v1244_v41 = vld [vmem:[#allocation2 + $0x2] sm:$0xff] }
 0x322   :  { %v961_v3 = vsel %vm949_vm6, %v943_v63, %v955_v58  ;;  %978 = vst [vmem:[#allocation2 + $0x21] sm:$0xff] %v972_v33  ;;  %v1015_v7 = vpack.c.bf16 %v972_v33, %v971_v36  ;;  %5324 = vmatpush3.bf16.msra.mxu0 %v5723_v19  ;;  %v4845_v36 = vld [vmem:[#allocation11] ss:$0 sm:$0xff] }
 0x323   :  { %v967_v6 = vadd.f32 1.0, %v961_v3  ;;  %v956_v55 = vsub.f32 0.0, %v944_v52  ;;  %5325 = vmatprep.subr.bf16.mxu0 %v5724_v54 }
 0x324   :  { %5258 = vmatmul.mubr.bf16.gmra.mrb[4].mxu1 %v1015_v7 }
 0x325   :  { %v973_v30 = vmul.f32 %v967_v6, %v817_v5  ;;  %v962_v9 = vsel %vm950_vm7, %v944_v52, %v956_v55  ;;  %5270 = vmatpush3.bf16.msra.mxu1 %v5708_v4  ;;  %5261 = vmatprep.mubr.msk.bf16.mxu1 %vm6410_vm0, %v6409_v1 }
 0x326   :  { %v968_v45 = vadd.f32 1.0, %v962_v9  ;;  %5271 = vmatprep.subr.bf16.mxu1 %v6409_v1  ;;  %v6886_v15 = vld [vmem:[#allocation2 + $0xa] sm:$0xff]  ;;  %v1246_v44 = vld [vmem:[#allocation2 + $0x12] sm:$0xff]  ;;  %5326 = vmatpush3.bf16.msra.mxu0 %v5724_v54 }
 0x327   :  { %979 = vst [vmem:[#allocation2 + $0x29] sm:$0xff] %v973_v30  ;;  %1976 = vst [vmem:[#allocation2 + $0xd] sm:$0x1] %v6409_v1  ;;  %v985_v31 = vld [vmem:[#allocation2 + $0x10] sm:$0xff]  ;;  %v1250_v42 = vpack.c.bf16 %v6886_v15, %v1244_v41  ;;  %5327 = vmatprep.subr.bf16.mxu0 %v5725_v56 }
 0x328   :  { %v974_v17 = vmul.f32 %v968_v45, %v818_v11 }
 0x329   :  { %5272 = vmatpush3.bf16.msra.mxu1 %v5709_v12  ;;  %v986_v28 = vld [vmem:[#allocation2 + $0x20] sm:$0xff] }
 0x32a   :  { %980 = vst [vmem:[#allocation2 + $0x31] sm:$0xff] %v974_v17  ;;  %v1016_v53 = vpack.c.bf16 %v974_v17, %v973_v30  ;;  %5273 = vmatprep.subr.bf16.mxu1 %v6409_v1  ;;  %v990_v32 = vpack.c.bf16 %v986_v28, %v985_v31  ;;  %5328 = vmatpush3.bf16.msra.mxu0 %v5725_v56 }
 0x32b   :  { %5329 = vmatprep.subr.bf16.mxu0 %v5726_v57 }
 0x32c   :  { %5262 = vmatmul.mubr.bf16.gmra.mrb[8].mxu1 %v1016_v53 }
 0x32d   :  { %5274 = vmatpush3.bf16.msra.mxu1 %v5710_v18  ;;  %5281 = vmatprep.mubr.msk.bf16.mxu1 %vm6410_vm0, %v6409_v1 }
 0x32e   :  { %5275 = vmatprep.subr.bf16.mxu1 %v6409_v1  ;;  %v987_v20 = vld [vmem:[#allocation2 + $0x28] sm:$0xff]  ;;  %5330 = vmatpush3.bf16.msra.mxu0 %v5726_v57 }
 0x32f   :  { %v1247_v43 = vld [vmem:[#allocation2 + $0x22] sm:$0xff]  ;;  %5331 = vmatprep.subr.bf16.mxu0 %v5727_v59 }
 0x330   :  { %v1251_v46 = vpack.c.bf16 %v1247_v43, %v1246_v44 }
 0x331   :  { %v1248_v21 = vld [vmem:[#allocation2 + $0x2a] sm:$0xff]  ;;  %5276 = vmatpush3.bf16.msra.mxu1 %v5711_v47  ;;  %v1249_v49 = vld [vmem:[#allocation2 + $0x32] sm:$0xff] }
 0x332   :  { %1977 = vst [vmem:[#allocation2 + $0x2d] sm:$0x1] %v6409_v1  ;;  %5277 = vmatprep.subr.bf16.mxu1 %v6409_v1  ;;  %v988_v35 = vld [vmem:[#allocation2 + $0x30] sm:$0xff]  ;;  %v1252_v14 = vpack.c.bf16 %v1249_v49, %v1248_v21  ;;  %5332 = vmatpush3.bf16.msra.mxu0 %v5727_v59 }
 0x333   :  { %v991_v8 = vpack.c.bf16 %v988_v35, %v987_v20  ;;  %5333 = vmatprep.subr.bf16.mxu0 %v5728_v60 }
 0x335   :  { %5278 = vmatpush3.bf16.msra.mxu1 %v5712_v22 }
 0x336   :  { %5279 = vmatprep.subr.bf16.mxu1 %v6409_v1  ;;  %5334 = vmatpush3.bf16.msra.mxu0 %v5728_v60 }
 0x337   :  { %5335 = vmatprep.subr.bf16.mxu0 %v5729_v51 }
 0x339   :  { %5280 = vmatpush3.bf16.msra.mxu1 %v5713_v13 }
 0x33a   :  { %5293 = vmatprep.subr.bf16.mxu1 %v6409_v1  ;;  %5336 = vmatpush3.bf16.msra.mxu0 %v5729_v51  ;;  %v6411_v51 = vmov 1983009808  }
 0x33b   :  { %5341 = vmatprep.subr.bf16.mxu0 %v6918_v48 }
 0x33c   :  { %5282 = vmatmul.mubr.bf16.vlgmr.msra.gmra.mrb[0].mxu1 %v989_v26 }
 0x33d   :  { %5294 = vmatpush3.bf16.msra.mxu1 %v5714_v24  ;;  %5285 = vmatprep.mubr.msk.bf16.mxu1 %vm6410_vm0, %v6409_v1 }
 0x33e   :  { %5295 = vmatprep.subr.bf16.mxu1 %v6409_v1 }
 0x341   :  { %5296 = vmatpush3.bf16.msra.mxu1 %v5715_v27 }
 0x342   :  { %5297 = vmatprep.subr.bf16.mxu1 %v6409_v1 }
 0x344   :  { %5286 = vmatmul.mubr.bf16.gmra.mrb[4].mxu1 %v990_v32 }
 0x345   :  { %5298 = vmatpush3.bf16.msra.mxu1 %v5716_v10  ;;  %5289 = vmatprep.mubr.msk.bf16.mxu1 %vm6410_vm0, %v6409_v1 }
 0x346   :  { %5299 = vmatprep.subr.bf16.mxu1 %v6409_v1 }
 0x349   :  { %5300 = vmatpush3.bf16.msra.mxu1 %v5717_v34 }
 0x34a   :  { %5301 = vmatprep.subr.bf16.mxu1 %v6409_v1 }
 0x34c   :  { %5290 = vmatmul.mubr.bf16.gmra.mrb[8].mxu1 %v991_v8 }
 0x34d   :  { %5302 = vmatpush3.bf16.msra.mxu1 %v5718_v37  ;;  %5309 = vmatprep.mubr.msk.bf16.mxu1 %vm6410_vm0, %v6409_v1 }
 0x34e   :  { %5303 = vmatprep.subr.bf16.mxu1 %v6409_v1 }
 0x351   :  { %5304 = vmatpush3.bf16.msra.mxu1 %v5719_v38 }
 0x352   :  { %5305 = vmatprep.subr.bf16.mxu1 %v6409_v1 }
 0x355   :  { %5306 = vmatpush3.bf16.msra.mxu1 %v5720_v39 }
 0x356   :  { %5307 = vmatprep.subr.bf16.mxu1 %v6409_v1 }
 0x359   :  { %5308 = vmatpush3.bf16.msra.mxu1 %v5721_v16 }
 0x35a   :  { %5381 = vmatprep.subr.bf16.mxu1 %v6409_v1 }
 0x35c   :  { %5310 = vmatmul.mubr.bf16.vlgmr.msra.gmra.mrb[0].mxu1 %v1250_v42 }
 0x35d   :  { %5313 = vmatprep.mubr.msk.bf16.mxu1 %vm6410_vm0, %v6409_v1 }
 0x364   :  { %5314 = vmatmul.mubr.bf16.gmra.mrb[4].mxu1 %v1251_v46 }
 0x365   :  { %5317 = vmatprep.mubr.msk.bf16.mxu1 %vm6410_vm0, %v6409_v1 }
 0x36c   :  { %5318 = vmatmul.mubr.bf16.gmra.mrb[8].mxu1 %v1252_v14 }
 0x36d   :  { %5397 = vmatprep.mubr.msk.bf16.mxu1 %vm6410_vm0, %v6409_v1 }
 0x42f   :  { %v1352_v29 = vpop.f32.mrb[0].mxu1 }
 0x430   :  { %v1388_v62 = vmul.f32 %v4844_v61, %v1352_v29  ;;  %v5311_v63 = vpop.f32.mrb[1].mxu1  ;;  %v1579_v29 = vlaneseq }
 0x431   :  { %v1355_v25 = vpop.f32.mrb[2].mxu1 }
 0x432   :  { %v6921_v0 = vadd.f32 %v4845_v36, %v1388_v62  ;;  %v1389_v2 = vmul.f32 %v4844_v61, %v1355_v25  ;;  %v5312_v58 = vpop.f32.mrb[3].mxu1 }
 0x434   :  { %v6924_v33 = vmul.f32 0.70710677, %v6921_v0  ;;  %v6926_v52 = vadd.f32 %v4845_v36, %v1389_v2 }
 0x436   :  { %v1419_v3 = vand.u32 2147483647, %v6924_v33  ;;  %v6930_v4 = vmul.f32 0.70710677, %v6926_v52  ;;  %vm1539_vm8 = vcmp.ge.f32.partialorder %v6924_v33, 0.0 }
 0x437   :  { %v1360_v5 = vpop.f32.mrb[4].mxu1 }
 0x438   :  { %v1425_v6 = vmul.f32 0.3275911, %v1419_v3  ;;  %v1420_v55 = vand.u32 2147483647, %v6930_v4  ;;  %v1390_v7 = vmul.f32 %v4844_v61, %v1360_v5  ;;  %v5315_v30 = vpop.f32.mrb[5].mxu1  ;;  %v1503_v26 = vsub.f32 0.0, %v1419_v3 }
 0x439   :  { %v1363_v45 = vpop.f32.mrb[6].mxu1  ;;  %vm1540_vm9 = vcmp.ge.f32.partialorder %v6930_v4, 0.0 }
 0x43a   :  { %v1431_v9 = vadd.f32 1.0, %v1425_v6  ;;  %v1426_v11 = vmul.f32 0.3275911, %v1420_v55  ;;  %v6933_v12 = vadd.f32 %v4845_v36, %v1390_v7  ;;  %v1391_v40 = vmul.f32 %v4844_v61, %v1363_v45  ;;  %v5316_v15 = vpop.f32.mrb[7].mxu1 }
 0x43b   :  { %v1504_v37 = vsub.f32 0.0, %v1420_v55  ;;  %v1509_v39 = vmul.f32 %v1503_v26, %v1419_v3 }
 0x43c   :  { %5833 = vrcp.f32 %v1431_v9  ;;  %v1432_v17 = vadd.f32 1.0, %v1426_v11  ;;  %v6936_v53 = vmul.f32 0.70710677, %v6933_v12  ;;  %v6938_v18 = vadd.f32 %v4845_v36, %v1391_v40 }
 0x43d   :  { %v1510_v14 = vmul.f32 %v1504_v37, %v1420_v55  ;;  %v1515_v19 = vmul.f32 1.442695, %v1509_v39  ;;  %v6970_v11 = vshrl.u32 %v1579_v29, 7 }
 0x43e   :  { %5835 = vrcp.f32 %v1432_v17  ;;  %v1421_v47 = vand.u32 2147483647, %v6936_v53  ;;  %v6942_v21 = vmul.f32 0.70710677, %v6938_v18  ;;  %vm1541_vm10 = vcmp.ge.f32.partialorder %v6936_v53, 0.0 }
 0x43f   :  { %v1368_v20 = vpop.f32.mrb[8].mxu1  ;;  %v1517_v63 = vmul.f32 1.442695, %v1510_v14 }
 0x440   :  { %v1392_v22 = vmul.f32 %v4844_v61, %v1368_v20  ;;  %v5319_v13 = vpop.f32.mrb[9].mxu1  ;;  %v1427_v23 = vmul.f32 0.3275911, %v1421_v47  ;;  %v1422_v27 = vand.u32 2147483647, %v6942_v21  ;;  %v1505_v56 = vsub.f32 0.0, %v1421_v47 }
 0x441   :  { %v1371_v24 = vpop.f32.mrb[10].mxu1  ;;  %v1407_v13 = vmul.f32 0.5, %v6921_v0  ;;  %vm1542_vm1 = vcmp.ge.f32.partialorder %v6942_v21, 0.0 }
 0x442   :  { %v6945_v28 = vadd.f32 %v4845_v36, %v1392_v22  ;;  %v1393_v31 = vmul.f32 %v4844_v61, %v1371_v24  ;;  %v5320_v10 = vpop.f32.mrb[11].mxu1  ;;  %v1433_v32 = vadd.f32 1.0, %v1427_v23  ;;  %v1428_v34 = vmul.f32 0.3275911, %v1422_v27 }
 0x443   :  { %v1577_v61 = vunpack.c.l.s4 %v6411_v51  ;;  %v1506_v25 = vsub.f32 0.0, %v1422_v27  ;;  %v1511_v3 = vmul.f32 %v1505_v56, %v1421_v47  ;;  %v6978_v23 = vsub.s32 0, %v6970_v11 }
 0x444   :  { %v6948_v35 = vmul.f32 0.70710677, %v6945_v28  ;;  %5837 = vrcp.f32 %v1433_v32  ;;  %v6950_v8 = vadd.f32 %v4845_v36, %v1393_v31  ;;  %v1434_v16 = vadd.f32 1.0, %v1428_v34 }
 0x445   :  { %v1578_v55 = vunpack.c.0.s8 %v1577_v61  ;;  %v1512_v45 = vmul.f32 %v1506_v25, %v1422_v27  ;;  %v1519_v20 = vmul.f32 1.442695, %v1511_v3  ;;  %v7018_v33 = vmul.f32 0.5, %v6945_v28 }
 0x446   :  { %v5834_v38 = vpop.eup %5833  ;;  %v6953_v41 = vand.u32 2147483647, %v6948_v35  ;;  %v6956_v43 = vmul.f32 0.70710677, %v6950_v8  ;;  %5839 = vrcp.f32 %v1434_v16  ;;  %vm1543_vm4 = vcmp.ge.f32.partialorder %v6948_v35, 0.0 }
 0x447   :  { %v1449_v42 = vmul.f32 1.0614054, %v5834_v38  ;;  %v6982_v27 = vsub.s32 %v1578_v55, %v6970_v11  ;;  %v1521_v32 = vmul.f32 1.442695, %v1512_v45  ;;  %v7005_v55 = vmul.f32 0.5, %v6933_v12 }
 0x448   :  { %v1429_v44 = vmul.f32 0.3275911, %v6953_v41  ;;  %v6959_v46 = vpop.eup %5835  ;;  %v6962_v50 = vand.u32 2147483647, %v6956_v43  ;;  %v1507_v0 = vsub.f32 0.0, %v6953_v41  ;;  %vm1544_vm5 = vcmp.ge.f32.partialorder %v6956_v43, 0.0 }
 0x449   :  { %v1455_v49 = vadd.f32 -1.4531521, %v1449_v42  ;;  %v1450_v54 = vmul.f32 1.0614054, %v6959_v46 }
 0x44a   :  { %v1435_v57 = vadd.f32 1.0, %v1429_v44  ;;  %v1430_v60 = vmul.f32 0.3275911, %v6962_v50  ;;  %v1513_v29 = vmul.f32 %v1507_v0, %v6953_v41 }
 0x44b   :  { %v1461_v59 = vmul.f32 %v5834_v38, %v1455_v49  ;;  %v1456_v36 = vadd.f32 -1.4531521, %v1450_v54  ;;  %v1508_v49 = vsub.f32 0.0, %v6962_v50 }
 0x44c   :  { %5841 = vrcp.f32 %v1435_v57  ;;  %v1436_v2 = vadd.f32 1.0, %v1430_v60  ;;  %v1523_v45 = vmul.f32 1.442695, %v1513_v29 }
 0x44d   :  { %v1467_v62 = vadd.f32 1.4214138, %v1461_v59  ;;  %5843 = vpow2.f32 %v1515_v19  ;;  %v1462_v58 = vmul.f32 %v6959_v46, %v1456_v36  ;;  %v1408_v19 = vmul.f32 0.5, %v6926_v52 }
 0x44e   :  { %v6967_v5 = vpop.eup %5837  ;;  %5845 = vrcp.f32 %v1436_v2  ;;  %v1514_v2 = vmul.f32 %v1508_v49, %v6962_v50 }
 0x44f   :  { %v1473_v6 = vmul.f32 %v5834_v38, %v1467_v62  ;;  %v1468_v7 = vadd.f32 1.4214138, %v1462_v58  ;;  %v1451_v30 = vmul.f32 1.0614054, %v6967_v5  ;;  %5847 = vpow2.f32 %v1517_v63 }
 0x450   :  { %v6972_v40 = vpop.eup %5839  ;;  %5849 = vpow2.f32 %v1519_v20 }
 0x451   :  { %v1479_v9 = vadd.f32 -0.28449672, %v1473_v6  ;;  %v1474_v15 = vmul.f32 %v6959_v46, %v1468_v7  ;;  %v1457_v17 = vadd.f32 -1.4531521, %v1451_v30  ;;  %v1452_v22 = vmul.f32 1.0614054, %v6972_v40 }
 0x452   :  { %5851 = vpow2.f32 %v1521_v32 }
 0x453   :  { %v1485_v47 = vmul.f32 %v5834_v38, %v1479_v9  ;;  %v1480_v24 = vadd.f32 -0.28449672, %v1474_v15  ;;  %v1463_v26 = vmul.f32 %v6967_v5, %v1457_v17  ;;  %v1458_v10 = vadd.f32 -1.4531521, %v1452_v22 }
 0x454   :  { %5853 = vpow2.f32 %v1523_v45 }
 0x455   :  { %v1491_v31 = vadd.f32 0.2548296, %v1485_v47  ;;  %v1486_v37 = vmul.f32 %v6959_v46, %v1480_v24  ;;  %v1469_v39 = vadd.f32 1.4214138, %v1463_v26  ;;  %v1464_v42 = vmul.f32 %v6972_v40, %v1458_v10 }
 0x456   :  { %v6984_v34 = vpop.eup %5841  ;;  %v1525_v47 = vmul.f32 1.442695, %v1514_v2  ;;  %v7015_v10 = vmul.f32 0.5, %v6938_v18 }
 0x457   :  { %v1497_v16 = vmul.f32 %v5834_v38, %v1491_v31  ;;  %v1453_v44 = vmul.f32 1.0614054, %v6984_v34  ;;  %v5844_v14 = vpop.eup %5843  ;;  %v1492_v54 = vadd.f32 0.2548296, %v1486_v37  ;;  %v1475_v56 = vmul.f32 %v6967_v5, %v1469_v39 }
 0x458   :  { %v6994_v57 = vpop.eup %5845  ;;  %v1470_v60 = vadd.f32 1.4214138, %v1464_v42  ;;  %5855 = vpow2.f32 %v1525_v47 }
 0x459   :  { %v1527_v59 = vmul.f32 %v5844_v14, %v1497_v16  ;;  %v1459_v38 = vadd.f32 -1.4531521, %v1453_v44  ;;  %v1498_v51 = vmul.f32 %v6959_v46, %v1492_v54  ;;  %v1481_v61 = vadd.f32 -0.28449672, %v1475_v56  ;;  %v5848_v62 = vpop.eup %5847 }
 0x45a   :  { %v1454_v36 = vmul.f32 1.0614054, %v6994_v57  ;;  %v1476_v52 = vmul.f32 %v6972_v40, %v1470_v60  ;;  %v5850_v22 = vpop.eup %5849 }
 0x45b   :  { %v1533_v63 = vsub.f32 1.0, %v1527_v59  ;;  %v1465_v25 = vmul.f32 %v6984_v34, %v1459_v38  ;;  %v1528_v58 = vmul.f32 %v5848_v62, %v1498_v51  ;;  %v1487_v3 = vmul.f32 %v6967_v5, %v1481_v61 }
 0x45c   :  { %v1460_v6 = vadd.f32 -1.4531521, %v1454_v36  ;;  %v1482_v41 = vadd.f32 -0.28449672, %v1476_v52  ;;  %v5852_v44 = vpop.eup %5851 }
 0x45d   :  { %v1545_v46 = vsub.f32 0.0, %v1533_v63  ;;  %v1471_v7 = vadd.f32 1.4214138, %v1465_v25  ;;  %v1534_v30 = vsub.f32 1.0, %v1528_v58  ;;  %v1493_v9 = vadd.f32 0.2548296, %v1487_v3 }
 0x45e   :  { %v1466_v15 = vmul.f32 %v6994_v57, %v1460_v6  ;;  %v1488_v17 = vmul.f32 %v6972_v40, %v1482_v41 }
 0x45f   :  { %v1551_v50 = vsel %vm1539_vm8, %v1533_v63, %v1545_v46  ;;  %v1477_v20 = vmul.f32 %v6984_v34, %v1471_v7  ;;  %v1546_v26 = vsub.f32 0.0, %v1534_v30  ;;  %v1499_v12 = vmul.f32 %v6967_v5, %v1493_v9 }
 0x460   :  { %v1557_v24 = vadd.f32 1.0, %v1551_v50  ;;  %v1472_v31 = vadd.f32 1.4214138, %v1466_v15  ;;  %v1494_v32 = vadd.f32 0.2548296, %v1488_v17 }
 0x461   :  { %v1483_v37 = vadd.f32 -0.28449672, %v1477_v20  ;;  %v1552_v0 = vsel %vm1540_vm9, %v1534_v30, %v1546_v26  ;;  %v1529_v16 = vmul.f32 %v5850_v22, %v1499_v12  ;;  %v5854_v22 = vpop.eup %5853 }
 0x462   :  { %v1563_v39 = vmul.f32 %v1557_v24, %v1407_v13  ;;  %v1478_v42 = vmul.f32 %v6994_v57, %v1472_v31  ;;  %v1558_v5 = vadd.f32 1.0, %v1552_v0  ;;  %v1500_v49 = vmul.f32 %v6972_v40, %v1494_v32  ;;  %v7039_v31 = vpop.eup %5855 }
 0x463   :  { %v1489_v14 = vmul.f32 %v6984_v34, %v1483_v37  ;;  %v1535_v28 = vsub.f32 1.0, %v1529_v16 }
 0x464   :  { %v1575_v18 = vcombine.high %v1563_v39, %v1563_v39  ;;  %v1582_v54 = vrot.slane %v1563_v39, %v6982_v27  ;;  %v1564_v13 = vmul.f32 %v1558_v5, %v1408_v19  ;;  %v7026_v56 = vmul.f32 %v5852_v44, %v1500_v49 }
 0x465   :  { %v1495_v4 = vadd.f32 0.2548296, %v1489_v14  ;;  %v7028_v59 = vadd.f32 -0.28449672, %v1478_v42  ;;  %v1547_v40 = vsub.f32 0.0, %v1535_v28 }
 0x466   :  { %v1589_v60 = vrot.slane %v1575_v18, %v6982_v27  ;;  %v1590_v38 = vcombine.high %v1582_v54, %v1582_v54  ;;  %v4846_v51 = vrot.slane %v1582_v54, 9  ;;  %v1592_v61 = vcombine.high %v1564_v13, %v1564_v13 }
 0x467   :  { %v1599_v29 = vrot.slane %v1564_v13, %v6982_v27  ;;  %v1536_v36 = vsub.f32 1.0, %v7026_v56  ;;  %v1501_v62 = vmul.f32 %v6984_v34, %v1495_v4  ;;  %v1553_v6 = vsel %vm1541_vm10, %v1535_v28, %v1547_v40 }
 0x468   :  { %v1591_v19 = vcombine.high %v1589_v60, %v1589_v60  ;;  %v4847_v63 = vrot.slane %v1590_v38, 9  ;;  %v4848_v52 = vrot.slane %v1589_v60, 9  ;;  %v1773_v25 = vadd.f32 %v4846_v51, %v1582_v54 }
 0x469   :  { %v1606_v2 = vrot.slane %v1592_v61, %v6982_v27  ;;  %v1607_v58 = vcombine.high %v1599_v29, %v1599_v29  ;;  %v4850_v3 = vrot.slane %v1599_v29, 9  ;;  %v1559_v0 = vadd.f32 1.0, %v1553_v6 }
 0x46a   :  { %v4849_v46 = vrot.slane %v1591_v19, 9  ;;  %v1774_v41 = vadd.f32 %v4847_v63, %v1590_v38  ;;  %v1775_v7 = vadd.f32 %v4848_v52, %v1589_v60  ;;  %v1797_v30 = vmul.f32 0.5, %v1773_v25 }
 0x46b   :  { %v1608_v34 = vcombine.high %v1606_v2, %v1606_v2  ;;  %v4851_v9 = vrot.slane %v1607_v58, 9  ;;  %v4852_v45 = vrot.slane %v1606_v2, 9  ;;  %v1777_v15 = vadd.f32 %v4850_v3, %v1599_v29 }
 0x46c   :  { %v1776_v50 = vadd.f32 %v4849_v46, %v1591_v19  ;;  %v1798_v17 = vmul.f32 0.5, %v1774_v41  ;;  %v1799_v20 = vmul.f32 0.5, %v1775_v7  ;;  %v1848_v47 = vrot.slane %v1797_v30, %v6978_v23 }
 0x46d   :  { %v4853_v53 = vrot.slane %v1608_v34, 9  ;;  %v1778_v24 = vadd.f32 %v4851_v9, %v1607_v58  ;;  %v1779_v26 = vadd.f32 %v4852_v45, %v1606_v2  ;;  %v1801_v12 = vmul.f32 0.5, %v1777_v15 }
 0x46e   :  { %v1800_v32 = vmul.f32 0.5, %v1776_v50  ;;  %v1852_v37 = vrot.slane %v1798_v17, %v6978_v23  ;;  %v1856_v39 = vrot.slane %v1799_v20, %v6978_v23  ;;  %v1565_v18 = vmul.f32 %v1559_v0, %v7005_v55 }
 0x46f   :  { %v1780_v16 = vadd.f32 %v4853_v53, %v1608_v34  ;;  %v1802_v42 = vmul.f32 0.5, %v1778_v24  ;;  %v1803_v44 = vmul.f32 0.5, %v1779_v26  ;;  %v1864_v5 = vrot.slane %v1801_v12, %v6978_v23 }
 0x470   :  { %v1860_v49 = vrot.slane %v1800_v32, %v6978_v23  ;;  %v1942_v14 = vsel %vm1941_vm11, %v1852_v37, %v1848_v47  ;;  %v1548_v54 = vsub.f32 0.0, %v1536_v36  ;;  %v1609_v38 = vcombine.high %v1565_v18, %v1565_v18 }
 0x471   :  { %v1944_v28 = vsel %vm1943_vm12, %v1856_v39, %v1942_v14  ;;  %v1804_v13 = vmul.f32 0.5, %v1780_v16  ;;  %v1868_v56 = vrot.slane %v1802_v42, %v6978_v23  ;;  %v1872_v4 = vrot.slane %v1803_v44, %v6978_v23 }
 0x472   :  { %v1946_v60 = vsel %vm1945_vm13, %v1860_v49, %v1944_v28  ;;  %v1616_v51 = vrot.slane %v1565_v18, %v6982_v27  ;;  %v1554_v40 = vsel %vm1542_vm1, %v1536_v36, %v1548_v54  ;;  %v1531_v19 = vmul.f32 %v5854_v22, %v1501_v62 }
 0x473   :  { %v1876_v55 = vrot.slane %v1804_v13, %v6978_v23  ;;  %v1948_v61 = vsel %vm1947_vm14, %v1864_v5, %v1946_v60  ;;  %v1560_v29 = vadd.f32 1.0, %v1554_v40  ;;  %v1623_v52 = vrot.slane %v1609_v38, %v6982_v27 }
 0x474   :  { %v1950_v63 = vsel %vm1949_vm15, %v1868_v56, %v1948_v61  ;;  %v1624_v25 = vcombine.high %v1616_v51, %v1616_v51  ;;  %v4854_v2 = vrot.slane %v1616_v51, 9  ;;  %v1537_v6 = vsub.f32 1.0, %v1531_v19 }
 0x475   :  { %v1952_v58 = vsel %vm1951_vm2, %v1872_v4, %v1950_v63  ;;  %v1566_v3 = vmul.f32 %v1560_v29, %v7015_v10  ;;  %v1490_v21 = vmul.f32 %v6994_v57, %v7028_v59  ;;  %v1625_v46 = vcombine.high %v1623_v52, %v1623_v52 }
 0x476   :  { %v7064_v36 = vsel %vm1953_vm3, %v1876_v55, %v1952_v58  ;;  %v4855_v41 = vrot.slane %v1624_v25, 9  ;;  %v4856_v62 = vrot.slane %v1623_v52, 9  ;;  %v1781_v7 = vadd.f32 %v4854_v2, %v1616_v51 }
 0x477   :  { %1972 = vst [vmem:[#allocation2 + $0x1] sm:$0xff] %v7064_v36  ;;  %v1626_v30 = vcombine.high %v1566_v3, %v1566_v3  ;;  %v1633_v34 = vrot.slane %v1566_v3, %v6982_v27  ;;  %v1549_v9 = vsub.f32 0.0, %v1537_v6  ;;  %v4857_v45 = vrot.slane %v1625_v46, 9 }
 0x478   :  { %v1782_v15 = vadd.f32 %v4855_v41, %v1624_v25  ;;  %v1783_v10 = vadd.f32 %v4856_v62, %v1623_v52  ;;  %v1496_v50 = vadd.f32 0.2548296, %v1490_v21  ;;  %v1805_v17 = vmul.f32 0.5, %v1781_v7 }
 0x479   :  { %v1640_v59 = vrot.slane %v1626_v30, %v6982_v27  ;;  %v1641_v20 = vcombine.high %v1633_v34, %v1633_v34  ;;  %v4858_v47 = vrot.slane %v1633_v34, 9  ;;  %v1784_v22 = vadd.f32 %v4857_v45, %v1625_v46 }
 0x47a   :  { %v1806_v53 = vmul.f32 0.5, %v1782_v15  ;;  %v1807_v24 = vmul.f32 0.5, %v1783_v10  ;;  %v1555_v26 = vsel %vm1543_vm4, %v1537_v6, %v1549_v9  ;;  %v1880_v12 = vrot.slane %v1805_v17, %v6978_v23 }
 0x47b   :  { %v1642_v32 = vcombine.high %v1640_v59, %v1640_v59  ;;  %v4859_v37 = vrot.slane %v1641_v20, 9  ;;  %v4860_v39 = vrot.slane %v1640_v59, 9  ;;  %v1808_v0 = vmul.f32 0.5, %v1784_v22 }
 0x47c   :  { %v1884_v16 = vrot.slane %v1806_v53, %v6978_v23  ;;  %v1888_v42 = vrot.slane %v1807_v24, %v6978_v23  ;;  %v1785_v44 = vadd.f32 %v4858_v47, %v1633_v34  ;;  %v1561_v18 = vadd.f32 1.0, %v1555_v26 }
 0x47d   :  { %v4861_v5 = vrot.slane %v1642_v32, 9  ;;  %v1786_v49 = vadd.f32 %v4859_v37, %v1641_v20  ;;  %v1787_v14 = vadd.f32 %v4860_v39, %v1640_v59  ;;  %v1892_v54 = vrot.slane %v1808_v0, %v6978_v23 }
 0x47e   :  { %v1955_v35 = vsel %vm1941_vm11, %v1884_v16, %v1880_v12  ;;  %v1809_v28 = vmul.f32 0.5, %v1785_v44  ;;  %v1502_v13 = vmul.f32 %v6994_v57, %v1496_v50  ;;  %v1567_v40 = vmul.f32 %v1561_v18, %v7018_v33  ;;  %v1978_v59 = vld [vmem:[#allocation2] sm:$0xff] }
 0x47f   :  { %v1956_v56 = vsel %vm1943_vm12, %v1888_v42, %v1955_v35  ;;  %v1788_v4 = vadd.f32 %v4861_v5, %v1642_v32  ;;  %v1810_v60 = vmul.f32 0.5, %v1786_v49  ;;  %v1811_v38 = vmul.f32 0.5, %v1787_v14 }
 0x480   :  { %v1957_v51 = vsel %vm1945_vm13, %v1892_v54, %v1956_v56  ;;  %v1532_v55 = vmul.f32 %v7039_v31, %v1502_v13  ;;  %v1896_v29 = vrot.slane %v1809_v28, %v6978_v23  ;;  %v1643_v57 = vcombine.high %v1567_v40, %v1567_v40 }
 0x481   :  { %1973 = vst [vmem:[#allocation2 + $0x9] sm:$0xf] %v1957_v51  ;;  %v1812_v61 = vmul.f32 0.5, %v1788_v4  ;;  %v1900_v19 = vrot.slane %v1810_v60, %v6978_v23  ;;  %v1904_v63 = vrot.slane %v1811_v38, %v6978_v23  ;;  %v1650_v52 = vrot.slane %v1567_v40, %v6982_v27 }
 0x482   :  { %v1538_v25 = vsub.f32 1.0, %v1532_v55  ;;  %v1657_v58 = vrot.slane %v1643_v57, %v6982_v27  ;;  %v1412_v50 = vmul.f32 0.5, %v6950_v8  ;;  %v2020_v42 = vcombine.high %v7064_v36, %v7064_v36 }
 0x483   :  { %v1958_v2 = vsel %vm1941_vm11, %v1900_v19, %v1896_v29  ;;  %v1658_v3 = vcombine.high %v1650_v52, %v1650_v52  ;;  %v4862_v33 = vrot.slane %v1650_v52, 9  ;;  %v1908_v31 = vrot.slane %v1812_v61, %v6978_v23 }
 0x484   :  { %v1959_v6 = vsel %vm1943_vm12, %v1904_v63, %v1958_v2  ;;  %v1550_v21 = vsub.f32 0.0, %v1538_v25  ;;  %v1659_v46 = vcombine.high %v1657_v58, %v1657_v58  ;;  %v4864_v62 = vrot.slane %v1657_v58, 9 }
 0x485   :  { %v4863_v41 = vrot.slane %v1658_v3, 9  ;;  %v1789_v7 = vadd.f32 %v4862_v33, %v1650_v52  ;;  %v1960_v10 = vsel %vm1945_vm13, %v1908_v31, %v1959_v6  ;;  %v2022_v4 = vcombine.low %v7064_v36, %v2020_v42  ;;  %v5746_v42 = vld [vmem:[#allocation12 + $0x98] sm:$0xff]  }
 0x486   :  { %v1556_v30 = vsel %vm1544_vm5, %v1538_v25, %v1550_v21  ;;  %v4865_v34 = vrot.slane %v1659_v46, 9  ;;  %v1791_v45 = vadd.f32 %v4864_v62, %v1657_v58  ;;  %v1986_v6 = vcombine.high %v1978_v59, %v1978_v59 }
 0x487   :  { %v1790_v9 = vadd.f32 %v4863_v41, %v1658_v3  ;;  %v1813_v15 = vmul.f32 0.5, %v1789_v7  ;;  %v1562_v17 = vadd.f32 1.0, %v1556_v30  ;;  %vm4440_vm1 = vcmask 1043456  }
 0x488   :  { %v7092_v20 = vld [vmem:[#allocation2 + $0x2] sm:$0xff]  ;;  %v1792_v47 = vadd.f32 %v4865_v34, %v1659_v46  ;;  %v1815_v22 = vmul.f32 0.5, %v1791_v45  ;;  %v1988_v34 = vcombine.low %v1978_v59, %v1986_v6  ;;  %v5733_v45 = vld [vmem:[#allocation12 + $0x8] sm:$0xff]   ;;  %v5738_v59 = vld [vmem:[#allocation12 + $0x30] sm:$0xff]   ;;  %vm4612_vm4 = vcmask 523264  }
 0x489   :  { %v1814_v43 = vmul.f32 0.5, %v1790_v9  ;;  %v1912_v53 = vrot.slane %v1813_v15, %v6978_v23  ;;  %2674 = vst [vmem:[#allocation2 + $0x7] sm:$0x1] %v6409_v1  ;;  %v1568_v24 = vmul.f32 %v1562_v17, %v1412_v50  ;;  %v2013_v18 = vld [vmem:[#allocation2 + $0x9] sm:$0xf]  ;;  %v5735_v50 = vld [vmem:[#allocation12 + $0x18] sm:$0xff]  }
 0x48a   :  { %v1816_v26 = vmul.f32 0.5, %v1792_v47  ;;  %v1920_v32 = vrot.slane %v1815_v22, %v6978_v23  ;;  %v1979_v46 = vld [vmem:[#allocation2 + $0x8] sm:$0xf]  ;;  %v5737_v47 = vld [vmem:[#allocation12 + $0x28] sm:$0xff]   ;;  %vm4713_vm5 = vcmask 1024  }
 0x48b   :  { %v1916_v12 = vrot.slane %v1814_v43, %v6978_v23  ;;  %v1961_v37 = vsel %vm1947_vm14, %v1912_v53, %v1960_v10  ;;  %v1660_v8 = vcombine.high %v1568_v24, %v1568_v24  ;;  %v1667_v39 = vrot.slane %v1568_v24, %v6982_v27  ;;  %v5734_v10 = vld [vmem:[#allocation12 + $0x10] sm:$0xff]   ;;  %v5736_v17 = vld [vmem:[#allocation12 + $0x20] sm:$0xff]   ;;  %v5739_v43 = vld [vmem:[#allocation12 + $0x38] sm:$0xff]  }
 0x48c   :  { %v1924_v0 = vrot.slane %v1816_v26, %v6978_v23  ;;  %v2247_v53 = vcombine.high %v7092_v20, %v7092_v20  ;;  %v5741_v26 = vld [vmem:[#allocation12 + $0x80] sm:$0xff]  }
 0x48d   :  { %v1962_v16 = vsel %vm1949_vm15, %v1916_v12, %v1961_v37  ;;  %v1674_v5 = vrot.slane %v1660_v8, %v6982_v27  ;;  %v1675_v49 = vcombine.high %v1667_v39, %v1667_v39  ;;  %v4866_v14 = vrot.slane %v1667_v39, 9  ;;  %v2240_v12 = vld [vmem:[#allocation2 + $0xa] sm:$0xf] }
 0x48e   :  { %v1963_v44 = vsel %vm1951_vm2, %v1920_v32, %v1962_v16  ;;  %v2249_v37 = vcombine.low %v7092_v20, %v2247_v53  ;;  %v5745_v16 = vld [vmem:[#allocation12 + $0x90] sm:$0xff]   ;;  %vm4436_vm2 = vcmask 195584  }
 0x48f   :  { %v1964_v54 = vsel %vm1953_vm3, %v1924_v0, %v1963_v44  ;;  %v1676_v35 = vcombine.high %v1674_v5, %v1674_v5  ;;  %v4867_v28 = vrot.slane %v1675_v49, 9  ;;  %v4868_v13 = vrot.slane %v1674_v5, 9  ;;  %v5747_v44 = vld [vmem:[#allocation12 + $0xa0] sm:$0xff]   ;;  %v5749_v20 = vld [vmem:[#allocation12 + $0xb0] sm:$0xff]  }
 0x490   :  { %1974 = vst [vmem:[#allocation2 + $0x21] sm:$0xff] %v1964_v54  ;;  %v1793_v56 = vadd.f32 %v4866_v14, %v1667_v39  ;;  %v2023_v60 = vcombine.low %v2013_v18, %v1964_v54  ;;  %v2021_v21 = vcombine.high %v1964_v54, %v1964_v54  ;;  %v5744_v39 = vld [vmem:[#allocation12 + $0x88] sm:$0xff]   ;;  %vm4680_vm3 = vcmask 91136  }
 0x491   :  { %v4869_v38 = vrot.slane %v1676_v35, 9  ;;  %v1794_v51 = vadd.f32 %v4867_v28, %v1675_v49  ;;  %v1795_v40 = vadd.f32 %v4868_v13, %v1674_v5  ;;  %v5748_v5 = vld [vmem:[#allocation12 + $0xa8] sm:$0xff]   ;;  %v5750_v49 = vld [vmem:[#allocation12 + $0xb8] sm:$0xff]  }
 0x492   :  { %v1817_v55 = vmul.f32 0.5, %v1793_v56  ;;  %v2028_v61 = vpack.c.bf16 %v2023_v60, %v2022_v4  ;;  %v5751_v28 = vld [vmem:[#allocation17 + $0x40] sm:$0xff]   ;;  %v5752_v13 = vld [vmem:[#allocation17 + $0x48] sm:$0xff]   ;;  %v5753_v56 = vld [vmem:[#allocation17 + $0x50] sm:$0xff]  }
 0x493   :  { %v1796_v29 = vadd.f32 %v4869_v38, %v1676_v35  ;;  %v1818_v19 = vmul.f32 0.5, %v1794_v51  ;;  %v1819_v63 = vmul.f32 0.5, %v1795_v40  ;;  %5382 = vmatpush3.bf16.msra.mxu1 %v5751_v28  ;;  %v5754_v4 = vld [vmem:[#allocation17 + $0x58] sm:$0xff]   ;;  %v5755_v60 = vld [vmem:[#allocation17 + $0x60] sm:$0xff]   ;;  %v5756_v38 = vld [vmem:[#allocation17 + $0x68] sm:$0xff]  }
 0x494   :  { %5337 = vmatprep.mubr.bf16.mxu0 %v2028_v61  ;;  %v1928_v52 = vrot.slane %v1817_v55, %v6978_v23  ;;  %5383 = vmatprep.subr.bf16.mxu1 %v6409_v1  ;;  %v5757_v51 = vld [vmem:[#allocation17 + $0x70] sm:$0xff]   ;;  %v5758_v40 = vld [vmem:[#allocation17 + $0x78] sm:$0xff]  }
 0x495   :  { %v1820_v57 = vmul.f32 0.5, %v1796_v29  ;;  %v1932_v25 = vrot.slane %v1818_v19, %v6978_v23  ;;  %v1936_v2 = vrot.slane %v1819_v63, %v6978_v23  ;;  %v4894_v55 = vld [vmem:[#allocation14] ss:$0 sm:$0xff]  ;;  %v4895_v29 = vld [vmem:[#allocation15] ss:$0 sm:$0xff] }
 0x497   :  { %v1940_v58 = vrot.slane %v1820_v57, %v6978_v23  ;;  %v1965_v36 = vsel %vm1941_vm11, %v1932_v25, %v1928_v52  ;;  %v1980_v31 = vld [vmem:[#allocation2 + $0x20] sm:$0xff]  ;;  %5384 = vmatpush3.bf16.msra.mxu1 %v5752_v13 }
 0x498   :  { %v1966_v3 = vsel %vm1943_vm12, %v1936_v2, %v1965_v36  ;;  %v1989_v62 = vcombine.low %v1979_v46, %v1980_v31  ;;  %v1987_v22 = vcombine.high %v1980_v31, %v1980_v31  ;;  %5385 = vmatprep.subr.bf16.mxu1 %v6409_v1 }
 0x499   :  { %v1967_v33 = vsel %vm1945_vm13, %v1940_v58, %v1966_v3 }
 0x49a   :  { %1975 = vst [vmem:[#allocation2 + $0x29] sm:$0xf] %v1967_v33  ;;  %v1994_v15 = vpack.c.bf16 %v1989_v62, %v1988_v34 }
 0x49b   :  { %5386 = vmatpush3.bf16.msra.mxu1 %v5753_v56 }
 0x49c   :  { %5387 = vmatprep.subr.bf16.mxu1 %v6409_v1 }
 0x49f   :  { %5388 = vmatpush3.bf16.msra.mxu1 %v5754_v4 }
 0x4a0   :  { %5389 = vmatprep.subr.bf16.mxu1 %v6409_v1 }
 0x4a1   :  { %v2015_v41 = vld [vmem:[#allocation2 + $0x29] sm:$0xf] }
 0x4a2   :  { %v7115_v7 = vld [vmem:[#allocation2 + $0x22] sm:$0xff]  ;;  %v2024_v30 = vcombine.low %v2021_v21, %v2015_v41  ;;  %v2242_v18 = vld [vmem:[#allocation2 + $0x2a] sm:$0xf] }
 0x4a3   :  { %2675 = vst [vmem:[#allocation2 + $0x27] sm:$0x1] %v6409_v1  ;;  %v2250_v32 = vcombine.low %v2240_v12, %v7115_v7  ;;  %v2248_v14 = vcombine.high %v7115_v7, %v7115_v7  ;;  %5390 = vmatpush3.bf16.msra.mxu1 %v5755_v60 }
 0x4a4   :  { %v2029_v9 = vpack.c.bf16 %v2024_v30, %v2024_v30  ;;  %5391 = vmatprep.subr.bf16.mxu1 %v6409_v1 }
 0x4a5   :  { %v2255_v0 = vpack.c.bf16 %v2250_v32, %v2249_v37  ;;  %v2251_v54 = vcombine.low %v2248_v14, %v2242_v18 }
 0x4a6   :  { %5338 = vmatmul.mubr.bf16.vlgmr.msra.gmra.mrb[12].mxu0 %v2029_v9 }
 0x4a7   :  { %5342 = vmatpush3.bf16.msra.mxu0 %v6918_v48  ;;  %5357 = vmatprep.mubr.bf16.mxu0 %v1994_v15  ;;  %v1981_v48 = vld [vmem:[#allocation2 + $0x28] sm:$0xf]  ;;  %v2256_v35 = vpack.c.bf16 %v2251_v54, %v2251_v54 }
 0x4a8   :  { %5343 = vmatprep.subr.bf16.mxu0 %v5733_v45  ;;  %v1990_v24 = vcombine.low %v1987_v22, %v1981_v48  ;;  %5392 = vmatpush3.bf16.msra.mxu1 %v5756_v38 }
 0x4a9   :  { %5393 = vmatprep.subr.bf16.mxu1 %v6409_v1 }
 0x4aa   :  { %v1995_v8 = vpack.c.bf16 %v1990_v24, %v1990_v24 }
 0x4ab   :  { %5344 = vmatpush3.bf16.msra.mxu0 %v5733_v45 }
 0x4ac   :  { %5345 = vmatprep.subr.bf16.mxu0 %v5734_v10  ;;  %5394 = vmatpush3.bf16.msra.mxu1 %v5757_v51 }
 0x4ad   :  { %5395 = vmatprep.subr.bf16.mxu1 %v6409_v1 }
 0x4af   :  { %5346 = vmatpush3.bf16.msra.mxu0 %v5734_v10 }
 0x4b0   :  { %5347 = vmatprep.subr.bf16.mxu0 %v5735_v50  ;;  %5396 = vmatpush3.bf16.msra.mxu1 %v5758_v40 }
 0x4b1   :  { %5401 = vmatprep.subr.bf16.mxu1 %v6409_v1 }
 0x4b3   :  { %5348 = vmatpush3.bf16.msra.mxu0 %v5735_v50 }
 0x4b4   :  { %5349 = vmatprep.subr.bf16.mxu0 %v5736_v17 }
 0x4b7   :  { %5350 = vmatpush3.bf16.msra.mxu0 %v5736_v17 }
 0x4b8   :  { %5351 = vmatprep.subr.bf16.mxu0 %v5737_v47 }
 0x4bb   :  { %5352 = vmatpush3.bf16.msra.mxu0 %v5737_v47 }
 0x4bc   :  { %5353 = vmatprep.subr.bf16.mxu0 %v5738_v59 }
 0x4bf   :  { %5354 = vmatpush3.bf16.msra.mxu0 %v5738_v59 }
 0x4c0   :  { %5355 = vmatprep.subr.bf16.mxu0 %v5739_v43 }
 0x4c3   :  { %5356 = vmatpush3.bf16.msra.mxu0 %v5739_v43 }
 0x4c4   :  { %5361 = vmatprep.subr.bf16.mxu0 %v5741_v26 }
 0x4c6   :  { %5358 = vmatmul.mubr.bf16.vlgmr.msra.gmra.mrb[12].mxu0 %v1995_v8 }
 0x4c7   :  { %5362 = vmatpush3.bf16.msra.mxu0 %v5741_v26  ;;  %5377 = vmatprep.mubr.bf16.mxu0 %v2255_v0 }
 0x4c8   :  { %5363 = vmatprep.subr.bf16.mxu0 %v5744_v39 }
 0x4cb   :  { %5364 = vmatpush3.bf16.msra.mxu0 %v5744_v39 }
 0x4cc   :  { %5365 = vmatprep.subr.bf16.mxu0 %v5745_v16 }
 0x4cf   :  { %5366 = vmatpush3.bf16.msra.mxu0 %v5745_v16 }
 0x4d0   :  { %5367 = vmatprep.subr.bf16.mxu0 %v5746_v42 }
 0x4d3   :  { %5368 = vmatpush3.bf16.msra.mxu0 %v5746_v42 }
 0x4d4   :  { %5369 = vmatprep.subr.bf16.mxu0 %v5747_v44 }
 0x4d7   :  { %5370 = vmatpush3.bf16.msra.mxu0 %v5747_v44 }
 0x4d8   :  { %5371 = vmatprep.subr.bf16.mxu0 %v5748_v5 }
 0x4db   :  { %5372 = vmatpush3.bf16.msra.mxu0 %v5748_v5 }
 0x4dc   :  { %5373 = vmatprep.subr.bf16.mxu0 %v5749_v20 }
 0x4df   :  { %5374 = vmatpush3.bf16.msra.mxu0 %v5749_v20 }
 0x4e0   :  { %5375 = vmatprep.subr.bf16.mxu0 %v5750_v49 }
 0x4e3   :  { %5376 = vmatpush3.bf16.msra.mxu0 %v5750_v49 }
 0x4e4   :  { %5441 = vmatprep.subr.bf16.mxu0 %v6409_v1 }
 0x4e6   :  { %5378 = vmatmul.mubr.bf16.vlgmr.msra.gmra.mrb[12].mxu0 %v2256_v35 }
 0x4e7   :  { %5457 = vmatprep.mubr.msk.bf16.mxu0 %vm6410_vm0, %v6409_v1 }
 0x5b9   :  { %v5379_v61 = vpop.f32.mrb[12].mxu0 }
 0x5ba   :  { %v2382_v19 = vmul.f32 %v5379_v61, %v4894_v55  ;;  %v2356_v63 = vpop.f32.mrb[13].mxu0 }
 0x5bb   :  { %v2380_v57 = vmul.f32 %v4894_v55, %v2356_v63  ;;  %v5380_v52 = vpop.f32.mrb[14].mxu0 }
 0x5bc   :  { %v7136_v25 = vadd.f32 %v4895_v29, %v2382_v19  ;;  %v2359_v2 = vpop.f32.mrb[15].mxu0 }
 0x5bd   :  { %v7138_v58 = vadd.f32 %v4895_v29, %v2380_v57  ;;  %v2381_v36 = vmul.f32 %v4894_v55, %v2359_v2 }
 0x5be   :  { %v7141_v3 = vmul.f32 0.70710677, %v7136_v25 }
 0x5bf   :  { %v7144_v33 = vmul.f32 0.70710677, %v7138_v58  ;;  %v7146_v31 = vadd.f32 %v4895_v29, %v2381_v36 }
 0x5c0   :  { %v2401_v6 = vand.u32 2147483647, %v7141_v3  ;;  %vm2461_vm6 = vcmp.ge.f32.partialorder %v7141_v3, 0.0 }
 0x5c1   :  { %v2399_v21 = vand.u32 2147483647, %v7144_v33  ;;  %v7151_v46 = vmul.f32 0.70710677, %v7146_v31  ;;  %vm2459_vm7 = vcmp.ge.f32.partialorder %v7144_v33, 0.0 }
 0x5c2   :  { %v2404_v41 = vmul.f32 0.3275911, %v2401_v6  ;;  %v2443_v15 = vsub.f32 0.0, %v2401_v6 }
 0x5c3   :  { %v2402_v62 = vmul.f32 0.3275911, %v2399_v21  ;;  %v2400_v7 = vand.u32 2147483647, %v7151_v46  ;;  %v2441_v10 = vsub.f32 0.0, %v2399_v21  ;;  %vm2460_vm8 = vcmp.ge.f32.partialorder %v7151_v46, 0.0 }
 0x5c4   :  { %v2407_v30 = vadd.f32 1.0, %v2404_v41  ;;  %v2446_v17 = vmul.f32 %v2443_v15, %v2401_v6  ;;  %v2393_v15 = vmul.f32 0.5, %v7138_v58  ;;  %v2394_v58 = vmul.f32 0.5, %v7146_v31 }
 0x5c5   :  { %v2405_v34 = vadd.f32 1.0, %v2402_v62  ;;  %v2403_v9 = vmul.f32 0.3275911, %v2400_v7  ;;  %v2442_v47 = vsub.f32 0.0, %v2400_v7  ;;  %v2444_v22 = vmul.f32 %v2441_v10, %v2399_v21 }
 0x5c6   :  { %5857 = vrcp.f32 %v2407_v30  ;;  %v2451_v26 = vmul.f32 1.442695, %v2446_v17 }
 0x5c7   :  { %5859 = vrcp.f32 %v2405_v34  ;;  %v2406_v45 = vadd.f32 1.0, %v2403_v9  ;;  %v2445_v32 = vmul.f32 %v2442_v47, %v2400_v7  ;;  %v2447_v8 = vmul.f32 1.442695, %v2444_v22 }
 0x5c8   :  { %v2395_v34 = vmul.f32 0.5, %v7136_v25 }
 0x5c9   :  { %5861 = vrcp.f32 %v2406_v45  ;;  %v2449_v5 = vmul.f32 1.442695, %v2445_v32 }
 0x5ca   :  { %5863 = vpow2.f32 %v2451_v26 }
 0x5cb   :  { %5865 = vpow2.f32 %v2447_v8 }
 0x5cc   :  { %5867 = vpow2.f32 %v2449_v5 }
 0x5d0   :  { %v5858_v50 = vpop.eup %5857 }
 0x5d1   :  { %v5860_v59 = vpop.eup %5859  ;;  %v2416_v43 = vmul.f32 1.0614054, %v5858_v50 }
 0x5d2   :  { %v2414_v48 = vmul.f32 1.0614054, %v5860_v59 }
 0x5d3   :  { %v2419_v53 = vadd.f32 -1.4531521, %v2416_v43  ;;  %v5862_v24 = vpop.eup %5861 }
 0x5d4   :  { %v2417_v12 = vadd.f32 -1.4531521, %v2414_v48  ;;  %v2415_v39 = vmul.f32 1.0614054, %v5862_v24  ;;  %v5864_v55 = vpop.eup %5863 }
 0x5d5   :  { %v2422_v37 = vmul.f32 %v5858_v50, %v2419_v53  ;;  %v5866_v29 = vpop.eup %5865 }
 0x5d6   :  { %v2420_v0 = vmul.f32 %v5860_v59, %v2417_v12  ;;  %v2418_v42 = vadd.f32 -1.4531521, %v2415_v39  ;;  %v5868_v36 = vpop.eup %5867 }
 0x5d7   :  { %v2425_v16 = vadd.f32 1.4214138, %v2422_v37 }
 0x5d8   :  { %v2423_v44 = vadd.f32 1.4214138, %v2420_v0  ;;  %v2421_v49 = vmul.f32 %v5862_v24, %v2418_v42 }
 0x5d9   :  { %v2428_v20 = vmul.f32 %v5858_v50, %v2425_v16 }
 0x5da   :  { %v2426_v14 = vmul.f32 %v5860_v59, %v2423_v44  ;;  %v2424_v54 = vadd.f32 1.4214138, %v2421_v49 }
 0x5db   :  { %v2431_v18 = vadd.f32 -0.28449672, %v2428_v20 }
 0x5dc   :  { %v2429_v35 = vadd.f32 -0.28449672, %v2426_v14  ;;  %v2427_v13 = vmul.f32 %v5862_v24, %v2424_v54 }
 0x5dd   :  { %v2434_v28 = vmul.f32 %v5858_v50, %v2431_v18 }
 0x5de   :  { %v2432_v56 = vmul.f32 %v5860_v59, %v2429_v35  ;;  %v2430_v60 = vadd.f32 -0.28449672, %v2427_v13 }
 0x5df   :  { %v2437_v4 = vadd.f32 0.2548296, %v2434_v28 }
 0x5e0   :  { %v2435_v38 = vadd.f32 0.2548296, %v2432_v56  ;;  %v2433_v40 = vmul.f32 %v5862_v24, %v2430_v60 }
 0x5e1   :  { %v2440_v51 = vmul.f32 %v5858_v50, %v2437_v4 }
 0x5e2   :  { %v2438_v61 = vmul.f32 %v5860_v59, %v2435_v38  ;;  %v2436_v63 = vadd.f32 0.2548296, %v2433_v40 }
 0x5e3   :  { %v2455_v19 = vmul.f32 %v5864_v55, %v2440_v51 }
 0x5e4   :  { %v2453_v57 = vmul.f32 %v5866_v29, %v2438_v61  ;;  %v2439_v2 = vmul.f32 %v5862_v24, %v2436_v63 }
 0x5e5   :  { %v2458_v52 = vsub.f32 1.0, %v2455_v19 }
 0x5e6   :  { %v2456_v6 = vsub.f32 1.0, %v2453_v57  ;;  %v2454_v41 = vmul.f32 %v5868_v36, %v2439_v2 }
 0x5e7   :  { %v2464_v21 = vsub.f32 0.0, %v2458_v52 }
 0x5e8   :  { %v2462_v62 = vsub.f32 0.0, %v2456_v6  ;;  %v2457_v30 = vsub.f32 1.0, %v2454_v41 }
 0x5e9   :  { %v2467_v7 = vsel %vm2461_vm6, %v2458_v52, %v2464_v21 }
 0x5ea   :  { %v2470_v9 = vadd.f32 1.0, %v2467_v7  ;;  %v2465_v45 = vsel %vm2459_vm7, %v2456_v6, %v2462_v62  ;;  %v2463_v50 = vsub.f32 0.0, %v2457_v30 }
 0x5eb   :  { %v2468_v10 = vadd.f32 1.0, %v2465_v45 }
 0x5ec   :  { %v2473_v17 = vmul.f32 %v2470_v9, %v2395_v34  ;;  %v2466_v59 = vsel %vm2460_vm8, %v2457_v30, %v2463_v50 }
 0x5ed   :  { %v2471_v47 = vmul.f32 %v2468_v10, %v2393_v15  ;;  %v2469_v48 = vadd.f32 1.0, %v2466_v59 }
 0x5ee   :  { %v2511_v22 = vcombine.high %v2473_v17, %v2473_v17  ;;  %v2518_v24 = vrot.slane %v2473_v17, %v6982_v27 }
 0x5ef   :  { %v2477_v43 = vcombine.high %v2471_v47, %v2471_v47  ;;  %v2484_v3 = vrot.slane %v2471_v47, %v6982_v27  ;;  %v2472_v8 = vmul.f32 %v2469_v48, %v2394_v58 }
 0x5f0   :  { %v2525_v46 = vrot.slane %v2511_v22, %v6982_v27  ;;  %v2526_v44 = vcombine.high %v2518_v24, %v2518_v24  ;;  %v4904_v18 = vrot.slane %v2518_v24, 9 }
 0x5f1   :  { %v2491_v33 = vrot.slane %v2477_v43, %v6982_v27  ;;  %v2492_v53 = vcombine.high %v2484_v3, %v2484_v3  ;;  %v4896_v25 = vrot.slane %v2484_v3, 9  ;;  %v2494_v31 = vcombine.high %v2472_v8, %v2472_v8 }
 0x5f2   :  { %v2527_v14 = vcombine.high %v2525_v46, %v2525_v46  ;;  %v2501_v56 = vrot.slane %v2472_v8, %v6982_v27  ;;  %v4905_v4 = vrot.slane %v2526_v44, 9  ;;  %v4906_v38 = vrot.slane %v2525_v46, 9 }
 0x5f3   :  { %v2493_v26 = vcombine.high %v2491_v33, %v2491_v33  ;;  %v4897_v12 = vrot.slane %v2492_v53, 9  ;;  %v4898_v32 = vrot.slane %v2491_v33, 9  ;;  %v2576_v37 = vadd.f32 %v4896_v25, %v2484_v3 }
 0x5f4   :  { %v2508_v60 = vrot.slane %v2494_v31, %v6982_v27  ;;  %v2509_v40 = vcombine.high %v2501_v56, %v2501_v56  ;;  %v4900_v55 = vrot.slane %v2501_v56, 9  ;;  %v4907_v61 = vrot.slane %v2527_v14, 9 }
 0x5f5   :  { %v4899_v39 = vrot.slane %v2493_v26, 9  ;;  %v2577_v0 = vadd.f32 %v4897_v12, %v2492_v53  ;;  %v2578_v16 = vadd.f32 %v4898_v32, %v2491_v33  ;;  %v2588_v42 = vmul.f32 0.5, %v2576_v37 }
 0x5f6   :  { %v2510_v19 = vcombine.high %v2508_v60, %v2508_v60  ;;  %v4902_v63 = vrot.slane %v2508_v60, 9  ;;  %v2584_v57 = vadd.f32 %v4904_v18, %v2518_v24  ;;  %v4901_v2 = vrot.slane %v2509_v40, 9 }
 0x5f7   :  { %v2579_v5 = vadd.f32 %v4899_v39, %v2493_v26  ;;  %v2589_v20 = vmul.f32 0.5, %v2577_v0  ;;  %v2590_v49 = vmul.f32 0.5, %v2578_v16  ;;  %v2615_v54 = vrot.slane %v2588_v42, %v6978_v23 }
 0x5f8   :  { %v2580_v36 = vadd.f32 %v4900_v55, %v2501_v56  ;;  %v2585_v6 = vadd.f32 %v4905_v4, %v2526_v44  ;;  %v4903_v21 = vrot.slane %v2510_v19, 9  ;;  %v2582_v41 = vadd.f32 %v4902_v63, %v2508_v60  ;;  %v5763_v55 = vld [vmem:[#allocation17 + $0x10] sm:$0xff]  }
 0x5f9   :  { %v2591_v35 = vmul.f32 0.5, %v2579_v5  ;;  %v2619_v28 = vrot.slane %v2589_v20, %v6978_v23  ;;  %v2623_v13 = vrot.slane %v2590_v49, %v6978_v23  ;;  %v2586_v62 = vadd.f32 %v4906_v38, %v2525_v46  ;;  %v5761_v38 = vld [vmem:[#allocation17] sm:$0xff]  }
 0x5fa   :  { %v2581_v7 = vadd.f32 %v4901_v2, %v2509_v40  ;;  %v2592_v30 = vmul.f32 0.5, %v2580_v36  ;;  %v2587_v34 = vadd.f32 %v4907_v61, %v2527_v14  ;;  %v2583_v9 = vadd.f32 %v4903_v21, %v2510_v19  ;;  %v5762_v40 = vld [vmem:[#allocation17 + $0x8] sm:$0xff]   ;;  %v5764_v61 = vld [vmem:[#allocation17 + $0x18] sm:$0xff]  }
 0x5fb   :  { %v2660_v51 = vsel %vm1941_vm11, %v2619_v28, %v2615_v54  ;;  %v2627_v29 = vrot.slane %v2591_v35, %v6978_v23  ;;  %v2594_v45 = vmul.f32 0.5, %v2582_v41  ;;  %v2596_v10 = vmul.f32 0.5, %v2584_v57  ;;  %v5766_v41 = vld [vmem:[#allocation17 + $0x28] sm:$0xff]  }
 0x5fc   :  { %v2661_v52 = vsel %vm1943_vm12, %v2623_v13, %v2660_v51  ;;  %v2593_v50 = vmul.f32 0.5, %v2581_v7  ;;  %v2631_v17 = vrot.slane %v2592_v30, %v6978_v23  ;;  %v2597_v47 = vmul.f32 0.5, %v2585_v6 }
 0x5fd   :  { %v2662_v15 = vsel %vm1945_vm13, %v2627_v29, %v2661_v52  ;;  %v2595_v59 = vmul.f32 0.5, %v2583_v9  ;;  %v2598_v43 = vmul.f32 0.5, %v2586_v62  ;;  %v2599_v48 = vmul.f32 0.5, %v2587_v34  ;;  %v5765_v52 = vld [vmem:[#allocation17 + $0x20] sm:$0xff]   ;;  %v5767_v9 = vld [vmem:[#allocation17 + $0x30] sm:$0xff]  }
 0x5fe   :  { %v2635_v3 = vrot.slane %v2593_v50, %v6978_v23  ;;  %v2663_v22 = vsel %vm1947_vm14, %v2631_v17, %v2662_v15  ;;  %v2639_v33 = vrot.slane %v2594_v45, %v6978_v23  ;;  %v2647_v25 = vrot.slane %v2596_v10, %v6978_v23  ;;  %v5768_v50 = vld [vmem:[#allocation17 + $0x38] sm:$0xff]  }
 0x5ff   :  { %v2643_v53 = vrot.slane %v2595_v59, %v6978_v23  ;;  %v2651_v58 = vrot.slane %v2597_v47, %v6978_v23  ;;  %v2655_v12 = vrot.slane %v2598_v43, %v6978_v23  ;;  %v2659_v37 = vrot.slane %v2599_v48, %v6978_v23  ;;  %v5771_v59 = vld [vmem:[#allocation17 + $0x80] sm:$0xff]   ;;  %v5774_v48 = vld [vmem:[#allocation17 + $0x98] sm:$0xff]  }
 0x600   :  { %v2664_v24 = vsel %vm1949_vm15, %v2635_v3, %v2663_v22  ;;  %v5772_v3 = vld [vmem:[#allocation17 + $0x88] sm:$0xff]   ;;  %v5773_v22 = vld [vmem:[#allocation17 + $0x90] sm:$0xff]  }
 0x601   :  { %v2665_v26 = vsel %vm1941_vm11, %v2643_v53, %v2639_v33  ;;  %2672 = vst [vmem:[#allocation2 + $0x1] sm:$0x3f] %v2664_v24 }
 0x602   :  { %v2666_v32 = vsel %vm1943_vm12, %v2647_v25, %v2665_v26 }
 0x603   :  { %v2667_v46 = vsel %vm1945_vm13, %v2651_v58, %v2666_v32  ;;  %v5775_v58 = vld [vmem:[#allocation17 + $0xa0] sm:$0xff]  }
 0x604   :  { %v2668_v8 = vsel %vm1947_vm14, %v2655_v12, %v2667_v46  ;;  %v5776_v46 = vld [vmem:[#allocation17 + $0xa8] sm:$0xff]  }
 0x605   :  { %v2669_v39 = vsel %vm1949_vm15, %v2659_v37, %v2668_v8 }
 0x606   :  { %2673 = vst [vmem:[#allocation2 + $0x21] sm:$0x3f] %v2669_v39 }
 0x608   :  { %v2756_v0 = vld [vmem:[#allocation2 + $0x1] sm:$0x3f] }
 0x609   :  { %v2767_v16 = vrot.slane %v2756_v0, %v6982_v27  ;;  %v2760_v42 = vcombine.high %v2756_v0, %v2756_v0  ;;  %v2676_v29 = vld [vmem:[#allocation2] sm:$0x3f] }
 0x60a   :  { %v2680_v63 = vcombine.high %v2676_v29, %v2676_v29  ;;  %v2687_v57 = vrot.slane %v2676_v29, %v6982_v27  ;;  %v3015_v33 = vld [vmem:[#allocation2 + $0x2] sm:$0x3f] }
 0x60b   :  { %v2775_v44 = vcombine.high %v2767_v16, %v2767_v16  ;;  %v2774_v20 = vrot.slane %v2760_v42, %v6982_v27  ;;  %v3019_v25 = vcombine.high %v3015_v33, %v3015_v33  ;;  %v3026_v24 = vrot.slane %v3015_v33, %v6982_v27  ;;  %v5777_v42 = vld [vmem:[#allocation17 + $0xb0] sm:$0xff]  }
 0x60c   :  { %v2694_v6 = vrot.slane %v2680_v63, %v6982_v27  ;;  %v2695_v21 = vcombine.high %v2687_v57, %v2687_v57 }
 0x60d   :  { %v2757_v5 = vld [vmem:[#allocation2 + $0x21] sm:$0x3f]  ;;  %v2792_v18 = vcombine.low %v2767_v16, %v2775_v44  ;;  %v3033_v32 = vrot.slane %v3019_v25, %v6982_v27  ;;  %v3034_v37 = vcombine.high %v3026_v24, %v3026_v24 }
 0x60e   :  { %v2776_v49 = vcombine.high %v2757_v5, %v2757_v5  ;;  %v2783_v14 = vrot.slane %v2757_v5, %v6982_v27  ;;  %v2677_v19 = vld [vmem:[#allocation2 + $0x20] sm:$0x3f]  ;;  %v2712_v34 = vcombine.low %v2687_v57, %v2695_v21 }
 0x60f   :  { %v2800_v28 = vrot.slane %v2792_v18, %v6982_v27  ;;  %v2696_v2 = vcombine.high %v2677_v19, %v2677_v19  ;;  %v2703_v36 = vrot.slane %v2677_v19, %v6982_v27  ;;  %v3016_v53 = vld [vmem:[#allocation2 + $0x22] sm:$0x3f]  ;;  %v3051_v16 = vcombine.low %v3026_v24, %v3034_v37 }
 0x610   :  { %v2790_v54 = vrot.slane %v2776_v49, %v6982_v27  ;;  %v2791_v31 = vcombine.high %v2783_v14, %v2783_v14  ;;  %v2793_v35 = vcombine.low %v2774_v20, %v2783_v14  ;;  %v2720_v10 = vrot.slane %v2712_v34, %v6982_v27  ;;  %v5778_v49 = vld [vmem:[#allocation17 + $0xb8] sm:$0xff]  }
 0x611   :  { %v2710_v62 = vrot.slane %v2696_v2, %v6982_v27  ;;  %v2711_v7 = vcombine.high %v2703_v36, %v2703_v36  ;;  %v2713_v30 = vcombine.low %v2694_v6, %v2703_v36  ;;  %v3035_v26 = vcombine.high %v3016_v53, %v3016_v53 }
 0x612   :  { %v2807_v13 = vrot.slane %v2793_v35, %v6982_v27  ;;  %v2809_v56 = vcombine.low %v2791_v31, %v2790_v54  ;;  %v3042_v12 = vrot.slane %v3016_v53, %v6982_v27  ;;  %v3059_v20 = vrot.slane %v3051_v16, %v6982_v27  ;;  %v5781_v31 = vld [vmem:[%s7482_s19] sm:$0xff]   ;;  %v5782_v35 = vld [vmem:[%s7482_s19 + $0x8] sm:$0xff]  }
 0x613   :  { %v2727_v45 = vrot.slane %v2713_v30, %v6982_v27  ;;  %v2729_v15 = vcombine.low %v2711_v7, %v2710_v62  ;;  %v3049_v8 = vrot.slane %v3035_v26, %v6982_v27  ;;  %5442 = vmatpush3.bf16.msra.mxu0 %v5781_v31 }
 0x614   :  { %v2808_v4 = vcombine.low %v2800_v28, %v2807_v13  ;;  %v2816_v60 = vrot.slane %v2809_v56, %v6982_v27  ;;  %v3050_v39 = vcombine.high %v3042_v12, %v3042_v12  ;;  %v3052_v0 = vcombine.low %v3033_v32, %v3042_v12  ;;  %5443 = vmatprep.subr.bf16.mxu0 %v6409_v1  ;;  %v5783_v28 = vld [vmem:[%s7482_s19 + $0x10] sm:$0xff]   ;;  %v5784_v13 = vld [vmem:[%s7482_s19 + $0x18] sm:$0xff]   ;;  %v5785_v56 = vld [vmem:[%s7482_s19 + $0x20] sm:$0xff]  }
 0x615   :  { %v2728_v17 = vcombine.low %v2720_v10, %v2727_v45  ;;  %v2736_v47 = vrot.slane %v2729_v15, %v6982_v27 }
 0x616   :  { %v2819_v51 = vpack.c.bf16 %v2816_v60, %v2808_v4  ;;  %v3066_v44 = vrot.slane %v3052_v0, %v6982_v27  ;;  %v3068_v5 = vcombine.low %v3050_v39, %v3049_v8  ;;  %v5786_v4 = vld [vmem:[%s7482_s19 + $0x28] sm:$0xff]   ;;  %v5787_v60 = vld [vmem:[%s7482_s19 + $0x30] sm:$0xff]  }
 0x617   :  { %v2739_v43 = vpack.c.bf16 %v2736_v47, %v2728_v17  ;;  %5444 = vmatpush3.bf16.msra.mxu0 %v5782_v35 }
 0x618   :  { %5398 = vmatmul.mubr.bf16.vlgmr.msra.gmra.mrb[12].mxu1 %v2819_v51  ;;  %v3067_v14 = vcombine.low %v3059_v20, %v3066_v44  ;;  %v3075_v18 = vrot.slane %v3068_v5, %v6982_v27  ;;  %5445 = vmatprep.subr.bf16.mxu0 %v6409_v1  ;;  %v4932_v51 = vld [vmem:[#allocation18] ss:$0 sm:$0xff] }
 0x619   :  { %5402 = vmatpush3.bf16.msra.mxu1 %v5761_v38  ;;  %5417 = vmatprep.mubr.msk.bf16.mxu1 %vm6410_vm0, %v6409_v1  ;;  %v5788_v38 = vld [vmem:[%s7482_s19 + $0x38] sm:$0xff]  }
 0x61a   :  { %5403 = vmatprep.subr.bf16.mxu1 %v6409_v1  ;;  %v3078_v54 = vpack.c.bf16 %v3075_v18, %v3067_v14 }
 0x61b   :  { %5446 = vmatpush3.bf16.msra.mxu0 %v5783_v28 }
 0x61c   :  { %5447 = vmatprep.subr.bf16.mxu0 %v6409_v1 }
 0x61d   :  { %5404 = vmatpush3.bf16.msra.mxu1 %v5762_v40 }
 0x61e   :  { %5405 = vmatprep.subr.bf16.mxu1 %v6409_v1 }
 0x61f   :  { %5448 = vmatpush3.bf16.msra.mxu0 %v5784_v13 }
 0x620   :  { %5449 = vmatprep.subr.bf16.mxu0 %v6409_v1 }
 0x621   :  { %5406 = vmatpush3.bf16.msra.mxu1 %v5763_v55  ;;  %v4933_v55 = vld [vmem:[#allocation20] ss:$0 sm:$0xff] }
 0x622   :  { %5407 = vmatprep.subr.bf16.mxu1 %v6409_v1 }
 0x623   :  { %5450 = vmatpush3.bf16.msra.mxu0 %v5785_v56 }
 0x624   :  { %5451 = vmatprep.subr.bf16.mxu0 %v6409_v1 }
 0x625   :  { %5408 = vmatpush3.bf16.msra.mxu1 %v5764_v61 }
 0x626   :  { %5409 = vmatprep.subr.bf16.mxu1 %v6409_v1 }
 0x627   :  { %5452 = vmatpush3.bf16.msra.mxu0 %v5786_v4 }
 0x628   :  { %5453 = vmatprep.subr.bf16.mxu0 %v6409_v1 }
 0x629   :  { %5410 = vmatpush3.bf16.msra.mxu1 %v5765_v52 }
 0x62a   :  { %5411 = vmatprep.subr.bf16.mxu1 %v6409_v1 }
 0x62b   :  { %5454 = vmatpush3.bf16.msra.mxu0 %v5787_v60 }
 0x62c   :  { %5455 = vmatprep.subr.bf16.mxu0 %v6409_v1 }
 0x62d   :  { %5412 = vmatpush3.bf16.msra.mxu1 %v5766_v41 }
 0x62e   :  { %5413 = vmatprep.subr.bf16.mxu1 %v6409_v1 }
 0x62f   :  { %5456 = vmatpush3.bf16.msra.mxu0 %v5788_v38 }
 0x630   :  { %5493 = vmatprep.subr.bf16.mxu0 %v6409_v1 }
 0x631   :  { %5414 = vmatpush3.bf16.msra.mxu1 %v5767_v9 }
 0x632   :  { %5415 = vmatprep.subr.bf16.mxu1 %v6409_v1 }
 0x635   :  { %5416 = vmatpush3.bf16.msra.mxu1 %v5768_v50 }
 0x636   :  { %5421 = vmatprep.subr.bf16.mxu1 %v6409_v1 }
 0x638   :  { %5418 = vmatmul.mubr.bf16.vlgmr.msra.gmra.mrb[12].mxu1 %v2739_v43 }
 0x639   :  { %5422 = vmatpush3.bf16.msra.mxu1 %v5771_v59  ;;  %5437 = vmatprep.mubr.msk.bf16.mxu1 %vm6410_vm0, %v6409_v1 }
 0x63a   :  { %5423 = vmatprep.subr.bf16.mxu1 %v6409_v1 }
 0x63d   :  { %5424 = vmatpush3.bf16.msra.mxu1 %v5772_v3 }
 0x63e   :  { %5425 = vmatprep.subr.bf16.mxu1 %v6409_v1 }
 0x641   :  { %5426 = vmatpush3.bf16.msra.mxu1 %v5773_v22 }
 0x642   :  { %5427 = vmatprep.subr.bf16.mxu1 %v6409_v1 }
 0x645   :  { %5428 = vmatpush3.bf16.msra.mxu1 %v5774_v48 }
 0x646   :  { %5429 = vmatprep.subr.bf16.mxu1 %v6409_v1 }
 0x649   :  { %5430 = vmatpush3.bf16.msra.mxu1 %v5775_v58 }
 0x64a   :  { %5431 = vmatprep.subr.bf16.mxu1 %v6409_v1 }
 0x64d   :  { %5432 = vmatpush3.bf16.msra.mxu1 %v5776_v46 }
 0x64e   :  { %5433 = vmatprep.subr.bf16.mxu1 %v6409_v1 }
 0x651   :  { %5434 = vmatpush3.bf16.msra.mxu1 %v5777_v42 }
 0x652   :  { %5435 = vmatprep.subr.bf16.mxu1 %v6409_v1 }
 0x655   :  { %5436 = vmatpush3.bf16.msra.mxu1 %v5778_v49 }
 0x656   :  { %5461 = vmatprep.subr.bf16.mxu1 %v6409_v1 }
 0x658   :  { %5438 = vmatmul.mubr.bf16.vlgmr.msra.gmra.mrb[12].mxu1 %v3078_v54 }
 0x659   :  { %5465 = vmatprep.mubr.msk.bf16.mxu1 %vm6410_vm0, %v6409_v1 }
 0x72b   :  { %v3178_v40 = vpop.f32.mrb[12].mxu1 }
 0x72c   :  { %v3194_v61 = vmul.f32 %v4932_v51, %v3178_v40  ;;  %v5439_v29 = vpop.f32.mrb[13].mxu1 }
 0x72d   :  { %v3181_v19 = vpop.f32.mrb[14].mxu1 }
 0x72e   :  { %v3203_v63 = vadd.f32 %v4933_v55, %v3194_v61  ;;  %v3195_v57 = vmul.f32 %v4932_v51, %v3181_v19  ;;  %v5440_v52 = vpop.f32.mrb[15].mxu1 }
 0x730   :  { %v3207_v2 = vmul.f32 0.70710677, %v3203_v63  ;;  %v3204_v36 = vadd.f32 %v4933_v55, %v3195_v57  ;;  %v3205_v31 = vmul.f32 0.5, %v3203_v63 }
 0x732   :  { %v3209_v6 = vand.u32 2147483647, %v3207_v2  ;;  %v3208_v21 = vmul.f32 0.70710677, %v3204_v36  ;;  %vm3249_vm9 = vcmp.ge.f32.partialorder %v3207_v2, 0.0  ;;  %v3206_v4 = vmul.f32 0.5, %v3204_v36 }
 0x734   :  { %v3211_v41 = vmul.f32 0.3275911, %v3209_v6  ;;  %v3210_v62 = vand.u32 2147483647, %v3208_v21  ;;  %v3237_v9 = vsub.f32 0.0, %v3209_v6  ;;  %vm3250_vm10 = vcmp.ge.f32.partialorder %v3208_v21, 0.0 }
 0x736   :  { %v3213_v7 = vadd.f32 1.0, %v3211_v41  ;;  %v3212_v30 = vmul.f32 0.3275911, %v3210_v62  ;;  %v3238_v45 = vsub.f32 0.0, %v3210_v62  ;;  %v3239_v10 = vmul.f32 %v3237_v9, %v3209_v6 }
 0x738   :  { %5869 = vrcp.f32 %v3213_v7  ;;  %v3214_v34 = vadd.f32 1.0, %v3212_v30  ;;  %v3240_v59 = vmul.f32 %v3238_v45, %v3210_v62  ;;  %v3241_v43 = vmul.f32 1.442695, %v3239_v10 }
 0x73a   :  { %5871 = vrcp.f32 %v3214_v34  ;;  %v3243_v53 = vmul.f32 1.442695, %v3240_v59 }
 0x73b   :  { %5873 = vpow2.f32 %v3241_v43 }
 0x73c   :  { %5875 = vpow2.f32 %v3243_v53 }
 0x742   :  { %v5870_v15 = vpop.eup %5869 }
 0x743   :  { %v3219_v50 = vmul.f32 1.0614054, %v5870_v15 }
 0x744   :  { %v5872_v17 = vpop.eup %5871 }
 0x745   :  { %v3221_v47 = vadd.f32 -1.4531521, %v3219_v50  ;;  %v3220_v3 = vmul.f32 1.0614054, %v5872_v17  ;;  %v5874_v0 = vpop.eup %5873 }
 0x746   :  { %v5876_v5 = vpop.eup %5875 }
 0x747   :  { %v3223_v22 = vmul.f32 %v5870_v15, %v3221_v47  ;;  %v3222_v48 = vadd.f32 -1.4531521, %v3220_v3 }
 0x749   :  { %v3225_v33 = vadd.f32 1.4214138, %v3223_v22  ;;  %v3224_v25 = vmul.f32 %v5872_v17, %v3222_v48 }
 0x74b   :  { %v3227_v24 = vmul.f32 %v5870_v15, %v3225_v33  ;;  %v3226_v58 = vadd.f32 1.4214138, %v3224_v25 }
 0x74d   :  { %v3229_v26 = vadd.f32 -0.28449672, %v3227_v24  ;;  %v3228_v12 = vmul.f32 %v5872_v17, %v3226_v58 }
 0x74f   :  { %v3231_v32 = vmul.f32 %v5870_v15, %v3229_v26  ;;  %v3230_v37 = vadd.f32 -0.28449672, %v3228_v12 }
 0x751   :  { %v3233_v46 = vadd.f32 0.2548296, %v3231_v32  ;;  %v3232_v8 = vmul.f32 %v5872_v17, %v3230_v37 }
 0x753   :  { %v3235_v39 = vmul.f32 %v5870_v15, %v3233_v46  ;;  %v3234_v16 = vadd.f32 0.2548296, %v3232_v8 }
 0x755   :  { %v3245_v42 = vmul.f32 %v5874_v0, %v3235_v39  ;;  %v3236_v44 = vmul.f32 %v5872_v17, %v3234_v16 }
 0x757   :  { %v3247_v20 = vsub.f32 1.0, %v3245_v42  ;;  %v3246_v49 = vmul.f32 %v5876_v5, %v3236_v44 }
 0x759   :  { %v3251_v14 = vsub.f32 0.0, %v3247_v20  ;;  %v3248_v18 = vsub.f32 1.0, %v3246_v49 }
 0x75b   :  { %v3253_v54 = vsel %vm3249_vm9, %v3247_v20, %v3251_v14  ;;  %v3252_v28 = vsub.f32 0.0, %v3248_v18  ;;  %v6412_v20 = vmov 1966171168  }
 0x75c   :  { %v3255_v35 = vadd.f32 1.0, %v3253_v54  ;;  %v3466_v49 = vunpack.c.l.s4 %v6412_v20 }
 0x75d   :  { %v3254_v56 = vsel %vm3250_vm10, %v3248_v18, %v3252_v28  ;;  %v4940_v18 = vld [vmem:[#allocation21] ss:$0 sm:$0xff] }
 0x75e   :  { %v3257_v13 = vmul.f32 %v3255_v35, %v3205_v31  ;;  %v3256_v60 = vadd.f32 1.0, %v3254_v56  ;;  %v3467_v14 = vunpack.c.0.s8 %v3466_v49 }
 0x760   :  { %v3261_v38 = vcombine.high %v3257_v13, %v3257_v13  ;;  %v3268_v51 = vrot.slane %v3257_v13, %v6982_v27  ;;  %v3258_v40 = vmul.f32 %v3256_v60, %v3206_v4  ;;  %v7258_v54 = vsub.s32 %v3467_v14, %v6970_v11 }
 0x762   :  { %v3275_v55 = vrot.slane %v3261_v38, %v6982_v27  ;;  %v3276_v61 = vcombine.high %v3268_v51, %v3268_v51  ;;  %v4934_v29 = vrot.slane %v3268_v51, 9  ;;  %v3284_v19 = vrot.slane %v3258_v40, %v6982_v27 }
 0x764   :  { %v3277_v57 = vcombine.high %v3275_v55, %v3275_v55  ;;  %v4935_v52 = vrot.slane %v3276_v61, 9  ;;  %v4936_v63 = vrot.slane %v3275_v55, 9  ;;  %v3310_v2 = vadd.f32 %v4934_v29, %v3268_v51 }
 0x765   :  { %v3285_v6 = vcombine.high %v3284_v19, %v3284_v19  ;;  %v4938_v21 = vrot.slane %v3284_v19, 9 }
 0x766   :  { %v4937_v41 = vrot.slane %v3277_v57, 9  ;;  %v3311_v62 = vadd.f32 %v4935_v52, %v3276_v61  ;;  %v3312_v36 = vadd.f32 %v4936_v63, %v3275_v55  ;;  %v3316_v7 = vmul.f32 0.5, %v3310_v2 }
 0x767   :  { %v4939_v30 = vrot.slane %v3285_v6, 9  ;;  %v3314_v34 = vadd.f32 %v4938_v21, %v3284_v19 }
 0x768   :  { %v3313_v9 = vadd.f32 %v4937_v41, %v3277_v57  ;;  %v3317_v45 = vmul.f32 0.5, %v3311_v62  ;;  %v3318_v15 = vmul.f32 0.5, %v3312_v36  ;;  %v3322_v47 = vpack.c.bf16 %v3316_v7, %v3316_v7 }
 0x769   :  { %v3320_v10 = vmul.f32 0.5, %v3314_v34  ;;  %v3315_v50 = vadd.f32 %v4939_v30, %v3285_v6 }
 0x76a   :  { %v3319_v17 = vmul.f32 0.5, %v3313_v9  ;;  %v3323_v27 = vpack.c.bf16 %v3317_v45, %v3317_v45  ;;  %v3324_v59 = vpack.c.bf16 %v3318_v15, %v3318_v15  ;;  %v3357_v24 = vunpack.c.l.b16 %v3322_v47 }
 0x76b   :  { %v3326_v43 = vpack.c.bf16 %v3320_v10, %v3320_v10  ;;  %v3321_v3 = vmul.f32 0.5, %v3315_v50  ;;  %v4949_v50 = vld [vmem:[#allocation23] ss:$0 sm:$0xff] }
 0x76c   :  { %v3358_v22 = vunpack.c.l.b16 %v3323_v27  ;;  %v3359_v48 = vunpack.c.l.b16 %v3324_v59  ;;  %v3325_v33 = vpack.c.bf16 %v3319_v17, %v3319_v17 }
 0x76d   :  { %v3361_v53 = vunpack.c.l.b16 %v3326_v43  ;;  %v3327_v25 = vpack.c.bf16 %v3321_v3, %v3321_v3 }
 0x76e   :  { %v3363_v58 = vrot.slane %v3358_v22, 7  ;;  %v3365_v26 = vrot.slane %v3359_v48, 6  ;;  %v3360_v12 = vunpack.c.l.b16 %v3325_v33 }
 0x76f   :  { %v3362_v32 = vunpack.c.l.b16 %v3327_v25  ;;  %v3369_v39 = vrot.slane %v3361_v53, 4 }
 0x770   :  { %v3364_v37 = vsel %vm1941_vm11, %v3363_v58, %v3357_v24  ;;  %v3367_v46 = vrot.slane %v3360_v12, 5  ;;  %vm3543_vm11 = vcmask 130048   ;;  %v5789_v24 = vld [vmem:[%s7483_s21] sm:$0xff]   ;;  %v5790_v58 = vld [vmem:[%s7483_s21 + $0x8] sm:$0xff]  }
 0x771   :  { %v3366_v8 = vsel %vm1943_vm12, %v3365_v26, %v3364_v37  ;;  %v3371_v16 = vrot.slane %v3362_v32, 3  ;;  %vm3545_vm12 = vcmask 261120   ;;  %5462 = vmatpush3.bf16.msra.mxu1 %v5789_v24 }
 0x772   :  { %v3368_v0 = vsel %vm1945_vm13, %v3367_v46, %v3366_v8  ;;  %vm3547_vm13 = vcmask 392192   ;;  %5463 = vmatprep.subr.bf16.mxu1 %v6409_v1 }
 0x773   :  { %v3370_v42 = vsel %vm1947_vm14, %v3369_v39, %v3368_v0  ;;  %vm3873_vm14 = vcmask 1040384  }
 0x774   :  { %v3372_v44 = vsel %vm1949_vm15, %v3371_v16, %v3370_v42  ;;  %vm3876_vm15 = vcmask 1041408  }
 0x775   :  { %v3373_v5 = vpack.c.b16 %v3372_v44, %v3372_v44  ;;  %5464 = vmatpush3.bf16.msra.mxu1 %v5790_v58 }
 0x776   :  { %5469 = vmatprep.subr.bf16.mxu1 %v6409_v1 }
 0x777   :  { %5458 = vmatmul.mubr.bf16.vlgmr.msra.gmra.mrb[16].mxu0 %v3373_v5 }
 0x778   :  { %5497 = vmatprep.mubr.msk.bf16.mxu0 %vm6410_vm0, %v6409_v1 }
 0x84a   :  { %v3457_v31 = vpop.f32.mrb[16].mxu0 }
 0x84b   :  { %v3458_v35 = vadd.f32 %v4940_v18, %v3457_v31  ;;  %v5459_v28 = vpop.f32.mrb[17].mxu0 }
 0x84c   :  { %v3460_v13 = vpop.f32.mrb[18].mxu0 }
 0x84d   :  { %v3464_v56 = vcombine.high %v3458_v35, %v3458_v35  ;;  %v3471_v4 = vrot.slane %v3458_v35, %v7258_v54  ;;  %v5460_v60 = vpop.f32.mrb[19].mxu0 }
 0x84f   :  { %v3478_v38 = vrot.slane %v3464_v56, %v7258_v54  ;;  %v3479_v51 = vcombine.high %v3471_v4, %v3471_v4  ;;  %v3487_v40 = vrot.slane %v3471_v4, %v7258_v54 }
 0x851   :  { %v3480_v55 = vcombine.high %v3478_v38, %v3478_v38  ;;  %v3501_v61 = vrot.slane %v3479_v51, %v7258_v54  ;;  %v3509_v11 = vcombine.high %v3487_v40, %v3487_v40  ;;  %v3494_v6 = vrot.slane %v3478_v38, %v7258_v54 }
 0x853   :  { %v3508_v29 = vrot.slane %v3480_v55, %v7258_v54  ;;  %v3510_v19 = vcombine.high %v3501_v61, %v3501_v61  ;;  %v3549_v9 = vcombine.low %v3501_v61, %v3494_v6 }
 0x855   :  { %v3511_v57 = vcombine.low %v3487_v40, %v3510_v19  ;;  %v3527_v52 = vcombine.low %v3509_v11, %v3508_v29  ;;  %v3556_v17 = vrot.slane %v3549_v9, %v7258_v54 }
 0x857   :  { %v3518_v63 = vrot.slane %v3511_v57, %v7258_v54  ;;  %v3534_v2 = vrot.slane %v3527_v52, %v7258_v54  ;;  %v3563_v47 = vrot.slane %v3556_v17, %v7258_v54 }
 0x859   :  { %v3525_v21 = vrot.slane %v3518_v63, %v7258_v54  ;;  %v3541_v41 = vrot.slane %v3534_v2, %v7258_v54 }
 0x85b   :  { %3571 = vrot.lane.b32.xlu0 %v3525_v21, %s6392_s29  ;;  %v3544_v62 = vsel %vm3543_vm11, %v3525_v21, %v3541_v41  ;;  %v3568_v36 = vsel %vm3543_vm11, %v3541_v41, %v3525_v21 }
 0x85c   :  { %v3546_v7 = vsel %vm3545_vm12, %v3544_v62, %v3525_v21  ;;  %v3569_v30 = vsel %vm3545_vm12, %v3568_v36, %v3541_v41 }
 0x85d   :  { %v3548_v34 = vsel %vm3547_vm13, %v3546_v7, %v3541_v41  ;;  %v7277_v45 = vsel %vm3547_vm13, %v3569_v30, %v3525_v21 }
 0x85e   :  { %v3589_v15 = vsub.f32 0.0, %v3548_v34 }
 0x85f   :  { %3574 = vrot.lane.b32.xlu0 %v3541_v41, %s6392_s29 }
 0x860   :  { %v3590_v10 = vmul.f32 1.442695, %v3589_v15 }
 0x862   :  { %5877 = vpow2.f32 %v3590_v10 }
 0x863   :  { %3679 = vrot.lane.b32.xlu0 %v4949_v50, %s6392_s29 }
 0x867   :  { %3578 = vrot.lane.b32.xlu0 %v3563_v47, %s6392_s29 }
 0x86c   :  { %v5878_v27 = vpop.eup %5877 }
 0x86d   :  { %v3592_v59 = vadd.f32 1.0, %v5878_v27 }
 0x86f   :  { %5879 = vrcp.f32 %v3592_v59 }
 0x879   :  { %v5880_v43 = vpop.eup %5879 }
 0x87a   :  { %v3602_v3 = vmul.f32 %v5880_v43, %v4949_v50  ;;  %v3605_v12 = vsub.f32 1.0, %v5880_v43  ;;  %v3611_v37 = vmul.f32 0.0, %v5880_v43  ;;  %v5791_v43 = vld [vmem:[%s7484_s10] sm:$0xff]  }
 0x8cd   :  { %v3572_v22 = vpop.permute.xlu0 %3571 }
 0x8d1   :  { %v3575_v48 = vpop.permute.xlu0 %3574 }
 0x8d2   :  { %v3577_v33 = vsel %vm3543_vm11, %v3572_v22, %v3575_v48  ;;  %v7286_v53 = vsel %vm3543_vm11, %v3575_v48, %v3572_v22 }
 0x8d3   :  { %v3603_v25 = vadd.f32 %v3602_v3, %v3577_v33  ;;  %v5792_v3 = vld [vmem:[%s7484_s10 + $0x8] sm:$0xff]  }
 0x8d5   :  { %5881 = vtanh.f32 %v3603_v25  ;;  %v3680_v16 = vpop.permute.xlu0 %3679 }
 0x8d9   :  { %v3579_v60 = vpop.permute.xlu0 %3578 }
 0x8df   :  { %v5882_v26 = vpop.eup %5881 }
 0x8e0   :  { %3607 = vrot.lane.b32.xlu1 %v5882_v26, %s6413_s1 }
 0x952   :  { %v3608_v32 = vpop.permute.xlu1 %3607 }
 0x953   :  { %v3610_v46 = vmul.f32 %v3608_v32, %v3605_v12 }
 0x955   :  { %v3612_v8 = vadd.f32 %v3611_v37, %v3610_v46 }
 0x957   :  { %v3613_v39 = vpack.c.bf16 %v3612_v8, %v3612_v8 }
 0x959   :  { %3615 = vrot.lane.b32.xlu1 %v3613_v39, %s6414_s24 }
 0x9cb   :  { %v3616_v0 = vpop.permute.xlu1 %3615 }
 0x9cc   :  { %5466 = vmatmul.mubr.msk.bf16.vlgmr.msra.gmra.mrb[16].mxu1 %vm3545_vm12, %v3616_v0 }
 0x9cd   :  { %5470 = vmatpush3.bf16.msra.mxu1 %v5789_v24  ;;  %5473 = vmatprep.mubr.msk.bf16.mxu1 %vm6410_vm0, %v6409_v1 }
 0x9ce   :  { %5471 = vmatprep.subr.bf16.mxu1 %v6409_v1 }
 0x9d1   :  { %5472 = vmatpush3.bf16.msra.mxu1 %v5790_v58 }
 0x9d2   :  { %5477 = vmatprep.subr.bf16.mxu1 %v6409_v1 }
 0xa9f   :  { %v3666_v42 = vpop.f32.mrb[16].mxu1 }
 0xaa0   :  { %v5467_v44 = vpop.f32.mrb[17].mxu1  ;;  %v3682_v5 = vadd.f32 %v3680_v16, %v3666_v42  ;;  %v3672_v14 = vadd.f32 %v3666_v42, %v3563_v47 }
 0xaa1   :  { %v3669_v20 = vpop.f32.mrb[18].mxu1 }
 0xaa2   :  { %3684 = vrot.lane.b32.xlu1 %v3682_v5, %s6392_s29  ;;  %v5468_v49 = vpop.f32.mrb[19].mxu1  ;;  %v3673_v18 = vsub.f32 0.0, %v3672_v14 }
 0xaa4   :  { %v3674_v31 = vmul.f32 1.442695, %v3673_v18 }
 0xaa6   :  { %5883 = vpow2.f32 %v3674_v31 }
 0xab0   :  { %v5884_v35 = vpop.eup %5883 }
 0xab1   :  { %v3676_v28 = vadd.f32 1.0, %v5884_v35 }
 0xab3   :  { %5885 = vrcp.f32 %v3676_v28 }
 0xabd   :  { %v5886_v13 = vpop.eup %5885 }
 0xabe   :  { %v3690_v40 = vsub.f32 1.0, %v5886_v13  ;;  %v3696_v61 = vmul.f32 %v5886_v13, %v3612_v8 }
 0xb14   :  { %v3685_v56 = vpop.permute.xlu1 %3684 }
 0xb15   :  { %v3687_v4 = vmul.f32 %v5886_v13, %v3685_v56 }
 0xb17   :  { %v3688_v38 = vadd.f32 %v3687_v4, %v3579_v60 }
 0xb19   :  { %5887 = vtanh.f32 %v3688_v38 }
 0xb23   :  { %v5888_v51 = vpop.eup %5887 }
 0xb24   :  { %3692 = vrot.lane.b32.xlu1 %v5888_v51, %s6413_s1 }
 0xb96   :  { %v3693_v55 = vpop.permute.xlu1 %3692 }
 0xb97   :  { %v3695_v29 = vmul.f32 %v3693_v55, %v3690_v40 }
 0xb99   :  { %v3697_v11 = vadd.f32 %v3696_v61, %v3695_v29 }
 0xb9b   :  { %v3698_v19 = vpack.c.bf16 %v3697_v11, %v3697_v11 }
 0xb9d   :  { %3700 = vrot.lane.b32.xlu0 %v3698_v19, %s6414_s24 }
 0xc0f   :  { %v3701_v57 = vpop.permute.xlu0 %3700 }
 0xc10   :  { %5474 = vmatmul.mubr.msk.bf16.vlgmr.msra.gmra.mrb[20].mxu1 %vm3545_vm12, %v3701_v57 }
 0xc11   :  { %5481 = vmatprep.mubr.msk.bf16.mxu1 %vm6410_vm0, %v6409_v1  ;;  %5478 = vmatpush3.bf16.msra.mxu1 %v5791_v43 }
 0xc12   :  { %5479 = vmatprep.subr.bf16.mxu1 %v6409_v1 }
 0xc15   :  { %5480 = vmatpush3.bf16.msra.mxu1 %v5792_v3 }
 0xc16   :  { %5485 = vmatprep.subr.bf16.mxu1 %v6409_v1 }
 0xce3   :  { %v3739_v52 = vpop.f32.mrb[20].mxu1 }
 0xce4   :  { %v3745_v63 = vadd.f32 %v3739_v52, %v7277_v45  ;;  %v5475_v2 = vpop.f32.mrb[21].mxu1  ;;  %v3752_v6 = vadd.f32 %v3739_v52, %v3680_v16 }
 0xce5   :  { %v3742_v21 = vpop.f32.mrb[22].mxu1 }
 0xce6   :  { %3754 = vrot.lane.b32.xlu1 %v3752_v6, %s6392_s29  ;;  %v5476_v41 = vpop.f32.mrb[23].mxu1  ;;  %v3746_v62 = vsub.f32 0.0, %v3745_v63 }
 0xce8   :  { %v3747_v36 = vmul.f32 1.442695, %v3746_v62  ;;  %v4954_v62 = vld [vmem:[#allocation24] ss:$0 sm:$0xff] }
 0xcea   :  { %3769 = vrot.lane.b32.xlu1 %v3612_v8, %s6414_s24  ;;  %5889 = vpow2.f32 %v3747_v36 }
 0xcee   :  { %3778 = vrot.lane.b32.xlu1 %v3697_v11, %s6414_s24 }
 0xcf4   :  { %v5890_v7 = vpop.eup %5889 }
 0xcf5   :  { %v3749_v30 = vadd.f32 1.0, %v5890_v7 }
 0xcf7   :  { %5891 = vrcp.f32 %v3749_v30 }
 0xd01   :  { %v5892_v34 = vpop.eup %5891 }
 0xd02   :  { %v3760_v50 = vsub.f32 1.0, %v5892_v34  ;;  %v3766_v47 = vmul.f32 %v5892_v34, %v3697_v11 }
 0xd58   :  { %v3755_v9 = vpop.permute.xlu1 %3754 }
 0xd59   :  { %v3757_v45 = vmul.f32 %v5892_v34, %v3755_v9 }
 0xd5b   :  { %v3758_v15 = vadd.f32 %v3757_v45, %v7286_v53 }
 0xd5c   :  { %v3770_v22 = vpop.permute.xlu1 %3769 }
 0xd5d   :  { %5893 = vtanh.f32 %v3758_v15 }
 0xd60   :  { %v3779_v48 = vpop.permute.xlu1 %3778 }
 0xd61   :  { %v3814_v33 = vrot.slane %v3779_v48, %v7258_v54 }
 0xd63   :  { %v3815_v53 = vcombine.high %v3814_v33, %v3814_v33  ;;  %v3822_v25 = vrot.slane %v3814_v33, %v7258_v54 }
 0xd65   :  { %v3829_v58 = vrot.slane %v3815_v53, %v7258_v54  ;;  %v3856_v46 = vrot.slane %v3822_v25, %v6978_v23 }
 0xd67   :  { %v5894_v10 = vpop.eup %5893  ;;  %v3860_v42 = vrot.slane %v3829_v58, %v6978_v23 }
 0xd68   :  { %3762 = vrot.lane.b32.xlu0 %v5894_v10, %s6413_s1 }
 0xdda   :  { %v3763_v17 = vpop.permute.xlu0 %3762 }
 0xddb   :  { %v3765_v27 = vmul.f32 %v3763_v17, %v3760_v50 }
 0xddd   :  { %v3767_v59 = vadd.f32 %v3766_v47, %v3765_v27 }
 0xddf   :  { %3773 = vrot.lane.b32.xlu0 %v3767_v59, %s6414_s24 }
 0xe51   :  { %v3774_v24 = vpop.permute.xlu0 %3773 }
 0xe52   :  { %v3776_v26 = vsel %vm3543_vm11, %v3770_v22, %v3774_v24  ;;  %v3781_v12 = vsel %vm3543_vm11, %v3774_v24, %v3770_v22 }
 0xe53   :  { %v3789_v32 = vrot.slane %v3776_v26, %v7258_v54  ;;  %v3837_v37 = vrot.slane %v3781_v12, %v7258_v54 }
 0xe55   :  { %v3790_v8 = vcombine.high %v3789_v32, %v3789_v32  ;;  %v3797_v39 = vrot.slane %v3789_v32, %v7258_v54  ;;  %v3838_v0 = vcombine.high %v3837_v37, %v3837_v37  ;;  %v3845_v16 = vrot.slane %v3837_v37, %v7258_v54 }
 0xe57   :  { %v3804_v44 = vrot.slane %v3790_v8, %v7258_v54  ;;  %v3852_v5 = vrot.slane %v3838_v0, %v7258_v54  ;;  %v3866_v20 = vrot.slane %v3845_v16, %v6978_v23  ;;  %v3874_v49 = vsel %vm3873_vm14, %v3797_v39, %v3856_v46 }
 0xe59   :  { %v3870_v14 = vrot.slane %v3852_v5, %v6978_v23  ;;  %v3875_v18 = vsel %vm3873_vm14, %v3804_v44, %v3860_v42  ;;  %v3877_v31 = vsel %vm3876_vm15, %v3874_v49, %v3866_v20  ;;  %v4958_v20 = vld [vmem:[#allocation26] ss:$0 sm:$0xff] }
 0xe5a   :  { %v3887_v35 = vrot.slane %v3877_v31, %v7258_v54 }
 0xe5b   :  { %v3878_v28 = vsel %vm3876_vm15, %v3875_v18, %v3870_v14 }
 0xe5c   :  { %v3888_v13 = vcombine.high %v3887_v35, %v3887_v35  ;;  %v3895_v56 = vrot.slane %v3887_v35, %v7258_v54  ;;  %v3910_v4 = vrot.slane %v3878_v28, %v7258_v54  ;;  %v5793_v28 = vld [vmem:[%s7485_s4] sm:$0xff]  }
 0xe5d   :  { %5494 = vmatpush3.bf16.msra.mxu0 %v5793_v28 }
 0xe5e   :  { %v3902_v60 = vrot.slane %v3888_v13, %v7258_v54  ;;  %v3903_v38 = vcombine.high %v3895_v56, %v3895_v56  ;;  %v3911_v51 = vcombine.high %v3910_v4, %v3910_v4  ;;  %v3918_v40 = vrot.slane %v3910_v4, %v7258_v54  ;;  %v5794_v13 = vld [vmem:[%s7485_s4 + $0x8] sm:$0xff]   ;;  %5495 = vmatprep.subr.bf16.mxu0 %v6409_v1 }
 0xe60   :  { %v3925_v23 = vrot.slane %v3911_v51, %v7258_v54  ;;  %v3926_v55 = vcombine.high %v3918_v40, %v3918_v40  ;;  %v3927_v61 = vcombine.low %v3895_v56, %v3902_v60  ;;  %v3928_v29 = vcombine.low %v3903_v38, %v3918_v40 }
 0xe61   :  { %5496 = vmatpush3.bf16.msra.mxu0 %v5794_v13 }
 0xe62   :  { %v3936_v11 = vrot.slane %v3927_v61, %v7258_v54  ;;  %v3929_v19 = vcombine.low %v3925_v23, %v3926_v55  ;;  %v3943_v57 = vrot.slane %v3928_v29, %v7258_v54  ;;  %5509 = vmatprep.subr.bf16.mxu0 %v6409_v1 }
 0xe64   :  { %v3950_v52 = vrot.slane %v3929_v19, %v7258_v54  ;;  %v3951_v63 = vcombine.low %v3936_v11, %v3943_v57 }
 0xe66   :  { %v3958_v2 = vrot.slane %v3951_v63, %v7258_v54  ;;  %v3965_v6 = vrot.slane %v3950_v52, %v7258_v54 }
 0xe68   :  { %v3966_v21 = vcombine.low %v3958_v2, %v3965_v6 }
 0xe6a   :  { %v3968_v41 = vpack.c.bf16 %v3966_v21, %v3966_v21 }
 0xe6c   :  { %5482 = vmatmul.mubr.msk.bf16.vlgmr.msra.gmra.mrb[24].mxu1 %vm3545_vm12, %v3968_v41 }
 0xe6d   :  { %5489 = vmatprep.mubr.msk.bf16.mxu1 %vm6410_vm0, %v6409_v1  ;;  %5486 = vmatpush3.bf16.msra.mxu1 %v5793_v28 }
 0xe6e   :  { %5487 = vmatprep.subr.bf16.mxu1 %v6409_v1 }
 0xe71   :  { %5488 = vmatpush3.bf16.msra.mxu1 %v5794_v13 }
 0xe72   :  { %5501 = vmatprep.subr.bf16.mxu1 %v6409_v1 }
 0xf3f   :  { %v4029_v36 = vpop.f32.mrb[24].mxu1 }
 0xf40   :  { %v4030_v7 = vadd.f32 %v4954_v62, %v4029_v36  ;;  %v5483_v30 = vpop.f32.mrb[25].mxu1 }
 0xf41   :  { %v4032_v34 = vpop.f32.mrb[26].mxu1 }
 0xf42   :  { %v4036_v9 = vcombine.high %v4030_v7, %v4030_v7  ;;  %v4043_v45 = vrot.slane %v4030_v7, %v7258_v54  ;;  %v5484_v15 = vpop.f32.mrb[27].mxu1 }
 0xf44   :  { %v4050_v10 = vrot.slane %v4036_v9, %v7258_v54  ;;  %v4051_v50 = vcombine.high %v4043_v45, %v4043_v45  ;;  %v4059_v17 = vrot.slane %v4043_v45, %v7258_v54 }
 0xf46   :  { %v4052_v47 = vcombine.high %v4050_v10, %v4050_v10  ;;  %v4066_v27 = vrot.slane %v4050_v10, %v7258_v54  ;;  %v4073_v59 = vrot.slane %v4051_v50, %v7258_v54  ;;  %v4081_v3 = vcombine.high %v4059_v17, %v4059_v17 }
 0xf48   :  { %v4080_v43 = vrot.slane %v4052_v47, %v7258_v54  ;;  %v4082_v22 = vcombine.high %v4073_v59, %v4073_v59  ;;  %v4118_v48 = vcombine.low %v4073_v59, %v4066_v27 }
 0xf4a   :  { %v4083_v33 = vcombine.low %v4059_v17, %v4082_v22  ;;  %v4099_v53 = vcombine.low %v4081_v3, %v4080_v43  ;;  %v4125_v4 = vrot.slane %v4118_v48, %v7258_v54 }
 0xf4c   :  { %v4090_v25 = vrot.slane %v4083_v33, %v7258_v54  ;;  %v4106_v24 = vrot.slane %v4099_v53, %v7258_v54  ;;  %v4132_v60 = vrot.slane %v4125_v4, %v7258_v54 }
 0xf4e   :  { %v4097_v58 = vrot.slane %v4090_v25, %v7258_v54  ;;  %v4113_v26 = vrot.slane %v4106_v24, %v7258_v54  ;;  %v5795_v25 = vld [vmem:[#allocation27] sm:$0xff]   ;;  %v5796_v24 = vld [vmem:[#allocation27 + $0x8] ss:$0 sps:$4 sm:$0xff]  }
 0xf50   :  { %4140 = vrot.lane.b32.xlu0 %v4097_v58, %s6392_s29  ;;  %4143 = vrot.lane.b32.xlu1 %v4113_v26, %s6392_s29  ;;  %v4115_v12 = vsel %vm3543_vm11, %v4097_v58, %v4113_v26  ;;  %v4137_v32 = vsel %vm3543_vm11, %v4113_v26, %v4097_v58 }
 0xf51   :  { %v4116_v37 = vsel %vm3545_vm12, %v4115_v12, %v4097_v58  ;;  %v4138_v46 = vsel %vm3545_vm12, %v4137_v32, %v4113_v26 }
 0xf52   :  { %v4117_v8 = vsel %vm3547_vm13, %v4116_v37, %v4113_v26  ;;  %v7365_v39 = vsel %vm3547_vm13, %v4138_v46, %v4097_v58  ;;  %v4422_v58 = vld [vmem:[%s7486_s28] sm:$0x3]  ;;  %v4442_v26 = vsel %vm4440_vm1, %v5796_v24, 0 }
 0xf53   :  { %v4158_v0 = vsub.f32 0.0, %v4117_v8  ;;  %v4423_v12 = vpack.c.bf16 %v4422_v58, %v4422_v58 }
 0xf55   :  { %v4159_v16 = vmul.f32 1.442695, %v4158_v0 }
 0xf57   :  { %5895 = vpow2.f32 %v4159_v16 }
 0xf61   :  { %v5896_v42 = vpop.eup %5895 }
 0xf62   :  { %v4161_v44 = vadd.f32 1.0, %v5896_v42 }
 0xf64   :  { %5897 = vrcp.f32 %v4161_v44 }
 0xf6e   :  { %v5898_v5 = vpop.eup %5897 }
 0xf6f   :  { %v4171_v18 = vmul.f32 %v5898_v5, %v4958_v20  ;;  %v4174_v38 = vsub.f32 1.0, %v5898_v5  ;;  %v4180_v40 = vmul.f32 0.0, %v5898_v5  ;;  %v5797_v5 = vld [vmem:[%s7487_s30] sm:$0xff]  }
 0xfc2   :  { %v7367_v49 = vpop.permute.xlu0 %4140  ;;  %v7369_v14 = vpop.permute.xlu1 %4143 }
 0xfc3   :  { %v4146_v31 = vsel %vm3543_vm11, %v7367_v49, %v7369_v14  ;;  %v4151_v42 = vsel %vm3543_vm11, %v7369_v14, %v7367_v49 }
 0xfc4   :  { %v4172_v35 = vadd.f32 %v4171_v18, %v4146_v31  ;;  %v5798_v18 = vld [vmem:[%s7487_s30 + $0x8] sm:$0xff]  }
 0xfc6   :  { %5899 = vtanh.f32 %v4172_v35 }
 0xfd0   :  { %v5900_v56 = vpop.eup %5899 }
 0xfd1   :  { %4176 = vrot.lane.b32.xlu0 %v5900_v56, %s6413_s1 }
 0xfd5   :  { %4248 = vrot.lane.b32.xlu0 %v4958_v20, %s6392_s29 }
 0xfd9   :  { %4147 = vrot.lane.b32.xlu0 %v4132_v60, %s6392_s29 }
0x1043   :  { %v4177_v51 = vpop.permute.xlu0 %4176 }
0x1044   :  { %v4179_v23 = vmul.f32 %v4177_v51, %v4174_v38 }
0x1046   :  { %v7385_v55 = vadd.f32 %v4180_v40, %v4179_v23 }
0x1047   :  { %v4249_v54 = vpop.permute.xlu0 %4248 }
0x1048   :  { %v4182_v61 = vpack.c.bf16 %v7385_v55, %v7385_v55 }
0x104a   :  { %4184 = vrot.lane.b32.xlu1 %v4182_v61, %s6414_s24 }
0x104b   :  { %v4148_v34 = vpop.permute.xlu0 %4147 }
0x10bc   :  { %v4185_v29 = vpop.permute.xlu1 %4184 }
0x10bd   :  { %5490 = vmatmul.mubr.msk.bf16.vlgmr.msra.gmra.mrb[28].mxu1 %vm3545_vm12, %v4185_v29 }
0x10be   :  { %5505 = vmatprep.mubr.msk.bf16.mxu1 %vm6410_vm0, %v6409_v1  ;;  %5502 = vmatpush3.bf16.msra.mxu1 %v5797_v5 }
0x10bf   :  { %5503 = vmatprep.subr.bf16.mxu1 %v6409_v1 }
0x10c2   :  { %5504 = vmatpush3.bf16.msra.mxu1 %v5798_v18 }
0x10c3   :  { %5517 = vmatprep.subr.bf16.mxu1 %v6409_v1 }
0x1190   :  { %v4235_v11 = vpop.f32.mrb[28].mxu1 }
0x1191   :  { %v5491_v19 = vpop.f32.mrb[29].mxu1  ;;  %v4251_v57 = vadd.f32 %v4249_v54, %v4235_v11  ;;  %v4241_v2 = vadd.f32 %v4235_v11, %v4132_v60 }
0x1192   :  { %v4238_v52 = vpop.f32.mrb[30].mxu1 }
0x1193   :  { %4253 = vrot.lane.b32.xlu1 %v4251_v57, %s6392_s29  ;;  %v5492_v63 = vpop.f32.mrb[31].mxu1  ;;  %v4242_v6 = vsub.f32 0.0, %v4241_v2 }
0x1195   :  { %v4243_v21 = vmul.f32 1.442695, %v4242_v6  ;;  %v5805_v6 = vld [vmem:[%s7489_s2] sm:$0xff]  }
0x1197   :  { %5901 = vpow2.f32 %v4243_v21  ;;  %v5806_v21 = vld [vmem:[%s7489_s2 + $0x8] sm:$0xff]  }
0x11a1   :  { %v5902_v41 = vpop.eup %5901 }
0x11a2   :  { %v4245_v62 = vadd.f32 1.0, %v5902_v41  ;;  %v5807_v41 = vld [vmem:[%s7489_s2 + $0x10] sm:$0xff]  }
0x11a4   :  { %5903 = vrcp.f32 %v4245_v62  ;;  %v5808_v62 = vld [vmem:[%s7489_s2 + $0x18] sm:$0xff]  }
0x11ae   :  { %v5904_v36 = vpop.eup %5903 }
0x11af   :  { %v4259_v15 = vsub.f32 1.0, %v5904_v36  ;;  %v4265_v50 = vmul.f32 %v5904_v36, %v7385_v55 }
0x1205   :  { %v4254_v7 = vpop.permute.xlu1 %4253 }
0x1206   :  { %v4256_v30 = vmul.f32 %v5904_v36, %v4254_v7  ;;  %v4966_v36 = vld [vmem:[#allocation29] ss:$0 sm:$0xff] }
0x1208   :  { %v4257_v9 = vadd.f32 %v4256_v30, %v4148_v34  ;;  %v4967_v30 = vld [vmem:[#allocation30] ss:$0 sm:$0xff] }
0x120a   :  { %5905 = vtanh.f32 %v4257_v9 }
0x1214   :  { %v5906_v45 = vpop.eup %5905 }
0x1215   :  { %4261 = vrot.lane.b32.xlu1 %v5906_v45, %s6413_s1 }
0x1287   :  { %v4262_v10 = vpop.permute.xlu1 %4261 }
0x1288   :  { %v4264_v17 = vmul.f32 %v4262_v10, %v4259_v15  ;;  %v4985_v15 = vld [vmem:[%s6573_s9] ss:$0 sm:$0xff] }
0x128a   :  { %v4266_v47 = vadd.f32 %v4265_v50, %v4264_v17 }
0x128c   :  { %v4267_v27 = vpack.c.bf16 %v4266_v47, %v4266_v47 }
0x128e   :  { %4269 = vrot.lane.b32.xlu0 %v4267_v27, %s6414_s24 }
0x1300   :  { %v4270_v59 = vpop.permute.xlu0 %4269 }
0x1301   :  { %5498 = vmatmul.mubr.msk.bf16.vlgmr.msra.gmra.mrb[20].mxu0 %vm3545_vm12, %v4270_v59 }
0x1302   :  { %5513 = vmatprep.mubr.msk.bf16.mxu0 %vm6410_vm0, %v6409_v1  ;;  %5510 = vmatpush3.bf16.msra.mxu0 %v5795_v25 }
0x1303   :  { %5511 = vmatprep.subr.bf16.mxu0 %v6409_v1 }
0x1306   :  { %5512 = vmatpush3.bf16.msra.mxu0 %v4442_v26  ;;  %v4986_v26 = vld [vmem:[%s6578_s6] ss:$0 sm:$0xff] }
0x1307   :  { %5533 = vmatprep.subr.bf16.mxu0 %v6409_v1 }
0x1309   :  { %5514 = vmatmul.mubr.msk.bf16.vlgmr.msra.gmra.mrb[24].mxu0 %vm4436_vm2, %v4423_v12 }
0x130a   :  { %5541 = vmatprep.mubr.msk.bf16.mxu0 %vm6410_vm0, %v6409_v1  ;;  %5534 = vmatpush3.bf16.msra.mxu0 %v5805_v6 }
0x130b   :  { %5535 = vmatprep.subr.bf16.mxu0 %v6409_v1 }
0x130e   :  { %5536 = vmatpush3.bf16.msra.mxu0 %v5806_v21 }
0x130f   :  { %5537 = vmatprep.subr.bf16.mxu0 %v6409_v1 }
0x1312   :  { %5538 = vmatpush3.bf16.msra.mxu0 %v5807_v41 }
0x1313   :  { %5539 = vmatprep.subr.bf16.mxu0 %v6409_v1 }
0x1316   :  { %5540 = vmatpush3.bf16.msra.mxu0 %v5808_v62 }
0x13d4   :  { %v4308_v43 = vpop.f32.mrb[20].mxu0 }
0x13d5   :  { %v4314_v3 = vadd.f32 %v4308_v43, %v7365_v39  ;;  %v5499_v22 = vpop.f32.mrb[21].mxu0  ;;  %v4321_v48 = vadd.f32 %v4308_v43, %v4249_v54 }
0x13d6   :  { %v4311_v33 = vpop.f32.mrb[22].mxu0 }
0x13d7   :  { %4323 = vrot.lane.b32.xlu1 %v4321_v48, %s6392_s29  ;;  %v5500_v53 = vpop.f32.mrb[23].mxu0  ;;  %v4315_v32 = vsub.f32 0.0, %v4314_v3  ;;  %s7488_s29 = sld [smem:[#allocation54_spill]]  ;;  %v4983_v48 = vld [vmem:[%s7490_s7] ss:$0 sm:$0xff] }
0x13d8   :  { %v4984_v53 = vld [vmem:[#allocation32] ss:$0 sm:$0xff] }
0x13d9   :  { %v4316_v37 = vmul.f32 1.442695, %v4315_v32 }
0x13db   :  { %5907 = vpow2.f32 %v4316_v37 }
0x13dc   :  { %v4478_v56 = vpop.f32.mrb[24].mxu0 }
0x13dd   :  { %v5515_v4 = vpop.f32.mrb[25].mxu0  ;;  %v5799_v29 = vld [vmem:[%s7488_s29] sm:$0xff]   ;;  %v5801_v11 = vld [vmem:[%s7488_s29 + $0x10] sm:$0xff]   ;;  %v5802_v19 = vld [vmem:[%s7488_s29 + $0x18] sm:$0xff]   ;;  %v4484_v52 = vmax.f32 %v4478_v56, 0.0 }
0x13de   :  { %v4481_v60 = vpop.f32.mrb[26].mxu0  ;;  %v5803_v57 = vld [vmem:[%s7488_s29 + $0x20] sm:$0xff]   ;;  %v5804_v63 = vld [vmem:[%s7488_s29 + $0x28] sm:$0xff]  }
0x13df   :  { %v5516_v38 = vpop.f32.mrb[27].mxu0  ;;  %v4485_v2 = vpack.c.bf16 %v4484_v52, %v4484_v52 }
0x13e5   :  { %v5908_v46 = vpop.eup %5907 }
0x13e6   :  { %v4318_v8 = vadd.f32 1.0, %v5908_v46 }
0x13e8   :  { %5909 = vrcp.f32 %v4318_v8 }
0x13f2   :  { %v5910_v39 = vpop.eup %5909 }
0x13f3   :  { %v4329_v31 = vsub.f32 1.0, %v5910_v39  ;;  %v4335_v28 = vmul.f32 %v5910_v39, %v4266_v47 }
0x1449   :  { %v4324_v0 = vpop.permute.xlu1 %4323 }
0x144a   :  { %v4326_v16 = vmul.f32 %v5910_v39, %v4324_v0  ;;  %v4987_v39 = vld [vmem:[#allocation3] ss:$0 sm:$0xff] }
0x144c   :  { %v4327_v44 = vadd.f32 %v4326_v16, %v4151_v42 }
0x144e   :  { %5911 = vtanh.f32 %v4327_v44 }
0x1458   :  { %v5912_v20 = vpop.eup %5911 }
0x1459   :  { %4331 = vrot.lane.b32.xlu0 %v5912_v20, %s6413_s1 }
0x14cb   :  { %v4332_v35 = vpop.permute.xlu0 %4331 }
0x14cc   :  { %v4334_v13 = vmul.f32 %v4332_v35, %v4329_v31 }
0x14ce   :  { %v4336_v49 = vadd.f32 %v4335_v28, %v4334_v13 }
0x14d0   :  { %v5669_v14 = vpack.i.bf16 %v7385_v55, %v4336_v49  ;;  %v5800_v55 = vld [vmem:[%s7488_s29 + $0x8] sm:$0xff]  }
0x14d2   :  { %5670 = vrot.lane.b32.xlu1 %v5669_v14, %s6414_s24 }
0x1544   :  { %v5671_v51 = vpop.permute.xlu1 %5670 }
0x1545   :  { %v5673_v40 = vunpack.i.h.bf16 %v5671_v51  ;;  %v5672_v23 = vunpack.i.l.bf16 %v5671_v51 }
0x1547   :  { %v4345_v61 = vsel %vm3543_vm11, %v5672_v23, %v5673_v40 }
0x1548   :  { %v4346_v54 = vpack.c.bf16 %v4345_v61, %v4345_v61 }
0x154a   :  { %5506 = vmatmul.mubr.msk.bf16.vlgmr.msra.gmra.mrb[32].mxu1 %vm3545_vm12, %v4346_v54 }
0x154b   :  { %5518 = vmatpush3.bf16.msra.mxu1 %v5799_v29  ;;  %5529 = vmatprep.mubr.msk.bf16.mxu1 %vm6410_vm0, %v6409_v1  ;;  %vm4534_vm0 = vcmask 785408  }
0x154c   :  { %5519 = vmatprep.subr.bf16.mxu1 %v6409_v1 }
0x154f   :  { %5520 = vmatpush3.bf16.msra.mxu1 %v5800_v55 }
0x1550   :  { %5521 = vmatprep.subr.bf16.mxu1 %v6409_v1 }
0x1553   :  { %5522 = vmatpush3.bf16.msra.mxu1 %v5801_v11 }
0x1554   :  { %5523 = vmatprep.subr.bf16.mxu1 %v6409_v1 }
0x1557   :  { %5524 = vmatpush3.bf16.msra.mxu1 %v5802_v19 }
0x1558   :  { %5525 = vmatprep.subr.bf16.mxu1 %v6409_v1 }
0x155b   :  { %5526 = vmatpush3.bf16.msra.mxu1 %v5803_v57 }
0x155c   :  { %5527 = vmatprep.subr.bf16.mxu1 %v6409_v1 }
0x155f   :  { %5528 = vmatpush3.bf16.msra.mxu1 %v5804_v63 }
0x1562   :  { %5530 = vmatmul.mubr.msk.bf16.vlgmr.msra.gmra.mrb[36].mxu1 %vm4534_vm0, %v4485_v2 }
0x161d   :  { %v4400_v7 = vpop.f32.mrb[32].mxu1 }
0x161e   :  { %v4413_v34 = vmul.f32 %v4966_v36, %v4400_v7  ;;  %v5507_v9 = vpop.f32.mrb[33].mxu1 }
0x161f   :  { %v4403_v45 = vpop.f32.mrb[34].mxu1 }
0x1620   :  { %v4421_v10 = vadd.f32 %v4967_v30, %v4413_v34  ;;  %v5508_v50 = vpop.f32.mrb[35].mxu1 }
0x1622   :  { %v4679_v17 = vmul.f32 %v4985_v15, %v4421_v10 }
0x1624   :  { %v4681_v47 = vsel %vm4680_vm3, %v4679_v17, 0.0 }
0x1625   :  { %4682 = vadd.xlane.f32.xlu0 %v4681_v47 }
0x1635   :  { %v4572_v27 = vpop.f32.mrb[36].mxu1 }
0x1636   :  { %v4578_v59 = vmax.f32 %v4572_v27, 0.0  ;;  %v5531_v1 = vpop.f32.mrb[37].mxu1 }
0x1637   :  { %v4575_v43 = vpop.f32.mrb[38].mxu1 }
0x1638   :  { %v4579_v3 = vpack.c.bf16 %v4578_v59, %v4578_v59  ;;  %v5532_v22 = vpop.f32.mrb[39].mxu1 }
0x163a   :  { %5542 = vmatmul.mubr.msk.bf16.vlgmr.msra.gmra.mrb[28].mxu0 %vm4612_vm4, %v4579_v3 }
0x16b2   :  { %v4683_v8 = vpop.xlane.xlu0 %4682 }
0x170d   :  { %v4650_v33 = vpop.f32.mrb[28].mxu0 }
0x170e   :  { %v4663_v25 = vmul.f32 %v4983_v48, %v4650_v33  ;;  %v5543_v24 = vpop.f32.mrb[29].mxu0 }
0x170f   :  { %v4653_v58 = vpop.f32.mrb[30].mxu0 }
0x1710   :  { %v4671_v12 = vadd.f32 %v4984_v53, %v4663_v25  ;;  %v5544_v32 = vpop.f32.mrb[31].mxu0 }
0x1712   :  { %v4691_v37 = vmul.f32 %v4986_v26, %v4671_v12 }
0x1714   :  { %v4692_v46 = vsel %vm3876_vm15, %v4691_v37, 0.0 }
0x1715   :  { %4693 = vadd.xlane.f32.xlu1 %v4692_v46 }
0x17a2   :  { %v4694_v0 = vpop.xlane.xlu1 %4693 }
0x17a3   :  { %v4695_v16 = vadd.f32 %v4694_v0, %v4683_v8 }
0x17a5   :  { %v4703_v42 = vadd.f32 %v4987_v39, %v4695_v16 }
0x17a7   :  { %v4705_v44 = vand.u32 2147483647, %v4703_v42  ;;  %v4704_v28 = vmax.f32 %v4703_v42, 0.0 }
0x17a9   :  { %v4706_v5 = vsub.f32 0.0, %v4705_v44 }
0x17ab   :  { %v4707_v20 = vmul.f32 1.442695, %v4706_v5 }
0x17ad   :  { %5913 = vpow2.f32 %v4707_v20 }
0x17b7   :  { %v5914_v18 = vpop.eup %5913 }
0x17b8   :  { %v4709_v31 = vadd.f32 1.0, %v5914_v18 }
0x17ba   :  { %5915 = vlog2.f32 %v4709_v31 }
0x17c4   :  { %v5916_v35 = vpop.eup %5915 }
0x17c5   :  { %v4711_v13 = vmul.f32 0.6931472, %v5916_v35 }
0x17c7   :  { %v4712_v49 = vadd.f32 %v4711_v13, %v4704_v28 }
0x17c9   :  { %4714 = vst.msk [vmem:[%s6586_s5] sm:$0x3] %vm4713_vm5, %v4712_v49 }
0x17ca   :  { %4719 = vsyncpa [#allocation5], 1 }
0x17cb   :  { %4720 = vsyncpa [#allocation7], 1 }
0x17cc   :  { %4721 = vsyncpa [#allocation10], 1 }
0x17cd   :  { %4722 = vsyncpa [#allocation13], 1 }
0x17ce   :  { %4723 = vsyncpa [#allocation16], 1 }
0x17cf   :  { %4724 = vsyncpa [#allocation19], 1 }
0x17d0   :  { %4725 = vsyncpa [#allocation22], 1 }
0x17d1   :  { %4726 = vsyncpa [#allocation25], 1 }
0x17d2   :  { %4727 = vsyncpa [#allocation28], 1 }
0x17d3   :  { %4728 = vsyncpa [#allocation31], 1 }

</bundles_post_ra>
